<compile_context>
chip_gen: v7x
topology: tpu7x:2x2x1
jax: 0.10.0
libtpu: 0.0.40
codegen_flags: <defaults>
</compile_context>

<pallas_src>
import math

import jax
import jax.numpy as jnp
from jax.experimental import pallas as pl
from jax.experimental.pallas import tpu as pltpu

# ----------------------------- model config ---------------------------------
HIDDEN = 32          # transformer d_model
NHEAD = 4            # attention heads
DHEAD = HIDDEN // NHEAD
FFN = 64             # feed-forward dim
NUM_QUERIES = 8      # object queries
DETR_CLASSES = 91    # original DETR class_embed: 91 + 1 = 92 outputs
CLASS_OUT = DETR_CLASSES + 1
NUM_CLASSES = 1      # DETRModel(num_classes=1) -> final Linear(92, 2)
FINAL_OUT = NUM_CLASSES + 1
LANE = 128           # lane-dense padding target for narrow head outputs
CF = 16              # backbone feature channels fed to input_proj

# ------------------------ weight-slab index constants -------------------------
# (N, 32, 32) attention / bbox-MLP matrix slab
W_ENC_Q, W_ENC_K, W_ENC_V, W_ENC_O = 0, 1, 2, 3
W_DS_Q, W_DS_K, W_DS_V, W_DS_O = 4, 5, 6, 7
W_DC_Q, W_DC_K, W_DC_V, W_DC_O = 8, 9, 10, 11
W_BBOX1, W_BBOX2 = 12, 13

# (N, 32) bias / LayerNorm slab
B_PROJ = 0
B_ENC_Q, B_ENC_K, B_ENC_V, B_ENC_O = 1, 2, 3, 4
B_ENC_N1G, B_ENC_N1B = 5, 6
B_ENC_L2, B_ENC_N2G, B_ENC_N2B = 7, 8, 9
B_DS_Q, B_DS_K, B_DS_V, B_DS_O = 10, 11, 12, 13
B_DEC_N1G, B_DEC_N1B = 14, 15
B_DC_Q, B_DC_K, B_DC_V, B_DC_O = 16, 17, 18, 19
B_DEC_N2G, B_DEC_N2B = 20, 21
B_DEC_L2, B_DEC_N3G, B_DEC_N3B = 22, 23, 24
B_DECNORM_G, B_DECNORM_B = 25, 26
B_BBOX1, B_BBOX2 = 27, 28

# (2, 32, 64)/(2, 64, 32)/(2, 64) FFN slabs
FFN_ENC, FFN_DEC = 0, 1
# (2, 32, 128) lane-padded head weight slab, (3, 128) head bias slab
HW_CLASS, HW_BBOX3 = 0, 1
HB_CLASS, HB_OUT, HB_BBOX3 = 0, 1, 2


# ----------------------------- in-kernel helpers ------------------------------
def _layer_norm(x, g, b, eps=1e-5):
    mean = jnp.mean(x, axis=-1, keepdims=True)
    var = jnp.mean((x - mean) ** 2, axis=-1, keepdims=True)
    return (x - mean) * jax.lax.rsqrt(var + eps) * g + b


def _linear(x, w, b, relu=False):
    y = jnp.dot(x, w, preferred_element_type=jnp.float32) + b
    return jnp.maximum(y, 0.0) if relu else y


def _mha(q, k, v, masks):
    """Multi-head attention with the heads stacked along the sublane axis.

    q: (Sq, E), k/v: (Sk, E), masks: list of NHEAD (1, E) f32 column masks.
    q is pre-scaled (1/sqrt(d_head) folded into Wq/bq). Masking q per head and
    contracting against the FULL k/v is equivalent to slicing per-head columns,
    so QK^T and PV are each a single MXU matmul; the softmax runs once over the
    stacked (NHEAD*Sq, Sk) scores.
    """
    Sq, E = q.shape
    q_h = jnp.concatenate([q * masks[h] for h in range(NHEAD)], axis=0)    # (NHEAD*Sq, E)
    s = jax.lax.dot_general(q_h, k, (((1,), (1,)), ((), ())),
                            preferred_element_type=jnp.float32)            # (NHEAD*Sq, Sk)
    m = jnp.max(s, axis=-1, keepdims=True)
    p = jnp.exp(s - m)
    p = p * pl.reciprocal(jnp.sum(p, axis=-1, keepdims=True), approx=True)
    pv = jnp.dot(p, v, preferred_element_type=jnp.float32)                 # (NHEAD*Sq, E)
    out = pv[0:Sq, :] * masks[0]
    for h in range(1, NHEAD):
        out = out + pv[h * Sq:(h + 1) * Sq, :] * masks[h]
    return out                                                              # (Sq, E)


# ----------------------------- fused Pallas kernel -----------------------------
def _detr_fused_kernel(tokens_ref, pos_ref, qpos_ref,
                       projw_ref, w32_ref, b32_ref,
                       ffn1_ref, ffn2_ref, b64_ref,
                       headw_ref, outw_ref, headb_ref,
                       logits_ref, boxes_ref):
    """One batch element per grid step: input_proj + encoder layer + decoder layer
    (+ final decoder LN) + class/bbox heads, all intermediates kept in VMEM."""
    tokens = tokens_ref[...]                                 # (S, CF)
    pos = pos_ref[...]                                       # (S, E)
    qpos = qpos_ref[...]                                     # (Q, E)

    def w32(i):
        return w32_ref[i]                                    # (32, 32) static slab slice

    def b32(i):
        return b32_ref[i:i + 1, :]                           # (1, 32) static slab slice

    # per-head column masks (compile-time constant pattern, built once per step)
    col = jax.lax.broadcasted_iota(jnp.int32, (1, HIDDEN), 1)
    masks = [((col >= h * DHEAD) & (col < (h + 1) * DHEAD)).astype(jnp.float32)
             for h in range(NHEAD)]

    # ---------------- encoder layer (includes input_proj 1x1 conv) ----------------
    src = _linear(tokens, projw_ref[...], b32(B_PROJ))       # (S, E)
    qk_in = src + pos
    q = _linear(qk_in, w32(W_ENC_Q), b32(B_ENC_Q))           # scale folded into Wq/bq
    k = _linear(qk_in, w32(W_ENC_K), b32(B_ENC_K))
    v = _linear(src, w32(W_ENC_V), b32(B_ENC_V))
    a = _linear(_mha(q, k, v, masks), w32(W_ENC_O), b32(B_ENC_O))
    src = _layer_norm(src + a, b32(B_ENC_N1G), b32(B_ENC_N1B))
    h = _linear(src, ffn1_ref[FFN_ENC], b64_ref[FFN_ENC:FFN_ENC + 1, :], relu=True)
    f = _linear(h, ffn2_ref[FFN_ENC], b32(B_ENC_L2))
    memory = _layer_norm(src + f, b32(B_ENC_N2G), b32(B_ENC_N2B))   # stays in VMEM

    # ---------------- decoder layer (DETR decoder starts from zeros) --------------
    tgt = jnp.zeros_like(qpos)

    # self-attention (q = k = tgt + query_pos, v = tgt)
    qk_in = tgt + qpos
    q = _linear(qk_in, w32(W_DS_Q), b32(B_DS_Q))
    k = _linear(qk_in, w32(W_DS_K), b32(B_DS_K))
    v = _linear(tgt, w32(W_DS_V), b32(B_DS_V))
    a = _linear(_mha(q, k, v, masks), w32(W_DS_O), b32(B_DS_O))
    tgt = _layer_norm(tgt + a, b32(B_DEC_N1G), b32(B_DEC_N1B))

    # cross-attention (q = tgt + query_pos, k = memory + pos, v = memory)
    q = _linear(tgt + qpos, w32(W_DC_Q), b32(B_DC_Q))
    k = _linear(memory + pos, w32(W_DC_K), b32(B_DC_K))
    v = _linear(memory, w32(W_DC_V), b32(B_DC_V))
    a = _linear(_mha(q, k, v, masks), w32(W_DC_O), b32(B_DC_O))
    tgt = _layer_norm(tgt + a, b32(B_DEC_N2G), b32(B_DEC_N2B))

    # feed-forward
    h = _linear(tgt, ffn1_ref[FFN_DEC], b64_ref[FFN_DEC:FFN_DEC + 1, :], relu=True)
    f = _linear(h, ffn2_ref[FFN_DEC], b32(B_DEC_L2))
    tgt = _layer_norm(tgt + f, b32(B_DEC_N3G), b32(B_DEC_N3B))

    # final decoder LayerNorm
    hs = _layer_norm(tgt, b32(B_DECNORM_G), b32(B_DECNORM_B))        # (Q, E), stays in VMEM

    # ---------------- prediction heads (lane-padded to 128) -----------------------
    # NOTE: padded rows/cols of headw/outw/headb are zero-initialized; they must stay
    # zero so logits columns beyond 92/2 never leak into the 92->2 matmul.
    c = _linear(hs, headw_ref[HW_CLASS], headb_ref[HB_CLASS:HB_CLASS + 1, :])   # 32->92 (pad 128)
    logits = _linear(c, outw_ref[...], headb_ref[HB_OUT:HB_OUT + 1, :])         # 92->2  (pad 128)
    logits_ref[...] = logits.astype(logits_ref.dtype)

    bh = _linear(hs, w32(W_BBOX1), b32(B_BBOX1), relu=True)
    bh = _linear(bh, w32(W_BBOX2), b32(B_BBOX2), relu=True)
    bx = _linear(bh, headw_ref[HW_BBOX3], headb_ref[HB_BBOX3:HB_BBOX3 + 1, :])  # 32->4 (pad 128)
    boxes_ref[...] = (1.0 / (1.0 + jnp.exp(-bx))).astype(boxes_ref.dtype)


# ----------------------------- pallas_call wrapper -----------------------------
def detr_transformer_pallas(tokens, prep):
    """tokens: (B, S, CF) backbone features. Returns lane-padded (B,Q,128) logits/boxes."""
    B, S, Cf = tokens.shape
    pos, qpos = prep['pos'], prep['qpos']

    args = (tokens, pos, qpos, prep['proj_w'], prep['w32'], prep['b32'],
            prep['ffn1'], prep['ffn2'], prep['b64'],
            prep['headw'], prep['outw'], prep['headb'])

    in_specs = [
        pl.BlockSpec((None, S, Cf), lambda b: (b, 0, 0)),            # tokens  (per batch)
        pl.BlockSpec(pos.shape, lambda b: (0, 0)),                   # pos     (shared)
        pl.BlockSpec(qpos.shape, lambda b: (0, 0)),                  # queries (shared)
        pl.BlockSpec(prep['proj_w'].shape, lambda b: (0, 0)),        # input_proj weight
        pl.BlockSpec(prep['w32'].shape, lambda b: (0, 0, 0)),        # (14,32,32) slab
        pl.BlockSpec(prep['b32'].shape, lambda b: (0, 0)),           # (29,32) slab
        pl.BlockSpec(prep['ffn1'].shape, lambda b: (0, 0, 0)),       # (2,32,64) slab
        pl.BlockSpec(prep['ffn2'].shape, lambda b: (0, 0, 0)),       # (2,64,32) slab
        pl.BlockSpec(prep['b64'].shape, lambda b: (0, 0)),           # (2,64) slab
        pl.BlockSpec(prep['headw'].shape, lambda b: (0, 0, 0)),      # (2,32,128) slab
        pl.BlockSpec(prep['outw'].shape, lambda b: (0, 0)),          # (128,128)
        pl.BlockSpec(prep['headb'].shape, lambda b: (0, 0)),         # (3,128) slab
    ]
    out_specs = (
        pl.BlockSpec((None, NUM_QUERIES, LANE), lambda b: (b, 0, 0)),
        pl.BlockSpec((None, NUM_QUERIES, LANE), lambda b: (b, 0, 0)),
    )
    out_shape = (jax.ShapeDtypeStruct((B, NUM_QUERIES, LANE), jnp.float32),
                 jax.ShapeDtypeStruct((B, NUM_QUERIES, LANE), jnp.float32))

    return pl.pallas_call(
        _detr_fused_kernel,
        out_shape=out_shape,
        grid=(B,),
        in_specs=in_specs,
        out_specs=out_specs,
        compiler_params=pltpu.CompilerParams(dimension_semantics=("parallel",)),
    )(*args)


# ----------------------------- plain-JAX glue ----------------------------------
def conv2d_relu(x_nhwc, w_hwio, b, stride):
    # tiny 3x3 backbone convs: XLA's native TPU conv path (no HBM-materialized im2col)
    y = jax.lax.conv_general_dilated(
        x_nhwc, w_hwio, window_strides=(stride, stride), padding=((1, 1), (1, 1)),
        dimension_numbers=('NHWC', 'HWIO', 'NHWC'))
    return jnp.maximum(y + b, 0.0)


def sine_pos_embed(B, H, W, hidden):
    """DETR PositionEmbeddingSine (normalize=True, no padding mask). -> [B, H*W, hidden]."""
    num_pos_feats = hidden // 2
    temperature = 10000.0
    scale = 2 * math.pi
    eps = 1e-6
    ones = jnp.ones((B, H, W), dtype=jnp.float32)
    y_embed = jnp.cumsum(ones, axis=1)
    x_embed = jnp.cumsum(ones, axis=2)
    y_embed = y_embed / (y_embed[:, -1:, :] + eps) * scale
    x_embed = x_embed / (x_embed[:, :, -1:] + eps) * scale
    dim_t = jnp.arange(num_pos_feats, dtype=jnp.float32)
    dim_t = temperature ** (2 * jnp.floor(dim_t / 2) / num_pos_feats)
    pos_x = x_embed[..., None] / dim_t
    pos_y = y_embed[..., None] / dim_t
    pos_x = jnp.stack([jnp.sin(pos_x[..., 0::2]), jnp.cos(pos_x[..., 1::2])], axis=4).reshape(B, H, W, -1)
    pos_y = jnp.stack([jnp.sin(pos_y[..., 0::2]), jnp.cos(pos_y[..., 1::2])], axis=4).reshape(B, H, W, -1)
    pos = jnp.concatenate([pos_y, pos_x], axis=3)
    return pos.reshape(B, H * W, hidden)


# ----------------------------- parameters --------------------------------------
def _lin(key, fan_in, fan_out):
    return (0.02 * jax.random.normal(key, (fan_in, fan_out), dtype=jnp.float32),
            jnp.zeros((fan_out,), jnp.float32))


def _attn_params(key):
    ks = jax.random.split(key, 4)
    p = {}
    p['wq'], p['bq'] = _lin(ks[0], HIDDEN, HIDDEN)
    p['wk'], p['bk'] = _lin(ks[1], HIDDEN, HIDDEN)
    p['wv'], p['bv'] = _lin(ks[2], HIDDEN, HIDDEN)
    p['wo'], p['bo'] = _lin(ks[3], HIDDEN, HIDDEN)
    return p


def _enc_dec_layer_params(key, cross):
    ks = jax.random.split(key, 4)
    p = {'self_attn': _attn_params(ks[0])}
    if cross:
        p['cross_attn'] = _attn_params(ks[1])
    p['lin1_w'], p['lin1_b'] = _lin(ks[2], HIDDEN, FFN)
    p['lin2_w'], p['lin2_b'] = _lin(ks[3], FFN, HIDDEN)
    for n in (['norm1', 'norm2', 'norm3'] if cross else ['norm1', 'norm2']):
        p[n + '_g'] = jnp.ones((HIDDEN,), jnp.float32)
        p[n + '_b'] = jnp.zeros((HIDDEN,), jnp.float32)
    return p


def init_params(key):
    ks = jax.random.split(key, 12)
    p = {}
    # tiny conv backbone (HWIO layout for lax.conv)
    p['conv1_w'] = 0.02 * jax.random.normal(ks[0], (3, 3, 3, 8), dtype=jnp.float32)
    p['conv1_b'] = jnp.zeros((8,), jnp.float32)
    p['conv2_w'] = 0.02 * jax.random.normal(ks[1], (3, 3, 8, CF), dtype=jnp.float32)
    p['conv2_b'] = jnp.zeros((CF,), jnp.float32)
    # input_proj 1x1 conv
    p['proj_w'], p['proj_b'] = _lin(ks[2], CF, HIDDEN)
    # transformer
    p['enc'] = _enc_dec_layer_params(ks[3], cross=False)
    p['dec'] = _enc_dec_layer_params(ks[4], cross=True)
    p['dec_norm_g'] = jnp.ones((HIDDEN,), jnp.float32)
    p['dec_norm_b'] = jnp.zeros((HIDDEN,), jnp.float32)
    p['query_embed'] = 0.02 * jax.random.normal(ks[5], (NUM_QUERIES, HIDDEN), dtype=jnp.float32)
    # heads
    p['class_w'], p['class_b'] = _lin(ks[6], HIDDEN, CLASS_OUT)
    p['bbox1_w'], p['bbox1_b'] = _lin(ks[7], HIDDEN, HIDDEN)
    p['bbox2_w'], p['bbox2_b'] = _lin(ks[8], HIDDEN, HIDDEN)
    p['bbox3_w'], p['bbox3_b'] = _lin(ks[9], HIDDEN, 4)
    # DETRModel.out : Linear(class_embed.out_features=92 -> num_classes+1=2)
    p['out_w'], p['out_b'] = _lin(ks[10], CLASS_OUT, FINAL_OUT)
    return p


def prepare_forward(params, image_hw):
    """One-time, forward-invariant preprocessing hoisted out of the per-call path:
    q-scale fold, weight-slab packing, lane-padding of the narrow heads, and the
    sine positional embedding (a pure function of the feature-map size)."""
    scale = 1.0 / math.sqrt(DHEAD)
    ep, dp = params['enc'], params['dec']
    esa, dsa, dca = ep['self_attn'], dp['self_attn'], dp['cross_attn']

    w32 = jnp.stack([
        esa['wq'] * scale, esa['wk'], esa['wv'], esa['wo'],
        dsa['wq'] * scale, dsa['wk'], dsa['wv'], dsa['wo'],
        dca['wq'] * scale, dca['wk'], dca['wv'], dca['wo'],
        params['bbox1_w'], params['bbox2_w'],
    ], axis=0)                                               # (14, 32, 32)

    b32 = jnp.stack([
        params['proj_b'],
        esa['bq'] * scale, esa['bk'], esa['bv'], esa['bo'],
        ep['norm1_g'], ep['norm1_b'],
        ep['lin2_b'], ep['norm2_g'], ep['norm2_b'],
        dsa['bq'] * scale, dsa['bk'], dsa['bv'], dsa['bo'],
        dp['norm1_g'], dp['norm1_b'],
        dca['bq'] * scale, dca['bk'], dca['bv'], dca['bo'],
        dp['norm2_g'], dp['norm2_b'],
        dp['lin2_b'], dp['norm3_g'], dp['norm3_b'],
        params['dec_norm_g'], params['dec_norm_b'],
        params['bbox1_b'], params['bbox2_b'],
    ], axis=0)                                               # (29, 32)

    ffn1 = jnp.stack([ep['lin1_w'], dp['lin1_w']], axis=0)   # (2, 32, 64)
    ffn2 = jnp.stack([ep['lin2_w'], dp['lin2_w']], axis=0)   # (2, 64, 32)
    b64 = jnp.stack([ep['lin1_b'], dp['lin1_b']], axis=0)    # (2, 64)

    # Lane-padded head weights; padded rows/cols MUST stay zero (see kernel comment).
    class_w_pad = jnp.zeros((HIDDEN, LANE), jnp.float32).at[:, :CLASS_OUT].set(params['class_w'])
    bbox3_w_pad = jnp.zeros((HIDDEN, LANE), jnp.float32).at[:, :4].set(params['bbox3_w'])
    headw = jnp.stack([class_w_pad, bbox3_w_pad], axis=0)    # (2, 32, 128)
    outw = jnp.zeros((LANE, LANE), jnp.float32).at[:CLASS_OUT, :FINAL_OUT].set(params['out_w'])
    headb = jnp.stack([
        jnp.zeros((LANE,), jnp.float32).at[:CLASS_OUT].set(params['class_b']),
        jnp.zeros((LANE,), jnp.float32).at[:FINAL_OUT].set(params['out_b']),
        jnp.zeros((LANE,), jnp.float32).at[:4].set(params['bbox3_b']),
    ], axis=0)                                               # (3, 128)

    # feature-map size after two stride-2 / pad-1 / 3x3 convs
    h, w = image_hw
    ho = (h - 1) // 2 + 1
    wo = (w - 1) // 2 + 1
    ho = (ho - 1) // 2 + 1
    wo = (wo - 1) // 2 + 1
    pos = sine_pos_embed(1, ho, wo, HIDDEN)[0]               # (S, HIDDEN), batch-invariant

    return {
        'conv1_w': params['conv1_w'], 'conv1_b': params['conv1_b'],
        'conv2_w': params['conv2_w'], 'conv2_b': params['conv2_b'],
        'proj_w': params['proj_w'],
        'w32': w32, 'b32': b32, 'ffn1': ffn1, 'ffn2': ffn2, 'b64': b64,
        'headw': headw, 'outw': outw, 'headb': headb,
        'qpos': params['query_embed'], 'pos': pos,
    }


# ----------------------------- forward ------------------------------------------
def detr_forward(prep, images):
    """images: [B, 3, H, W] (NCHW). Returns dict(pred_logits [B,Q,2], pred_boxes [B,Q,4])."""
    x = jnp.transpose(images, (0, 2, 3, 1)).astype(jnp.float32)   # NCHW -> NHWC

    # backbone: two strided 3x3 convs + ReLU (XLA conv), then tokenize
    feat = conv2d_relu(x, prep['conv1_w'], prep['conv1_b'], 2)
    feat = conv2d_relu(feat, prep['conv2_w'], prep['conv2_b'], 2)
    B, Ho, Wo, Cf = feat.shape
    tokens = feat.reshape(B, Ho * Wo, Cf)

    # single fused Pallas kernel: input_proj + encoder + decoder + heads
    logits_pad, boxes_pad = detr_transformer_pallas(tokens, prep)

    pred_logits = logits_pad[:, :, :FINAL_OUT]
    pred_boxes = boxes_pad[:, :, :4]
    return {'pred_logits': pred_logits, 'pred_boxes': pred_boxes}


if __name__ == "__main__":
    key = jax.random.PRNGKey(0)
    pkey, xkey = jax.random.split(key)
    params = init_params(pkey)
    images = jax.random.normal(xkey, (2, 3, 32, 32), dtype=jnp.float32)  # NCHW, like PyTorch

    prep = prepare_forward(params, image_hw=(32, 32))   # one-time hoisted preprocessing
    out = jax.jit(detr_forward)(prep, images)
    jax.block_until_ready(out)

    assert out['pred_logits'].shape == (2, NUM_QUERIES, FINAL_OUT)
    assert out['pred_boxes'].shape == (2, NUM_QUERIES, 4)
    assert bool(jnp.all(jnp.isfinite(out['pred_logits'])))
    assert bool(jnp.all((out['pred_boxes'] >= 0) & (out['pred_boxes'] <= 1)))
    print("KERNEL_OK")
</pallas_src>

<mosaic_0001>
module attributes {stable_mosaic.version = 11 : i64} {
  func.func @_detr_fused_kernel(%arg0: i32, %arg1: memref<1x64x16xf32, #tpu.memory_space<vmem>>, %arg2: memref<64x32xf32, #tpu.memory_space<vmem>>, %arg3: memref<8x32xf32, #tpu.memory_space<vmem>>, %arg4: memref<16x32xf32, #tpu.memory_space<vmem>>, %arg5: memref<14x32x32xf32, #tpu.memory_space<vmem>>, %arg6: memref<29x32xf32, #tpu.memory_space<vmem>>, %arg7: memref<2x32x64xf32, #tpu.memory_space<vmem>>, %arg8: memref<2x64x32xf32, #tpu.memory_space<vmem>>, %arg9: memref<2x64xf32, #tpu.memory_space<vmem>>, %arg10: memref<2x32x128xf32, #tpu.memory_space<vmem>>, %arg11: memref<128x128xf32, #tpu.memory_space<vmem>>, %arg12: memref<3x128xf32, #tpu.memory_space<vmem>>, %arg13: memref<1x8x128xf32, #tpu.memory_space<vmem>>, %arg14: memref<1x8x128xf32, #tpu.memory_space<vmem>>) attributes {dimension_semantics = [#tpu.dimension_semantics<parallel>], iteration_bounds = array<i64: 2>, scalar_prefetch = 0 : i64, scratch_operands = 0 : i64, tpu.core_type = #tpu.core_type<tc>, window_params = [{transform_indices = @transform_0, window_bounds = array<i64: 1, 64, 16>}, {pipeline_mode = #tpu.pipeline_mode<synchronous>, transform_indices = @transform_1, window_bounds = array<i64: 64, 32>}, {pipeline_mode = #tpu.pipeline_mode<synchronous>, transform_indices = @transform_2, window_bounds = array<i64: 8, 32>}, {pipeline_mode = #tpu.pipeline_mode<synchronous>, transform_indices = @transform_3, window_bounds = array<i64: 16, 32>}, {pipeline_mode = #tpu.pipeline_mode<synchronous>, transform_indices = @transform_4, window_bounds = array<i64: 14, 32, 32>}, {pipeline_mode = #tpu.pipeline_mode<synchronous>, transform_indices = @transform_5, window_bounds = array<i64: 29, 32>}, {pipeline_mode = #tpu.pipeline_mode<synchronous>, transform_indices = @transform_6, window_bounds = array<i64: 2, 32, 64>}, {pipeline_mode = #tpu.pipeline_mode<synchronous>, transform_indices = @transform_7, window_bounds = array<i64: 2, 64, 32>}, {pipeline_mode = #tpu.pipeline_mode<synchronous>, transform_indices = @transform_8, window_bounds = array<i64: 2, 64>}, {pipeline_mode = #tpu.pipeline_mode<synchronous>, transform_indices = @transform_9, window_bounds = array<i64: 2, 32, 128>}, {pipeline_mode = #tpu.pipeline_mode<synchronous>, transform_indices = @transform_10, window_bounds = array<i64: 128, 128>}, {pipeline_mode = #tpu.pipeline_mode<synchronous>, transform_indices = @transform_11, window_bounds = array<i64: 3, 128>}, {transform_indices = @transform_12, window_bounds = array<i64: 1, 8, 128>}, {transform_indices = @transform_13, window_bounds = array<i64: 1, 8, 128>}]} {
    %c0 = arith.constant 0 : index
    %c0_0 = arith.constant 0 : index
    %c0_1 = arith.constant 0 : index
    %0 = vector.load %arg1[%c0, %c0_0, %c0_1] : memref<1x64x16xf32, #tpu.memory_space<vmem>>, vector<1x64x16xf32>
    %1 = vector.shape_cast %0 : vector<1x64x16xf32> to vector<64x16xf32>
    %c0_2 = arith.constant 0 : index
    %c0_3 = arith.constant 0 : index
    %2 = vector.load %arg2[%c0_2, %c0_3] : memref<64x32xf32, #tpu.memory_space<vmem>>, vector<64x32xf32>
    %c0_4 = arith.constant 0 : index
    %c0_5 = arith.constant 0 : index
    %3 = vector.load %arg3[%c0_4, %c0_5] : memref<8x32xf32, #tpu.memory_space<vmem>>, vector<8x32xf32>
    %4 = tpu.iota {dimensions = array<i32: 1>} : vector<1x32xi32>
    %c0_i32 = arith.constant 0 : i32
    %5 = vector.broadcast %c0_i32 : i32 to vector<1x32xi32>
    %6 = arith.cmpi sge, %4, %5 : vector<1x32xi32>
    %c8_i32 = arith.constant 8 : i32
    %7 = vector.broadcast %c8_i32 : i32 to vector<1x32xi32>
    %8 = arith.cmpi slt, %4, %7 : vector<1x32xi32>
    %9 = arith.andi %6, %8 : vector<1x32xi1>
    %10 = arith.extui %9 : vector<1x32xi1> to vector<1x32xi32>
    %11 = arith.sitofp %10 : vector<1x32xi32> to vector<1x32xf32>
    %c8_i32_6 = arith.constant 8 : i32
    %12 = vector.broadcast %c8_i32_6 : i32 to vector<1x32xi32>
    %13 = arith.cmpi sge, %4, %12 : vector<1x32xi32>
    %c16_i32 = arith.constant 16 : i32
    %14 = vector.broadcast %c16_i32 : i32 to vector<1x32xi32>
    %15 = arith.cmpi slt, %4, %14 : vector<1x32xi32>
    %16 = arith.andi %13, %15 : vector<1x32xi1>
    %17 = arith.extui %16 : vector<1x32xi1> to vector<1x32xi32>
    %18 = arith.sitofp %17 : vector<1x32xi32> to vector<1x32xf32>
    %c16_i32_7 = arith.constant 16 : i32
    %19 = vector.broadcast %c16_i32_7 : i32 to vector<1x32xi32>
    %20 = arith.cmpi sge, %4, %19 : vector<1x32xi32>
    %c24_i32 = arith.constant 24 : i32
    %21 = vector.broadcast %c24_i32 : i32 to vector<1x32xi32>
    %22 = arith.cmpi slt, %4, %21 : vector<1x32xi32>
    %23 = arith.andi %20, %22 : vector<1x32xi1>
    %24 = arith.extui %23 : vector<1x32xi1> to vector<1x32xi32>
    %25 = arith.sitofp %24 : vector<1x32xi32> to vector<1x32xf32>
    %c24_i32_8 = arith.constant 24 : i32
    %26 = vector.broadcast %c24_i32_8 : i32 to vector<1x32xi32>
    %27 = arith.cmpi sge, %4, %26 : vector<1x32xi32>
    %c32_i32 = arith.constant 32 : i32
    %28 = vector.broadcast %c32_i32 : i32 to vector<1x32xi32>
    %29 = arith.cmpi slt, %4, %28 : vector<1x32xi32>
    %30 = arith.andi %27, %29 : vector<1x32xi1>
    %31 = arith.extui %30 : vector<1x32xi1> to vector<1x32xi32>
    %32 = arith.sitofp %31 : vector<1x32xi32> to vector<1x32xf32>
    %c0_9 = arith.constant 0 : index
    %c0_10 = arith.constant 0 : index
    %33 = vector.load %arg4[%c0_9, %c0_10] : memref<16x32xf32, #tpu.memory_space<vmem>>, vector<16x32xf32>
    %c0_11 = arith.constant 0 : index
    %c0_12 = arith.constant 0 : index
    %34 = vector.load %arg6[%c0_11, %c0_12] : memref<29x32xf32, #tpu.memory_space<vmem>>, vector<1x32xf32>
    %cst = arith.constant dense<0.000000e+00> : vector<64x32xf32>
    %35 = tpu.matmul %1, %33, %cst {dimension_numbers = #tpu.dot_dimension_numbers<[1], [0], [0], [1], [0, 0, 1, 1], [], []>} : vector<64x16xf32>, vector<16x32xf32>, vector<64x32xf32> -> vector<64x32xf32>
    %36 = vector.broadcast %34 : vector<1x32xf32> to vector<64x32xf32>
    %37 = arith.addf %35, %36 : vector<64x32xf32>
    %38 = arith.addf %37, %2 : vector<64x32xf32>
    %c0_13 = arith.constant 0 : index
    %c0_14 = arith.constant 0 : index
    %c0_15 = arith.constant 0 : index
    %39 = vector.load %arg5[%c0_13, %c0_14, %c0_15] : memref<14x32x32xf32, #tpu.memory_space<vmem>>, vector<1x32x32xf32>
    %40 = vector.shape_cast %39 : vector<1x32x32xf32> to vector<32x32xf32>
    %c1 = arith.constant 1 : index
    %c0_16 = arith.constant 0 : index
    %41 = vector.load %arg6[%c1, %c0_16] : memref<29x32xf32, #tpu.memory_space<vmem>>, vector<1x32xf32>
    %cst_17 = arith.constant dense<0.000000e+00> : vector<64x32xf32>
    %42 = tpu.matmul %38, %40, %cst_17 {dimension_numbers = #tpu.dot_dimension_numbers<[1], [0], [0], [1], [0, 0, 1, 1], [], []>} : vector<64x32xf32>, vector<32x32xf32>, vector<64x32xf32> -> vector<64x32xf32>
    %43 = vector.broadcast %41 : vector<1x32xf32> to vector<64x32xf32>
    %44 = arith.addf %42, %43 : vector<64x32xf32>
    %c1_18 = arith.constant 1 : index
    %c0_19 = arith.constant 0 : index
    %c0_20 = arith.constant 0 : index
    %45 = vector.load %arg5[%c1_18, %c0_19, %c0_20] : memref<14x32x32xf32, #tpu.memory_space<vmem>>, vector<1x32x32xf32>
    %46 = vector.shape_cast %45 : vector<1x32x32xf32> to vector<32x32xf32>
    %c2 = arith.constant 2 : index
    %c0_21 = arith.constant 0 : index
    %47 = vector.load %arg6[%c2, %c0_21] : memref<29x32xf32, #tpu.memory_space<vmem>>, vector<1x32xf32>
    %cst_22 = arith.constant dense<0.000000e+00> : vector<64x32xf32>
    %48 = tpu.matmul %38, %46, %cst_22 {dimension_numbers = #tpu.dot_dimension_numbers<[1], [0], [0], [1], [0, 0, 1, 1], [], []>} : vector<64x32xf32>, vector<32x32xf32>, vector<64x32xf32> -> vector<64x32xf32>
    %49 = vector.broadcast %47 : vector<1x32xf32> to vector<64x32xf32>
    %50 = arith.addf %48, %49 : vector<64x32xf32>
    %c2_23 = arith.constant 2 : index
    %c0_24 = arith.constant 0 : index
    %c0_25 = arith.constant 0 : index
    %51 = vector.load %arg5[%c2_23, %c0_24, %c0_25] : memref<14x32x32xf32, #tpu.memory_space<vmem>>, vector<1x32x32xf32>
    %52 = vector.shape_cast %51 : vector<1x32x32xf32> to vector<32x32xf32>
    %c3 = arith.constant 3 : index
    %c0_26 = arith.constant 0 : index
    %53 = vector.load %arg6[%c3, %c0_26] : memref<29x32xf32, #tpu.memory_space<vmem>>, vector<1x32xf32>
    %cst_27 = arith.constant dense<0.000000e+00> : vector<64x32xf32>
    %54 = tpu.matmul %37, %52, %cst_27 {dimension_numbers = #tpu.dot_dimension_numbers<[1], [0], [0], [1], [0, 0, 1, 1], [], []>} : vector<64x32xf32>, vector<32x32xf32>, vector<64x32xf32> -> vector<64x32xf32>
    %55 = vector.broadcast %53 : vector<1x32xf32> to vector<64x32xf32>
    %56 = arith.addf %54, %55 : vector<64x32xf32>
    %57 = vector.broadcast %11 : vector<1x32xf32> to vector<64x32xf32>
    %58 = arith.mulf %44, %57 : vector<64x32xf32>
    %59 = vector.broadcast %18 : vector<1x32xf32> to vector<64x32xf32>
    %60 = arith.mulf %44, %59 : vector<64x32xf32>
    %61 = vector.broadcast %25 : vector<1x32xf32> to vector<64x32xf32>
    %62 = arith.mulf %44, %61 : vector<64x32xf32>
    %63 = vector.broadcast %32 : vector<1x32xf32> to vector<64x32xf32>
    %64 = arith.mulf %44, %63 : vector<64x32xf32>
    %65 = tpu.concatenate %58, %60, %62, %64 in 0 : vector<64x32xf32>, vector<64x32xf32>, vector<64x32xf32>, vector<64x32xf32> -> vector<256x32xf32>
    %cst_28 = arith.constant dense<0.000000e+00> : vector<256x64xf32>
    %66 = tpu.matmul %65, %50, %cst_28 {dimension_numbers = #tpu.dot_dimension_numbers<[1], [1], [0], [0], [0, 0, 1, 0], [], []>} : vector<256x32xf32>, vector<64x32xf32>, vector<256x64xf32> -> vector<256x64xf32>
    %cst_29 = arith.constant dense<0xFF800000> : vector<256xf32>
    %67 = vector.multi_reduction <maximumf>, %66, %cst_29 [1] : vector<256x64xf32> to vector<256xf32>
    %68 = vector.shape_cast %67 : vector<256xf32> to vector<256x1xf32>
    %69 = vector.broadcast %68 : vector<256x1xf32> to vector<256x64xf32>
    %70 = arith.subf %66, %69 : vector<256x64xf32>
    %71 = math.exp %70 : vector<256x64xf32>
    %cst_30 = arith.constant dense<0.000000e+00> : vector<256xf32>
    %72 = vector.multi_reduction <add>, %71, %cst_30 [1] : vector<256x64xf32> to vector<256xf32>
    %73 = vector.shape_cast %72 : vector<256xf32> to vector<256x1xf32>
    %74 = tpu.reciprocal %73 {approx = true} : vector<256x1xf32> -> vector<256x1xf32>
    %75 = vector.broadcast %74 : vector<256x1xf32> to vector<256x64xf32>
    %76 = arith.mulf %71, %75 : vector<256x64xf32>
    %cst_31 = arith.constant dense<0.000000e+00> : vector<256x32xf32>
    %77 = tpu.matmul %76, %56, %cst_31 {dimension_numbers = #tpu.dot_dimension_numbers<[1], [0], [0], [1], [0, 0, 1, 1], [], []>} : vector<256x64xf32>, vector<64x32xf32>, vector<256x32xf32> -> vector<256x32xf32>
    %78 = vector.extract_strided_slice %77 {offsets = [0, 0], sizes = [64, 32], strides = [1, 1]} : vector<256x32xf32> to vector<64x32xf32>
    %79 = vector.broadcast %11 : vector<1x32xf32> to vector<64x32xf32>
    %80 = arith.mulf %78, %79 : vector<64x32xf32>
    %81 = vector.extract_strided_slice %77 {offsets = [64, 0], sizes = [64, 32], strides = [1, 1]} : vector<256x32xf32> to vector<64x32xf32>
    %82 = vector.broadcast %18 : vector<1x32xf32> to vector<64x32xf32>
    %83 = arith.mulf %81, %82 : vector<64x32xf32>
    %84 = arith.addf %80, %83 : vector<64x32xf32>
    %85 = vector.extract_strided_slice %77 {offsets = [128, 0], sizes = [64, 32], strides = [1, 1]} : vector<256x32xf32> to vector<64x32xf32>
    %86 = vector.broadcast %25 : vector<1x32xf32> to vector<64x32xf32>
    %87 = arith.mulf %85, %86 : vector<64x32xf32>
    %88 = arith.addf %84, %87 : vector<64x32xf32>
    %89 = vector.extract_strided_slice %77 {offsets = [192, 0], sizes = [64, 32], strides = [1, 1]} : vector<256x32xf32> to vector<64x32xf32>
    %90 = vector.broadcast %32 : vector<1x32xf32> to vector<64x32xf32>
    %91 = arith.mulf %89, %90 : vector<64x32xf32>
    %92 = arith.addf %88, %91 : vector<64x32xf32>
    %c3_32 = arith.constant 3 : index
    %c0_33 = arith.constant 0 : index
    %c0_34 = arith.constant 0 : index
    %93 = vector.load %arg5[%c3_32, %c0_33, %c0_34] : memref<14x32x32xf32, #tpu.memory_space<vmem>>, vector<1x32x32xf32>
    %94 = vector.shape_cast %93 : vector<1x32x32xf32> to vector<32x32xf32>
    %c4 = arith.constant 4 : index
    %c0_35 = arith.constant 0 : index
    %95 = vector.load %arg6[%c4, %c0_35] : memref<29x32xf32, #tpu.memory_space<vmem>>, vector<1x32xf32>
    %cst_36 = arith.constant dense<0.000000e+00> : vector<64x32xf32>
    %96 = tpu.matmul %92, %94, %cst_36 {dimension_numbers = #tpu.dot_dimension_numbers<[1], [0], [0], [1], [0, 0, 1, 1], [], []>} : vector<64x32xf32>, vector<32x32xf32>, vector<64x32xf32> -> vector<64x32xf32>
    %97 = vector.broadcast %95 : vector<1x32xf32> to vector<64x32xf32>
    %98 = arith.addf %96, %97 : vector<64x32xf32>
    %99 = arith.addf %37, %98 : vector<64x32xf32>
    %c5 = arith.constant 5 : index
    %c0_37 = arith.constant 0 : index
    %100 = vector.load %arg6[%c5, %c0_37] : memref<29x32xf32, #tpu.memory_space<vmem>>, vector<1x32xf32>
    %c6 = arith.constant 6 : index
    %c0_38 = arith.constant 0 : index
    %101 = vector.load %arg6[%c6, %c0_38] : memref<29x32xf32, #tpu.memory_space<vmem>>, vector<1x32xf32>
    %cst_39 = arith.constant dense<0.000000e+00> : vector<64xf32>
    %102 = vector.multi_reduction <add>, %99, %cst_39 [1] : vector<64x32xf32> to vector<64xf32>
    %103 = vector.shape_cast %102 : vector<64xf32> to vector<64x1xf32>
    %cst_40 = arith.constant 3.200000e+01 : f32
    %104 = vector.broadcast %cst_40 : f32 to vector<64x1xf32>
    %105 = arith.divf %103, %104 : vector<64x1xf32>
    %106 = vector.broadcast %105 : vector<64x1xf32> to vector<64x32xf32>
    %107 = arith.subf %99, %106 : vector<64x32xf32>
    %108 = arith.mulf %107, %107 : vector<64x32xf32>
    %cst_41 = arith.constant dense<0.000000e+00> : vector<64xf32>
    %109 = vector.multi_reduction <add>, %108, %cst_41 [1] : vector<64x32xf32> to vector<64xf32>
    %110 = vector.shape_cast %109 : vector<64xf32> to vector<64x1xf32>
    %cst_42 = arith.constant 3.200000e+01 : f32
    %111 = vector.broadcast %cst_42 : f32 to vector<64x1xf32>
    %112 = arith.divf %110, %111 : vector<64x1xf32>
    %113 = vector.broadcast %105 : vector<64x1xf32> to vector<64x32xf32>
    %114 = arith.subf %99, %113 : vector<64x32xf32>
    %cst_43 = arith.constant 9.99999974E-6 : f32
    %115 = vector.broadcast %cst_43 : f32 to vector<64x1xf32>
    %116 = arith.addf %112, %115 : vector<64x1xf32>
    %117 = math.rsqrt %116 : vector<64x1xf32>
    %118 = vector.broadcast %117 : vector<64x1xf32> to vector<64x32xf32>
    %119 = arith.mulf %114, %118 : vector<64x32xf32>
    %120 = vector.broadcast %100 : vector<1x32xf32> to vector<64x32xf32>
    %121 = arith.mulf %119, %120 : vector<64x32xf32>
    %122 = vector.broadcast %101 : vector<1x32xf32> to vector<64x32xf32>
    %123 = arith.addf %121, %122 : vector<64x32xf32>
    %c0_44 = arith.constant 0 : index
    %c0_45 = arith.constant 0 : index
    %c0_46 = arith.constant 0 : index
    %124 = vector.load %arg7[%c0_44, %c0_45, %c0_46] : memref<2x32x64xf32, #tpu.memory_space<vmem>>, vector<1x32x64xf32>
    %125 = vector.shape_cast %124 : vector<1x32x64xf32> to vector<32x64xf32>
    %c0_47 = arith.constant 0 : index
    %c0_48 = arith.constant 0 : index
    %126 = vector.load %arg9[%c0_47, %c0_48] : memref<2x64xf32, #tpu.memory_space<vmem>>, vector<1x64xf32>
    %cst_49 = arith.constant dense<0.000000e+00> : vector<64x64xf32>
    %127 = tpu.matmul %123, %125, %cst_49 {dimension_numbers = #tpu.dot_dimension_numbers<[1], [0], [0], [1], [0, 0, 1, 1], [], []>} : vector<64x32xf32>, vector<32x64xf32>, vector<64x64xf32> -> vector<64x64xf32>
    %128 = vector.broadcast %126 : vector<1x64xf32> to vector<64x64xf32>
    %129 = arith.addf %127, %128 : vector<64x64xf32>
    %cst_50 = arith.constant 0.000000e+00 : f32
    %130 = vector.broadcast %cst_50 : f32 to vector<64x64xf32>
    %131 = arith.maximumf %129, %130 : vector<64x64xf32>
    %c0_51 = arith.constant 0 : index
    %c0_52 = arith.constant 0 : index
    %c0_53 = arith.constant 0 : index
    %132 = vector.load %arg8[%c0_51, %c0_52, %c0_53] : memref<2x64x32xf32, #tpu.memory_space<vmem>>, vector<1x64x32xf32>
    %133 = vector.shape_cast %132 : vector<1x64x32xf32> to vector<64x32xf32>
    %c7 = arith.constant 7 : index
    %c0_54 = arith.constant 0 : index
    %134 = vector.load %arg6[%c7, %c0_54] : memref<29x32xf32, #tpu.memory_space<vmem>>, vector<1x32xf32>
    %cst_55 = arith.constant dense<0.000000e+00> : vector<64x32xf32>
    %135 = tpu.matmul %131, %133, %cst_55 {dimension_numbers = #tpu.dot_dimension_numbers<[1], [0], [0], [1], [0, 0, 1, 1], [], []>} : vector<64x64xf32>, vector<64x32xf32>, vector<64x32xf32> -> vector<64x32xf32>
    %136 = vector.broadcast %134 : vector<1x32xf32> to vector<64x32xf32>
    %137 = arith.addf %135, %136 : vector<64x32xf32>
    %138 = arith.addf %123, %137 : vector<64x32xf32>
    %c8 = arith.constant 8 : index
    %c0_56 = arith.constant 0 : index
    %139 = vector.load %arg6[%c8, %c0_56] : memref<29x32xf32, #tpu.memory_space<vmem>>, vector<1x32xf32>
    %c9 = arith.constant 9 : index
    %c0_57 = arith.constant 0 : index
    %140 = vector.load %arg6[%c9, %c0_57] : memref<29x32xf32, #tpu.memory_space<vmem>>, vector<1x32xf32>
    %cst_58 = arith.constant dense<0.000000e+00> : vector<64xf32>
    %141 = vector.multi_reduction <add>, %138, %cst_58 [1] : vector<64x32xf32> to vector<64xf32>
    %142 = vector.shape_cast %141 : vector<64xf32> to vector<64x1xf32>
    %cst_59 = arith.constant 3.200000e+01 : f32
    %143 = vector.broadcast %cst_59 : f32 to vector<64x1xf32>
    %144 = arith.divf %142, %143 : vector<64x1xf32>
    %145 = vector.broadcast %144 : vector<64x1xf32> to vector<64x32xf32>
    %146 = arith.subf %138, %145 : vector<64x32xf32>
    %147 = arith.mulf %146, %146 : vector<64x32xf32>
    %cst_60 = arith.constant dense<0.000000e+00> : vector<64xf32>
    %148 = vector.multi_reduction <add>, %147, %cst_60 [1] : vector<64x32xf32> to vector<64xf32>
    %149 = vector.shape_cast %148 : vector<64xf32> to vector<64x1xf32>
    %cst_61 = arith.constant 3.200000e+01 : f32
    %150 = vector.broadcast %cst_61 : f32 to vector<64x1xf32>
    %151 = arith.divf %149, %150 : vector<64x1xf32>
    %152 = vector.broadcast %144 : vector<64x1xf32> to vector<64x32xf32>
    %153 = arith.subf %138, %152 : vector<64x32xf32>
    %cst_62 = arith.constant 9.99999974E-6 : f32
    %154 = vector.broadcast %cst_62 : f32 to vector<64x1xf32>
    %155 = arith.addf %151, %154 : vector<64x1xf32>
    %156 = math.rsqrt %155 : vector<64x1xf32>
    %157 = vector.broadcast %156 : vector<64x1xf32> to vector<64x32xf32>
    %158 = arith.mulf %153, %157 : vector<64x32xf32>
    %159 = vector.broadcast %139 : vector<1x32xf32> to vector<64x32xf32>
    %160 = arith.mulf %158, %159 : vector<64x32xf32>
    %161 = vector.broadcast %140 : vector<1x32xf32> to vector<64x32xf32>
    %162 = arith.addf %160, %161 : vector<64x32xf32>
    %cst_63 = arith.constant 0.000000e+00 : f32
    %163 = vector.broadcast %cst_63 : f32 to vector<8x32xf32>
    %164 = arith.addf %163, %3 : vector<8x32xf32>
    %c4_64 = arith.constant 4 : index
    %c0_65 = arith.constant 0 : index
    %c0_66 = arith.constant 0 : index
    %165 = vector.load %arg5[%c4_64, %c0_65, %c0_66] : memref<14x32x32xf32, #tpu.memory_space<vmem>>, vector<1x32x32xf32>
    %166 = vector.shape_cast %165 : vector<1x32x32xf32> to vector<32x32xf32>
    %c10 = arith.constant 10 : index
    %c0_67 = arith.constant 0 : index
    %167 = vector.load %arg6[%c10, %c0_67] : memref<29x32xf32, #tpu.memory_space<vmem>>, vector<1x32xf32>
    %cst_68 = arith.constant dense<0.000000e+00> : vector<8x32xf32>
    %168 = tpu.matmul %164, %166, %cst_68 {dimension_numbers = #tpu.dot_dimension_numbers<[1], [0], [0], [1], [0, 0, 1, 1], [], []>} : vector<8x32xf32>, vector<32x32xf32>, vector<8x32xf32> -> vector<8x32xf32>
    %169 = vector.broadcast %167 : vector<1x32xf32> to vector<8x32xf32>
    %170 = arith.addf %168, %169 : vector<8x32xf32>
    %c5_69 = arith.constant 5 : index
    %c0_70 = arith.constant 0 : index
    %c0_71 = arith.constant 0 : index
    %171 = vector.load %arg5[%c5_69, %c0_70, %c0_71] : memref<14x32x32xf32, #tpu.memory_space<vmem>>, vector<1x32x32xf32>
    %172 = vector.shape_cast %171 : vector<1x32x32xf32> to vector<32x32xf32>
    %c11 = arith.constant 11 : index
    %c0_72 = arith.constant 0 : index
    %173 = vector.load %arg6[%c11, %c0_72] : memref<29x32xf32, #tpu.memory_space<vmem>>, vector<1x32xf32>
    %cst_73 = arith.constant dense<0.000000e+00> : vector<8x32xf32>
    %174 = tpu.matmul %164, %172, %cst_73 {dimension_numbers = #tpu.dot_dimension_numbers<[1], [0], [0], [1], [0, 0, 1, 1], [], []>} : vector<8x32xf32>, vector<32x32xf32>, vector<8x32xf32> -> vector<8x32xf32>
    %175 = vector.broadcast %173 : vector<1x32xf32> to vector<8x32xf32>
    %176 = arith.addf %174, %175 : vector<8x32xf32>
    %c6_74 = arith.constant 6 : index
    %c0_75 = arith.constant 0 : index
    %c0_76 = arith.constant 0 : index
    %177 = vector.load %arg5[%c6_74, %c0_75, %c0_76] : memref<14x32x32xf32, #tpu.memory_space<vmem>>, vector<1x32x32xf32>
    %178 = vector.shape_cast %177 : vector<1x32x32xf32> to vector<32x32xf32>
    %c12 = arith.constant 12 : index
    %c0_77 = arith.constant 0 : index
    %179 = vector.load %arg6[%c12, %c0_77] : memref<29x32xf32, #tpu.memory_space<vmem>>, vector<1x32xf32>
    %cst_78 = arith.constant dense<0.000000e+00> : vector<8x32xf32>
    %180 = tpu.matmul %163, %178, %cst_78 {dimension_numbers = #tpu.dot_dimension_numbers<[1], [0], [0], [1], [0, 0, 1, 1], [], []>} : vector<8x32xf32>, vector<32x32xf32>, vector<8x32xf32> -> vector<8x32xf32>
    %181 = vector.broadcast %179 : vector<1x32xf32> to vector<8x32xf32>
    %182 = arith.addf %180, %181 : vector<8x32xf32>
    %183 = vector.broadcast %11 : vector<1x32xf32> to vector<8x32xf32>
    %184 = arith.mulf %170, %183 : vector<8x32xf32>
    %185 = vector.broadcast %18 : vector<1x32xf32> to vector<8x32xf32>
    %186 = arith.mulf %170, %185 : vector<8x32xf32>
    %187 = vector.broadcast %25 : vector<1x32xf32> to vector<8x32xf32>
    %188 = arith.mulf %170, %187 : vector<8x32xf32>
    %189 = vector.broadcast %32 : vector<1x32xf32> to vector<8x32xf32>
    %190 = arith.mulf %170, %189 : vector<8x32xf32>
    %191 = tpu.concatenate %184, %186, %188, %190 in 0 : vector<8x32xf32>, vector<8x32xf32>, vector<8x32xf32>, vector<8x32xf32> -> vector<32x32xf32>
    %cst_79 = arith.constant dense<0.000000e+00> : vector<32x8xf32>
    %192 = tpu.matmul %191, %176, %cst_79 {dimension_numbers = #tpu.dot_dimension_numbers<[1], [1], [0], [0], [0, 0, 1, 0], [], []>} : vector<32x32xf32>, vector<8x32xf32>, vector<32x8xf32> -> vector<32x8xf32>
    %cst_80 = arith.constant dense<0xFF800000> : vector<32xf32>
    %193 = vector.multi_reduction <maximumf>, %192, %cst_80 [1] : vector<32x8xf32> to vector<32xf32>
    %194 = vector.shape_cast %193 : vector<32xf32> to vector<32x1xf32>
    %195 = vector.broadcast %194 : vector<32x1xf32> to vector<32x8xf32>
    %196 = arith.subf %192, %195 : vector<32x8xf32>
    %197 = math.exp %196 : vector<32x8xf32>
    %cst_81 = arith.constant dense<0.000000e+00> : vector<32xf32>
    %198 = vector.multi_reduction <add>, %197, %cst_81 [1] : vector<32x8xf32> to vector<32xf32>
    %199 = vector.shape_cast %198 : vector<32xf32> to vector<32x1xf32>
    %200 = tpu.reciprocal %199 {approx = true} : vector<32x1xf32> -> vector<32x1xf32>
    %201 = vector.broadcast %200 : vector<32x1xf32> to vector<32x8xf32>
    %202 = arith.mulf %197, %201 : vector<32x8xf32>
    %cst_82 = arith.constant dense<0.000000e+00> : vector<32x32xf32>
    %203 = tpu.matmul %202, %182, %cst_82 {dimension_numbers = #tpu.dot_dimension_numbers<[1], [0], [0], [1], [0, 0, 1, 1], [], []>} : vector<32x8xf32>, vector<8x32xf32>, vector<32x32xf32> -> vector<32x32xf32>
    %204 = vector.extract_strided_slice %203 {offsets = [0, 0], sizes = [8, 32], strides = [1, 1]} : vector<32x32xf32> to vector<8x32xf32>
    %205 = vector.broadcast %11 : vector<1x32xf32> to vector<8x32xf32>
    %206 = arith.mulf %204, %205 : vector<8x32xf32>
    %207 = vector.extract_strided_slice %203 {offsets = [8, 0], sizes = [8, 32], strides = [1, 1]} : vector<32x32xf32> to vector<8x32xf32>
    %208 = vector.broadcast %18 : vector<1x32xf32> to vector<8x32xf32>
    %209 = arith.mulf %207, %208 : vector<8x32xf32>
    %210 = arith.addf %206, %209 : vector<8x32xf32>
    %211 = vector.extract_strided_slice %203 {offsets = [16, 0], sizes = [8, 32], strides = [1, 1]} : vector<32x32xf32> to vector<8x32xf32>
    %212 = vector.broadcast %25 : vector<1x32xf32> to vector<8x32xf32>
    %213 = arith.mulf %211, %212 : vector<8x32xf32>
    %214 = arith.addf %210, %213 : vector<8x32xf32>
    %215 = vector.extract_strided_slice %203 {offsets = [24, 0], sizes = [8, 32], strides = [1, 1]} : vector<32x32xf32> to vector<8x32xf32>
    %216 = vector.broadcast %32 : vector<1x32xf32> to vector<8x32xf32>
    %217 = arith.mulf %215, %216 : vector<8x32xf32>
    %218 = arith.addf %214, %217 : vector<8x32xf32>
    %c7_83 = arith.constant 7 : index
    %c0_84 = arith.constant 0 : index
    %c0_85 = arith.constant 0 : index
    %219 = vector.load %arg5[%c7_83, %c0_84, %c0_85] : memref<14x32x32xf32, #tpu.memory_space<vmem>>, vector<1x32x32xf32>
    %220 = vector.shape_cast %219 : vector<1x32x32xf32> to vector<32x32xf32>
    %c13 = arith.constant 13 : index
    %c0_86 = arith.constant 0 : index
    %221 = vector.load %arg6[%c13, %c0_86] : memref<29x32xf32, #tpu.memory_space<vmem>>, vector<1x32xf32>
    %cst_87 = arith.constant dense<0.000000e+00> : vector<8x32xf32>
    %222 = tpu.matmul %218, %220, %cst_87 {dimension_numbers = #tpu.dot_dimension_numbers<[1], [0], [0], [1], [0, 0, 1, 1], [], []>} : vector<8x32xf32>, vector<32x32xf32>, vector<8x32xf32> -> vector<8x32xf32>
    %223 = vector.broadcast %221 : vector<1x32xf32> to vector<8x32xf32>
    %224 = arith.addf %222, %223 : vector<8x32xf32>
    %225 = arith.addf %163, %224 : vector<8x32xf32>
    %c14 = arith.constant 14 : index
    %c0_88 = arith.constant 0 : index
    %226 = vector.load %arg6[%c14, %c0_88] : memref<29x32xf32, #tpu.memory_space<vmem>>, vector<1x32xf32>
    %c15 = arith.constant 15 : index
    %c0_89 = arith.constant 0 : index
    %227 = vector.load %arg6[%c15, %c0_89] : memref<29x32xf32, #tpu.memory_space<vmem>>, vector<1x32xf32>
    %cst_90 = arith.constant dense<0.000000e+00> : vector<8xf32>
    %228 = vector.multi_reduction <add>, %225, %cst_90 [1] : vector<8x32xf32> to vector<8xf32>
    %229 = vector.shape_cast %228 : vector<8xf32> to vector<8x1xf32>
    %cst_91 = arith.constant 3.200000e+01 : f32
    %230 = vector.broadcast %cst_91 : f32 to vector<8x1xf32>
    %231 = arith.divf %229, %230 : vector<8x1xf32>
    %232 = vector.broadcast %231 : vector<8x1xf32> to vector<8x32xf32>
    %233 = arith.subf %225, %232 : vector<8x32xf32>
    %234 = arith.mulf %233, %233 : vector<8x32xf32>
    %cst_92 = arith.constant dense<0.000000e+00> : vector<8xf32>
    %235 = vector.multi_reduction <add>, %234, %cst_92 [1] : vector<8x32xf32> to vector<8xf32>
    %236 = vector.shape_cast %235 : vector<8xf32> to vector<8x1xf32>
    %cst_93 = arith.constant 3.200000e+01 : f32
    %237 = vector.broadcast %cst_93 : f32 to vector<8x1xf32>
    %238 = arith.divf %236, %237 : vector<8x1xf32>
    %239 = vector.broadcast %231 : vector<8x1xf32> to vector<8x32xf32>
    %240 = arith.subf %225, %239 : vector<8x32xf32>
    %cst_94 = arith.constant 9.99999974E-6 : f32
    %241 = vector.broadcast %cst_94 : f32 to vector<8x1xf32>
    %242 = arith.addf %238, %241 : vector<8x1xf32>
    %243 = math.rsqrt %242 : vector<8x1xf32>
    %244 = vector.broadcast %243 : vector<8x1xf32> to vector<8x32xf32>
    %245 = arith.mulf %240, %244 : vector<8x32xf32>
    %246 = vector.broadcast %226 : vector<1x32xf32> to vector<8x32xf32>
    %247 = arith.mulf %245, %246 : vector<8x32xf32>
    %248 = vector.broadcast %227 : vector<1x32xf32> to vector<8x32xf32>
    %249 = arith.addf %247, %248 : vector<8x32xf32>
    %250 = arith.addf %249, %3 : vector<8x32xf32>
    %c8_95 = arith.constant 8 : index
    %c0_96 = arith.constant 0 : index
    %c0_97 = arith.constant 0 : index
    %251 = vector.load %arg5[%c8_95, %c0_96, %c0_97] : memref<14x32x32xf32, #tpu.memory_space<vmem>>, vector<1x32x32xf32>
    %252 = vector.shape_cast %251 : vector<1x32x32xf32> to vector<32x32xf32>
    %c16 = arith.constant 16 : index
    %c0_98 = arith.constant 0 : index
    %253 = vector.load %arg6[%c16, %c0_98] : memref<29x32xf32, #tpu.memory_space<vmem>>, vector<1x32xf32>
    %cst_99 = arith.constant dense<0.000000e+00> : vector<8x32xf32>
    %254 = tpu.matmul %250, %252, %cst_99 {dimension_numbers = #tpu.dot_dimension_numbers<[1], [0], [0], [1], [0, 0, 1, 1], [], []>} : vector<8x32xf32>, vector<32x32xf32>, vector<8x32xf32> -> vector<8x32xf32>
    %255 = vector.broadcast %253 : vector<1x32xf32> to vector<8x32xf32>
    %256 = arith.addf %254, %255 : vector<8x32xf32>
    %257 = arith.addf %162, %2 : vector<64x32xf32>
    %c9_100 = arith.constant 9 : index
    %c0_101 = arith.constant 0 : index
    %c0_102 = arith.constant 0 : index
    %258 = vector.load %arg5[%c9_100, %c0_101, %c0_102] : memref<14x32x32xf32, #tpu.memory_space<vmem>>, vector<1x32x32xf32>
    %259 = vector.shape_cast %258 : vector<1x32x32xf32> to vector<32x32xf32>
    %c17 = arith.constant 17 : index
    %c0_103 = arith.constant 0 : index
    %260 = vector.load %arg6[%c17, %c0_103] : memref<29x32xf32, #tpu.memory_space<vmem>>, vector<1x32xf32>
    %cst_104 = arith.constant dense<0.000000e+00> : vector<64x32xf32>
    %261 = tpu.matmul %257, %259, %cst_104 {dimension_numbers = #tpu.dot_dimension_numbers<[1], [0], [0], [1], [0, 0, 1, 1], [], []>} : vector<64x32xf32>, vector<32x32xf32>, vector<64x32xf32> -> vector<64x32xf32>
    %262 = vector.broadcast %260 : vector<1x32xf32> to vector<64x32xf32>
    %263 = arith.addf %261, %262 : vector<64x32xf32>
    %c10_105 = arith.constant 10 : index
    %c0_106 = arith.constant 0 : index
    %c0_107 = arith.constant 0 : index
    %264 = vector.load %arg5[%c10_105, %c0_106, %c0_107] : memref<14x32x32xf32, #tpu.memory_space<vmem>>, vector<1x32x32xf32>
    %265 = vector.shape_cast %264 : vector<1x32x32xf32> to vector<32x32xf32>
    %c18 = arith.constant 18 : index
    %c0_108 = arith.constant 0 : index
    %266 = vector.load %arg6[%c18, %c0_108] : memref<29x32xf32, #tpu.memory_space<vmem>>, vector<1x32xf32>
    %cst_109 = arith.constant dense<0.000000e+00> : vector<64x32xf32>
    %267 = tpu.matmul %162, %265, %cst_109 {dimension_numbers = #tpu.dot_dimension_numbers<[1], [0], [0], [1], [0, 0, 1, 1], [], []>} : vector<64x32xf32>, vector<32x32xf32>, vector<64x32xf32> -> vector<64x32xf32>
    %268 = vector.broadcast %266 : vector<1x32xf32> to vector<64x32xf32>
    %269 = arith.addf %267, %268 : vector<64x32xf32>
    %270 = vector.broadcast %11 : vector<1x32xf32> to vector<8x32xf32>
    %271 = arith.mulf %256, %270 : vector<8x32xf32>
    %272 = vector.broadcast %18 : vector<1x32xf32> to vector<8x32xf32>
    %273 = arith.mulf %256, %272 : vector<8x32xf32>
    %274 = vector.broadcast %25 : vector<1x32xf32> to vector<8x32xf32>
    %275 = arith.mulf %256, %274 : vector<8x32xf32>
    %276 = vector.broadcast %32 : vector<1x32xf32> to vector<8x32xf32>
    %277 = arith.mulf %256, %276 : vector<8x32xf32>
    %278 = tpu.concatenate %271, %273, %275, %277 in 0 : vector<8x32xf32>, vector<8x32xf32>, vector<8x32xf32>, vector<8x32xf32> -> vector<32x32xf32>
    %cst_110 = arith.constant dense<0.000000e+00> : vector<32x64xf32>
    %279 = tpu.matmul %278, %263, %cst_110 {dimension_numbers = #tpu.dot_dimension_numbers<[1], [1], [0], [0], [0, 0, 1, 0], [], []>} : vector<32x32xf32>, vector<64x32xf32>, vector<32x64xf32> -> vector<32x64xf32>
    %cst_111 = arith.constant dense<0xFF800000> : vector<32xf32>
    %280 = vector.multi_reduction <maximumf>, %279, %cst_111 [1] : vector<32x64xf32> to vector<32xf32>
    %281 = vector.shape_cast %280 : vector<32xf32> to vector<32x1xf32>
    %282 = vector.broadcast %281 : vector<32x1xf32> to vector<32x64xf32>
    %283 = arith.subf %279, %282 : vector<32x64xf32>
    %284 = math.exp %283 : vector<32x64xf32>
    %cst_112 = arith.constant dense<0.000000e+00> : vector<32xf32>
    %285 = vector.multi_reduction <add>, %284, %cst_112 [1] : vector<32x64xf32> to vector<32xf32>
    %286 = vector.shape_cast %285 : vector<32xf32> to vector<32x1xf32>
    %287 = tpu.reciprocal %286 {approx = true} : vector<32x1xf32> -> vector<32x1xf32>
    %288 = vector.broadcast %287 : vector<32x1xf32> to vector<32x64xf32>
    %289 = arith.mulf %284, %288 : vector<32x64xf32>
    %cst_113 = arith.constant dense<0.000000e+00> : vector<32x32xf32>
    %290 = tpu.matmul %289, %269, %cst_113 {dimension_numbers = #tpu.dot_dimension_numbers<[1], [0], [0], [1], [0, 0, 1, 1], [], []>} : vector<32x64xf32>, vector<64x32xf32>, vector<32x32xf32> -> vector<32x32xf32>
    %291 = vector.extract_strided_slice %290 {offsets = [0, 0], sizes = [8, 32], strides = [1, 1]} : vector<32x32xf32> to vector<8x32xf32>
    %292 = vector.broadcast %11 : vector<1x32xf32> to vector<8x32xf32>
    %293 = arith.mulf %291, %292 : vector<8x32xf32>
    %294 = vector.extract_strided_slice %290 {offsets = [8, 0], sizes = [8, 32], strides = [1, 1]} : vector<32x32xf32> to vector<8x32xf32>
    %295 = vector.broadcast %18 : vector<1x32xf32> to vector<8x32xf32>
    %296 = arith.mulf %294, %295 : vector<8x32xf32>
    %297 = arith.addf %293, %296 : vector<8x32xf32>
    %298 = vector.extract_strided_slice %290 {offsets = [16, 0], sizes = [8, 32], strides = [1, 1]} : vector<32x32xf32> to vector<8x32xf32>
    %299 = vector.broadcast %25 : vector<1x32xf32> to vector<8x32xf32>
    %300 = arith.mulf %298, %299 : vector<8x32xf32>
    %301 = arith.addf %297, %300 : vector<8x32xf32>
    %302 = vector.extract_strided_slice %290 {offsets = [24, 0], sizes = [8, 32], strides = [1, 1]} : vector<32x32xf32> to vector<8x32xf32>
    %303 = vector.broadcast %32 : vector<1x32xf32> to vector<8x32xf32>
    %304 = arith.mulf %302, %303 : vector<8x32xf32>
    %305 = arith.addf %301, %304 : vector<8x32xf32>
    %c11_114 = arith.constant 11 : index
    %c0_115 = arith.constant 0 : index
    %c0_116 = arith.constant 0 : index
    %306 = vector.load %arg5[%c11_114, %c0_115, %c0_116] : memref<14x32x32xf32, #tpu.memory_space<vmem>>, vector<1x32x32xf32>
    %307 = vector.shape_cast %306 : vector<1x32x32xf32> to vector<32x32xf32>
    %c19 = arith.constant 19 : index
    %c0_117 = arith.constant 0 : index
    %308 = vector.load %arg6[%c19, %c0_117] : memref<29x32xf32, #tpu.memory_space<vmem>>, vector<1x32xf32>
    %cst_118 = arith.constant dense<0.000000e+00> : vector<8x32xf32>
    %309 = tpu.matmul %305, %307, %cst_118 {dimension_numbers = #tpu.dot_dimension_numbers<[1], [0], [0], [1], [0, 0, 1, 1], [], []>} : vector<8x32xf32>, vector<32x32xf32>, vector<8x32xf32> -> vector<8x32xf32>
    %310 = vector.broadcast %308 : vector<1x32xf32> to vector<8x32xf32>
    %311 = arith.addf %309, %310 : vector<8x32xf32>
    %312 = arith.addf %249, %311 : vector<8x32xf32>
    %c20 = arith.constant 20 : index
    %c0_119 = arith.constant 0 : index
    %313 = vector.load %arg6[%c20, %c0_119] : memref<29x32xf32, #tpu.memory_space<vmem>>, vector<1x32xf32>
    %c21 = arith.constant 21 : index
    %c0_120 = arith.constant 0 : index
    %314 = vector.load %arg6[%c21, %c0_120] : memref<29x32xf32, #tpu.memory_space<vmem>>, vector<1x32xf32>
    %cst_121 = arith.constant dense<0.000000e+00> : vector<8xf32>
    %315 = vector.multi_reduction <add>, %312, %cst_121 [1] : vector<8x32xf32> to vector<8xf32>
    %316 = vector.shape_cast %315 : vector<8xf32> to vector<8x1xf32>
    %cst_122 = arith.constant 3.200000e+01 : f32
    %317 = vector.broadcast %cst_122 : f32 to vector<8x1xf32>
    %318 = arith.divf %316, %317 : vector<8x1xf32>
    %319 = vector.broadcast %318 : vector<8x1xf32> to vector<8x32xf32>
    %320 = arith.subf %312, %319 : vector<8x32xf32>
    %321 = arith.mulf %320, %320 : vector<8x32xf32>
    %cst_123 = arith.constant dense<0.000000e+00> : vector<8xf32>
    %322 = vector.multi_reduction <add>, %321, %cst_123 [1] : vector<8x32xf32> to vector<8xf32>
    %323 = vector.shape_cast %322 : vector<8xf32> to vector<8x1xf32>
    %cst_124 = arith.constant 3.200000e+01 : f32
    %324 = vector.broadcast %cst_124 : f32 to vector<8x1xf32>
    %325 = arith.divf %323, %324 : vector<8x1xf32>
    %326 = vector.broadcast %318 : vector<8x1xf32> to vector<8x32xf32>
    %327 = arith.subf %312, %326 : vector<8x32xf32>
    %cst_125 = arith.constant 9.99999974E-6 : f32
    %328 = vector.broadcast %cst_125 : f32 to vector<8x1xf32>
    %329 = arith.addf %325, %328 : vector<8x1xf32>
    %330 = math.rsqrt %329 : vector<8x1xf32>
    %331 = vector.broadcast %330 : vector<8x1xf32> to vector<8x32xf32>
    %332 = arith.mulf %327, %331 : vector<8x32xf32>
    %333 = vector.broadcast %313 : vector<1x32xf32> to vector<8x32xf32>
    %334 = arith.mulf %332, %333 : vector<8x32xf32>
    %335 = vector.broadcast %314 : vector<1x32xf32> to vector<8x32xf32>
    %336 = arith.addf %334, %335 : vector<8x32xf32>
    %c1_126 = arith.constant 1 : index
    %c0_127 = arith.constant 0 : index
    %c0_128 = arith.constant 0 : index
    %337 = vector.load %arg7[%c1_126, %c0_127, %c0_128] : memref<2x32x64xf32, #tpu.memory_space<vmem>>, vector<1x32x64xf32>
    %338 = vector.shape_cast %337 : vector<1x32x64xf32> to vector<32x64xf32>
    %c1_129 = arith.constant 1 : index
    %c0_130 = arith.constant 0 : index
    %339 = vector.load %arg9[%c1_129, %c0_130] : memref<2x64xf32, #tpu.memory_space<vmem>>, vector<1x64xf32>
    %cst_131 = arith.constant dense<0.000000e+00> : vector<8x64xf32>
    %340 = tpu.matmul %336, %338, %cst_131 {dimension_numbers = #tpu.dot_dimension_numbers<[1], [0], [0], [1], [0, 0, 1, 1], [], []>} : vector<8x32xf32>, vector<32x64xf32>, vector<8x64xf32> -> vector<8x64xf32>
    %341 = vector.broadcast %339 : vector<1x64xf32> to vector<8x64xf32>
    %342 = arith.addf %340, %341 : vector<8x64xf32>
    %cst_132 = arith.constant 0.000000e+00 : f32
    %343 = vector.broadcast %cst_132 : f32 to vector<8x64xf32>
    %344 = arith.maximumf %342, %343 : vector<8x64xf32>
    %c1_133 = arith.constant 1 : index
    %c0_134 = arith.constant 0 : index
    %c0_135 = arith.constant 0 : index
    %345 = vector.load %arg8[%c1_133, %c0_134, %c0_135] : memref<2x64x32xf32, #tpu.memory_space<vmem>>, vector<1x64x32xf32>
    %346 = vector.shape_cast %345 : vector<1x64x32xf32> to vector<64x32xf32>
    %c22 = arith.constant 22 : index
    %c0_136 = arith.constant 0 : index
    %347 = vector.load %arg6[%c22, %c0_136] : memref<29x32xf32, #tpu.memory_space<vmem>>, vector<1x32xf32>
    %cst_137 = arith.constant dense<0.000000e+00> : vector<8x32xf32>
    %348 = tpu.matmul %344, %346, %cst_137 {dimension_numbers = #tpu.dot_dimension_numbers<[1], [0], [0], [1], [0, 0, 1, 1], [], []>} : vector<8x64xf32>, vector<64x32xf32>, vector<8x32xf32> -> vector<8x32xf32>
    %349 = vector.broadcast %347 : vector<1x32xf32> to vector<8x32xf32>
    %350 = arith.addf %348, %349 : vector<8x32xf32>
    %351 = arith.addf %336, %350 : vector<8x32xf32>
    %c23 = arith.constant 23 : index
    %c0_138 = arith.constant 0 : index
    %352 = vector.load %arg6[%c23, %c0_138] : memref<29x32xf32, #tpu.memory_space<vmem>>, vector<1x32xf32>
    %c24 = arith.constant 24 : index
    %c0_139 = arith.constant 0 : index
    %353 = vector.load %arg6[%c24, %c0_139] : memref<29x32xf32, #tpu.memory_space<vmem>>, vector<1x32xf32>
    %cst_140 = arith.constant dense<0.000000e+00> : vector<8xf32>
    %354 = vector.multi_reduction <add>, %351, %cst_140 [1] : vector<8x32xf32> to vector<8xf32>
    %355 = vector.shape_cast %354 : vector<8xf32> to vector<8x1xf32>
    %cst_141 = arith.constant 3.200000e+01 : f32
    %356 = vector.broadcast %cst_141 : f32 to vector<8x1xf32>
    %357 = arith.divf %355, %356 : vector<8x1xf32>
    %358 = vector.broadcast %357 : vector<8x1xf32> to vector<8x32xf32>
    %359 = arith.subf %351, %358 : vector<8x32xf32>
    %360 = arith.mulf %359, %359 : vector<8x32xf32>
    %cst_142 = arith.constant dense<0.000000e+00> : vector<8xf32>
    %361 = vector.multi_reduction <add>, %360, %cst_142 [1] : vector<8x32xf32> to vector<8xf32>
    %362 = vector.shape_cast %361 : vector<8xf32> to vector<8x1xf32>
    %cst_143 = arith.constant 3.200000e+01 : f32
    %363 = vector.broadcast %cst_143 : f32 to vector<8x1xf32>
    %364 = arith.divf %362, %363 : vector<8x1xf32>
    %365 = vector.broadcast %357 : vector<8x1xf32> to vector<8x32xf32>
    %366 = arith.subf %351, %365 : vector<8x32xf32>
    %cst_144 = arith.constant 9.99999974E-6 : f32
    %367 = vector.broadcast %cst_144 : f32 to vector<8x1xf32>
    %368 = arith.addf %364, %367 : vector<8x1xf32>
    %369 = math.rsqrt %368 : vector<8x1xf32>
    %370 = vector.broadcast %369 : vector<8x1xf32> to vector<8x32xf32>
    %371 = arith.mulf %366, %370 : vector<8x32xf32>
    %372 = vector.broadcast %352 : vector<1x32xf32> to vector<8x32xf32>
    %373 = arith.mulf %371, %372 : vector<8x32xf32>
    %374 = vector.broadcast %353 : vector<1x32xf32> to vector<8x32xf32>
    %375 = arith.addf %373, %374 : vector<8x32xf32>
    %c25 = arith.constant 25 : index
    %c0_145 = arith.constant 0 : index
    %376 = vector.load %arg6[%c25, %c0_145] : memref<29x32xf32, #tpu.memory_space<vmem>>, vector<1x32xf32>
    %c26 = arith.constant 26 : index
    %c0_146 = arith.constant 0 : index
    %377 = vector.load %arg6[%c26, %c0_146] : memref<29x32xf32, #tpu.memory_space<vmem>>, vector<1x32xf32>
    %cst_147 = arith.constant dense<0.000000e+00> : vector<8xf32>
    %378 = vector.multi_reduction <add>, %375, %cst_147 [1] : vector<8x32xf32> to vector<8xf32>
    %379 = vector.shape_cast %378 : vector<8xf32> to vector<8x1xf32>
    %cst_148 = arith.constant 3.200000e+01 : f32
    %380 = vector.broadcast %cst_148 : f32 to vector<8x1xf32>
    %381 = arith.divf %379, %380 : vector<8x1xf32>
    %382 = vector.broadcast %381 : vector<8x1xf32> to vector<8x32xf32>
    %383 = arith.subf %375, %382 : vector<8x32xf32>
    %384 = arith.mulf %383, %383 : vector<8x32xf32>
    %cst_149 = arith.constant dense<0.000000e+00> : vector<8xf32>
    %385 = vector.multi_reduction <add>, %384, %cst_149 [1] : vector<8x32xf32> to vector<8xf32>
    %386 = vector.shape_cast %385 : vector<8xf32> to vector<8x1xf32>
    %cst_150 = arith.constant 3.200000e+01 : f32
    %387 = vector.broadcast %cst_150 : f32 to vector<8x1xf32>
    %388 = arith.divf %386, %387 : vector<8x1xf32>
    %389 = vector.broadcast %381 : vector<8x1xf32> to vector<8x32xf32>
    %390 = arith.subf %375, %389 : vector<8x32xf32>
    %cst_151 = arith.constant 9.99999974E-6 : f32
    %391 = vector.broadcast %cst_151 : f32 to vector<8x1xf32>
    %392 = arith.addf %388, %391 : vector<8x1xf32>
    %393 = math.rsqrt %392 : vector<8x1xf32>
    %394 = vector.broadcast %393 : vector<8x1xf32> to vector<8x32xf32>
    %395 = arith.mulf %390, %394 : vector<8x32xf32>
    %396 = vector.broadcast %376 : vector<1x32xf32> to vector<8x32xf32>
    %397 = arith.mulf %395, %396 : vector<8x32xf32>
    %398 = vector.broadcast %377 : vector<1x32xf32> to vector<8x32xf32>
    %399 = arith.addf %397, %398 : vector<8x32xf32>
    %c0_152 = arith.constant 0 : index
    %c0_153 = arith.constant 0 : index
    %c0_154 = arith.constant 0 : index
    %400 = vector.load %arg10[%c0_152, %c0_153, %c0_154] : memref<2x32x128xf32, #tpu.memory_space<vmem>>, vector<1x32x128xf32>
    %401 = vector.shape_cast %400 : vector<1x32x128xf32> to vector<32x128xf32>
    %c0_155 = arith.constant 0 : index
    %c0_156 = arith.constant 0 : index
    %402 = vector.load %arg12[%c0_155, %c0_156] : memref<3x128xf32, #tpu.memory_space<vmem>>, vector<1x128xf32>
    %cst_157 = arith.constant dense<0.000000e+00> : vector<8x128xf32>
    %403 = tpu.matmul %399, %401, %cst_157 {dimension_numbers = #tpu.dot_dimension_numbers<[1], [0], [0], [1], [0, 0, 1, 1], [], []>} : vector<8x32xf32>, vector<32x128xf32>, vector<8x128xf32> -> vector<8x128xf32>
    %404 = vector.broadcast %402 : vector<1x128xf32> to vector<8x128xf32>
    %405 = arith.addf %403, %404 : vector<8x128xf32>
    %c0_158 = arith.constant 0 : index
    %c0_159 = arith.constant 0 : index
    %406 = vector.load %arg11[%c0_158, %c0_159] : memref<128x128xf32, #tpu.memory_space<vmem>>, vector<128x128xf32>
    %c1_160 = arith.constant 1 : index
    %c0_161 = arith.constant 0 : index
    %407 = vector.load %arg12[%c1_160, %c0_161] : memref<3x128xf32, #tpu.memory_space<vmem>>, vector<1x128xf32>
    %cst_162 = arith.constant dense<0.000000e+00> : vector<8x128xf32>
    %408 = tpu.matmul %405, %406, %cst_162 {dimension_numbers = #tpu.dot_dimension_numbers<[1], [0], [0], [1], [0, 0, 1, 1], [], []>} : vector<8x128xf32>, vector<128x128xf32>, vector<8x128xf32> -> vector<8x128xf32>
    %409 = vector.broadcast %407 : vector<1x128xf32> to vector<8x128xf32>
    %410 = arith.addf %408, %409 : vector<8x128xf32>
    %c0_163 = arith.constant 0 : index
    %c0_164 = arith.constant 0 : index
    %c0_165 = arith.constant 0 : index
    %411 = vector.load %arg13[%c0_163, %c0_164, %c0_165] : memref<1x8x128xf32, #tpu.memory_space<vmem>>, vector<1x8x128xf32>
    %412 = vector.shape_cast %411 : vector<1x8x128xf32> to vector<8x128xf32>
    %413 = vector.shape_cast %410 : vector<8x128xf32> to vector<1x8x128xf32>
    tpu.vector_store %arg13[%c0_163, %c0_164, %c0_165], %413 {strides = array<i32>} : memref<1x8x128xf32, #tpu.memory_space<vmem>>, vector<1x8x128xf32>,
    %c12_166 = arith.constant 12 : index
    %c0_167 = arith.constant 0 : index
    %c0_168 = arith.constant 0 : index
    %414 = vector.load %arg5[%c12_166, %c0_167, %c0_168] : memref<14x32x32xf32, #tpu.memory_space<vmem>>, vector<1x32x32xf32>
    %415 = vector.shape_cast %414 : vector<1x32x32xf32> to vector<32x32xf32>
    %c27 = arith.constant 27 : index
    %c0_169 = arith.constant 0 : index
    %416 = vector.load %arg6[%c27, %c0_169] : memref<29x32xf32, #tpu.memory_space<vmem>>, vector<1x32xf32>
    %cst_170 = arith.constant dense<0.000000e+00> : vector<8x32xf32>
    %417 = tpu.matmul %399, %415, %cst_170 {dimension_numbers = #tpu.dot_dimension_numbers<[1], [0], [0], [1], [0, 0, 1, 1], [], []>} : vector<8x32xf32>, vector<32x32xf32>, vector<8x32xf32> -> vector<8x32xf32>
    %418 = vector.broadcast %416 : vector<1x32xf32> to vector<8x32xf32>
    %419 = arith.addf %417, %418 : vector<8x32xf32>
    %cst_171 = arith.constant 0.000000e+00 : f32
    %420 = vector.broadcast %cst_171 : f32 to vector<8x32xf32>
    %421 = arith.maximumf %419, %420 : vector<8x32xf32>
    %c13_172 = arith.constant 13 : index
    %c0_173 = arith.constant 0 : index
    %c0_174 = arith.constant 0 : index
    %422 = vector.load %arg5[%c13_172, %c0_173, %c0_174] : memref<14x32x32xf32, #tpu.memory_space<vmem>>, vector<1x32x32xf32>
    %423 = vector.shape_cast %422 : vector<1x32x32xf32> to vector<32x32xf32>
    %c28 = arith.constant 28 : index
    %c0_175 = arith.constant 0 : index
    %424 = vector.load %arg6[%c28, %c0_175] : memref<29x32xf32, #tpu.memory_space<vmem>>, vector<1x32xf32>
    %cst_176 = arith.constant dense<0.000000e+00> : vector<8x32xf32>
    %425 = tpu.matmul %421, %423, %cst_176 {dimension_numbers = #tpu.dot_dimension_numbers<[1], [0], [0], [1], [0, 0, 1, 1], [], []>} : vector<8x32xf32>, vector<32x32xf32>, vector<8x32xf32> -> vector<8x32xf32>
    %426 = vector.broadcast %424 : vector<1x32xf32> to vector<8x32xf32>
    %427 = arith.addf %425, %426 : vector<8x32xf32>
    %cst_177 = arith.constant 0.000000e+00 : f32
    %428 = vector.broadcast %cst_177 : f32 to vector<8x32xf32>
    %429 = arith.maximumf %427, %428 : vector<8x32xf32>
    %c1_178 = arith.constant 1 : index
    %c0_179 = arith.constant 0 : index
    %c0_180 = arith.constant 0 : index
    %430 = vector.load %arg10[%c1_178, %c0_179, %c0_180] : memref<2x32x128xf32, #tpu.memory_space<vmem>>, vector<1x32x128xf32>
    %431 = vector.shape_cast %430 : vector<1x32x128xf32> to vector<32x128xf32>
    %c2_181 = arith.constant 2 : index
    %c0_182 = arith.constant 0 : index
    %432 = vector.load %arg12[%c2_181, %c0_182] : memref<3x128xf32, #tpu.memory_space<vmem>>, vector<1x128xf32>
    %cst_183 = arith.constant dense<0.000000e+00> : vector<8x128xf32>
    %433 = tpu.matmul %429, %431, %cst_183 {dimension_numbers = #tpu.dot_dimension_numbers<[1], [0], [0], [1], [0, 0, 1, 1], [], []>} : vector<8x32xf32>, vector<32x128xf32>, vector<8x128xf32> -> vector<8x128xf32>
    %434 = vector.broadcast %432 : vector<1x128xf32> to vector<8x128xf32>
    %435 = arith.addf %433, %434 : vector<8x128xf32>
    %cst_184 = arith.constant 0.000000e+00 : f32
    %436 = vector.broadcast %cst_184 : f32 to vector<8x128xf32>
    %437 = arith.subf %436, %435 : vector<8x128xf32>
    %438 = math.exp %437 : vector<8x128xf32>
    %cst_185 = arith.constant 1.000000e+00 : f32
    %439 = vector.broadcast %cst_185 : f32 to vector<8x128xf32>
    %440 = arith.addf %439, %438 : vector<8x128xf32>
    %cst_186 = arith.constant 1.000000e+00 : f32
    %441 = vector.broadcast %cst_186 : f32 to vector<8x128xf32>
    %442 = arith.divf %441, %440 : vector<8x128xf32>
    %c0_187 = arith.constant 0 : index
    %c0_188 = arith.constant 0 : index
    %c0_189 = arith.constant 0 : index
    %443 = vector.load %arg14[%c0_187, %c0_188, %c0_189] : memref<1x8x128xf32, #tpu.memory_space<vmem>>, vector<1x8x128xf32>
    %444 = vector.shape_cast %443 : vector<1x8x128xf32> to vector<8x128xf32>
    %445 = vector.shape_cast %442 : vector<8x128xf32> to vector<1x8x128xf32>
    tpu.vector_store %arg14[%c0_187, %c0_188, %c0_189], %445 {strides = array<i32>} : memref<1x8x128xf32, #tpu.memory_space<vmem>>, vector<1x8x128xf32>,
    return
  }
  func.func @transform_0(%arg0: i32) -> (i32, i32, i32) {
    %c0_i32 = arith.constant 0 : i32
    %c0_i32_0 = arith.constant 0 : i32
    %c0_i32_1 = arith.constant 0 : i32
    return %arg0, %c0_i32, %c0_i32_0 : i32, i32, i32
  }
  func.func @transform_1(%arg0: i32) -> (i32, i32) {
    %c0_i32 = arith.constant 0 : i32
    %c0_i32_0 = arith.constant 0 : i32
    %c0_i32_1 = arith.constant 0 : i32
    return %c0_i32, %c0_i32_0 : i32, i32
  }
  func.func @transform_2(%arg0: i32) -> (i32, i32) {
    %c0_i32 = arith.constant 0 : i32
    %c0_i32_0 = arith.constant 0 : i32
    %c0_i32_1 = arith.constant 0 : i32
    return %c0_i32, %c0_i32_0 : i32, i32
  }
  func.func @transform_3(%arg0: i32) -> (i32, i32) {
    %c0_i32 = arith.constant 0 : i32
    %c0_i32_0 = arith.constant 0 : i32
    %c0_i32_1 = arith.constant 0 : i32
    return %c0_i32, %c0_i32_0 : i32, i32
  }
  func.func @transform_4(%arg0: i32) -> (i32, i32, i32) {
    %c0_i32 = arith.constant 0 : i32
    %c0_i32_0 = arith.constant 0 : i32
    %c0_i32_1 = arith.constant 0 : i32
    %c0_i32_2 = arith.constant 0 : i32
    return %c0_i32, %c0_i32_0, %c0_i32_1 : i32, i32, i32
  }
  func.func @transform_5(%arg0: i32) -> (i32, i32) {
    %c0_i32 = arith.constant 0 : i32
    %c0_i32_0 = arith.constant 0 : i32
    %c0_i32_1 = arith.constant 0 : i32
    return %c0_i32, %c0_i32_0 : i32, i32
  }
  func.func @transform_6(%arg0: i32) -> (i32, i32, i32) {
    %c0_i32 = arith.constant 0 : i32
    %c0_i32_0 = arith.constant 0 : i32
    %c0_i32_1 = arith.constant 0 : i32
    %c0_i32_2 = arith.constant 0 : i32
    return %c0_i32, %c0_i32_0, %c0_i32_1 : i32, i32, i32
  }
  func.func @transform_7(%arg0: i32) -> (i32, i32, i32) {
    %c0_i32 = arith.constant 0 : i32
    %c0_i32_0 = arith.constant 0 : i32
    %c0_i32_1 = arith.constant 0 : i32
    %c0_i32_2 = arith.constant 0 : i32
    return %c0_i32, %c0_i32_0, %c0_i32_1 : i32, i32, i32
  }
  func.func @transform_8(%arg0: i32) -> (i32, i32) {
    %c0_i32 = arith.constant 0 : i32
    %c0_i32_0 = arith.constant 0 : i32
    %c0_i32_1 = arith.constant 0 : i32
    return %c0_i32, %c0_i32_0 : i32, i32
  }
  func.func @transform_9(%arg0: i32) -> (i32, i32, i32) {
    %c0_i32 = arith.constant 0 : i32
    %c0_i32_0 = arith.constant 0 : i32
    %c0_i32_1 = arith.constant 0 : i32
    %c0_i32_2 = arith.constant 0 : i32
    return %c0_i32, %c0_i32_0, %c0_i32_1 : i32, i32, i32
  }
  func.func @transform_10(%arg0: i32) -> (i32, i32) {
    %c0_i32 = arith.constant 0 : i32
    %c0_i32_0 = arith.constant 0 : i32
    %c0_i32_1 = arith.constant 0 : i32
    return %c0_i32, %c0_i32_0 : i32, i32
  }
  func.func @transform_11(%arg0: i32) -> (i32, i32) {
    %c0_i32 = arith.constant 0 : i32
    %c0_i32_0 = arith.constant 0 : i32
    %c0_i32_1 = arith.constant 0 : i32
    return %c0_i32, %c0_i32_0 : i32, i32
  }
  func.func @transform_12(%arg0: i32) -> (i32, i32, i32) {
    %c0_i32 = arith.constant 0 : i32
    %c0_i32_0 = arith.constant 0 : i32
    %c0_i32_1 = arith.constant 0 : i32
    return %arg0, %c0_i32, %c0_i32_0 : i32, i32, i32
  }
  func.func @transform_13(%arg0: i32) -> (i32, i32, i32) {
    %c0_i32 = arith.constant 0 : i32
    %c0_i32_0 = arith.constant 0 : i32
    %c0_i32_1 = arith.constant 0 : i32
    return %arg0, %c0_i32, %c0_i32_0 : i32, i32, i32
  }
}

</mosaic_0001>

<bundles_post_ra>
// kernel: detr_forward.1
= control target key start
LH: loop header
LB: loop body
LE: loop exit
PB: predicated region body
PF: predicated region fallthrough
CT: control target
= control target key end

     0   :  { %s6646_s25 = smov 0   ;;  %s8193_s0 = inlined_call_operand.vmem [shape: f32[2,64,16], index: 0, kind: input, shape index: {}]   ;;  %s8194_s1 = inlined_call_operand.vmem [shape: f32[64,32], index: 1, kind: input, shape index: {}]   ;;  %s8195_s2 = inlined_call_operand.vmem [shape: f32[8,32], index: 2, kind: input, shape index: {}]   ;;  %s8196_s3 = inlined_call_operand.vmem [shape: f32[16,32], index: 3, kind: input, shape index: {}]   ;;  %s8197_s4 = inlined_call_operand.vmem [shape: f32[14,32,32], index: 4, kind: input, shape index: {}]   ;;  %s8198_s5 = inlined_call_operand.vmem [shape: f32[29,32], index: 5, kind: input, shape index: {}]   ;;  %s8199_s6 = inlined_call_operand.vmem [shape: f32[2,32,64], index: 6, kind: input, shape index: {}]   ;;  %s8200_s7 = inlined_call_operand.vmem [shape: f32[2,64,32], index: 7, kind: input, shape index: {}]   ;;  %s8201_s8 = inlined_call_operand.vmem [shape: f32[2,64], index: 8, kind: input, shape index: {}]   ;;  %s8202_s9 = inlined_call_operand.vmem [shape: f32[2,32,128], index: 9, kind: input, shape index: {}]   ;;  %s8203_s10 = inlined_call_operand.vmem [shape: f32[128,128], index: 10, kind: input, shape index: {}]   ;;  %s8204_s11 = inlined_call_operand.vmem [shape: f32[3,128], index: 11, kind: input, shape index: {}]   ;;  %s8205_s12 = inlined_call_operand.vmem [shape: f32[2,8,128], index: 12, kind: output, shape index: {0}]   ;;  %s8206_s13 = inlined_call_operand.vmem [shape: f32[2,8,128], index: 13, kind: output, shape index: {1}]  }
   0x1 LB: > { %s4934_s26 = sadd.s32 4294967295, %s6571_s25   ;;  %p4938_p0 = scmp.ge.s32.totalorder %s6571_s25, 1  ;;  %s6571_s25 = sphi %s6646_s25, %s24_s25  }
   0x2   : > { %p390_p1 = scmp.lt.s32.totalorder %s6571_s25, 3 }
   0x4   : > { %p391_p2 = pnand %p4938_p0, %p390_p1 }
   0x5   : > { %v489_v0 = vld [vmem:[%s8196_s3] sm:$0xff] (!%p391_p2)  ;;  %v490_v1 = vld [vmem:[%s8196_s3 + $0x8] sm:$0xff] (!%p391_p2)  ;;  %p437_p3 = scmp.lt.s32.totalorder (!%p391_p2), %s4934_s26, 1  ;;  %v4967_v9 = vld [vmem:[%s8197_s4 + $0x30] sm:$0xff] (!%p391_p2)  ;;  %vm496_vm0 = vcmask (!%p391_p2), 130048   ;;  %vm643_vm1 = vcmask (!%p391_p2), 261120   ;;  %v467_v62 = vlaneseq (!%p391_p2) }
   0x6   : > { %394 = sbr.rel (%p391_p2) target bundleno = 6775 (0x1a77), region = 68  ;;  %v4965_v2 = vld [vmem:[%s8197_s4 + $0x20] sm:$0xff] (!%p391_p2)  ;;  %v6084_v3 = vpack.c.bf16 (!%p391_p2), %v490_v1, %v489_v0  ;;  %v4966_v4 = vld [vmem:[%s8197_s4 + $0x28] sm:$0xff] (!%p391_p2)  ;;  %v4968_v10 = vld [vmem:[%s8197_s4 + $0x38] sm:$0xff] (!%p391_p2)  ;;  %vm1404_vm13 = vcmask (!%p391_p2), 523264   ;;  %vm6575_vm14 = vmmov (!%p391_p2), 0  }
   0x7   : > { %v634_v5 = vld [vmem:[%s8197_s4] sm:$0xff] (!%p391_p2)  ;;  %v635_v6 = vld [vmem:[%s8197_s4 + $0x8] sm:$0xff] (!%p391_p2)  ;;  %v6096_v7 = vpack.c.bf16 (!%p391_p2), %v4966_v4, %v4965_v2  ;;  %v6100_v14 = vpack.c.bf16 (!%p391_p2), %v4968_v10, %v4967_v9  ;;  %v636_v20 = vld [vmem:[%s8197_s4 + $0x10] sm:$0xff] (!%p391_p2)  ;;  %v6793_v63 = vand.u32 (!%p391_p2), 127, %v467_v62  ;;  %v6573_v4 = vmov (!%p391_p2), 0.0  }
   0x8   : > { %v6088_v8 = vpack.c.bf16 (!%p391_p2), %v635_v6, %v634_v5  ;;  %6085 = vmatprep.subr.bf16.mxu0 (!%p391_p2), %v6084_v3  ;;  %v637_v21 = vld [vmem:[%s8197_s4 + $0x18] sm:$0xff] (!%p391_p2)  ;;  %v4978_v23 = vld [vmem:[%s8197_s4 + $0x40] sm:$0xff] (!%p391_p2)  ;;  %v4979_v24 = vld [vmem:[%s8197_s4 + $0x48] sm:$0xff] (!%p391_p2)  ;;  %vm3189_vm15 = vcmask (!%p391_p2), 64512  }
   0x9   : > { %6087 = vmatpush3.bf16.msra.mxu0 (!%p391_p2), %v6084_v3  ;;  %v6092_v22 = vpack.c.bf16 (!%p391_p2), %v637_v21, %v636_v20  ;;  %v6104_v25 = vpack.c.bf16 (!%p391_p2), %v4979_v24, %v4978_v23  ;;  %v4947_v26 = vld [vmem:[%s8198_s5] ss:$0 sm:$0xff] (!%p391_p2)  ;;  %v459_v31 = vld [vmem:[%s8194_s1 + $0x8] sm:$0xff] (!%p391_p2)  ;;  %v4980_v33 = vld [vmem:[%s8197_s4 + $0x50] sm:$0xff] (!%p391_p2)  ;;  %vm470_vm2 = vcmp.lt.s32.totalorder (!%p391_p2), %v6793_v63, 8  ;;  %vm474_vm4 = vcmp.ge.s32.totalorder (!%p391_p2), %v6793_v63, 8 }
   0xa   : > { %6089 = vmatprep.subr.bf16.mxu1 (!%p391_p2), %v6088_v8  ;;  %6097 = vmatprep.subr.bf16.mxu0 (!%p391_p2), %v6096_v7  ;;  %v458_v30 = vld [vmem:[%s8194_s1] sm:$0xff] (!%p391_p2)  ;;  %v4981_v34 = vld [vmem:[%s8197_s4 + $0x58] sm:$0xff] (!%p391_p2)  ;;  %v460_v40 = vld [vmem:[%s8194_s1 + $0x10] sm:$0xff] (!%p391_p2)  ;;  %v6807_v5 = vsel (!%p391_p2), %vm470_vm2, 1.0, %v6573_v4  ;;  %vm475_vm5 = vcmp.lt.s32.totalorder (!%p391_p2), %v6793_v63, 16  ;;  %vm479_vm7 = vcmp.ge.s32.totalorder (!%p391_p2), %v6793_v63, 16 }
   0xb   : > { %6091 = vmatpush3.bf16.msra.mxu1 (!%p391_p2), %v6088_v8  ;;  %v461_v35 = vld [vmem:[%s8194_s1 + $0x18] sm:$0xff] (!%p391_p2)  ;;  %v6108_v42 = vpack.c.bf16 (!%p391_p2), %v4981_v34, %v4980_v33  ;;  %v463_v46 = vld [vmem:[%s8194_s1 + $0x28] sm:$0xff] (!%p391_p2)  ;;  %v462_v49 = vld [vmem:[%s8194_s1 + $0x20] sm:$0xff] (!%p391_p2)  ;;  %vm480_vm8 = vcmp.lt.s32.totalorder (!%p391_p2), %v6793_v63, 24  ;;  %vm484_vm10 = vcmp.ge.s32.totalorder (!%p391_p2), %v6793_v63, 24  ;;  %vm485_vm11 = vcmp.lt.s32.totalorder (!%p391_p2), %v6793_v63, 32 }
   0xc   : > { %6093 = vmatprep.subr.bf16.mxu1 (!%p391_p2), %v6092_v22  ;;  %v465_v54 = vld [vmem:[%s8194_s1 + $0x38] sm:$0xff] (!%p391_p2)  ;;  %v464_v57 = vld [vmem:[%s8194_s1 + $0x30] sm:$0xff] (!%p391_p2)  ;;  %v4969_v0 = vld [vmem:[%s8198_s5 + $0x2] ss:$0 sm:$0xff] (!%p391_p2) }
   0xd   : > { %s8210_s26 = smov (!%p437_p3, %s4934_s26), 1  ;;  %v6802_v1 = vld [vmem:[%s8198_s5 + $0x1] ss:$0 sm:$0xff]  ;;  %vm6814_vm3 = vmpackc.low %vm643_vm1, %vm643_vm1 }
   0xe   : > { %s5231_s28 = sshll.u32 %s8210_s26, 6  ;;  %vm476_vm6 = vmand %vm474_vm4, %vm475_vm5  ;;  %s4941_s22 = sshll.u32 %s8210_s26, 3 }
   0xf   : > { %s441_s14 = scalar_lea.vmem %s8193_s0, %s5231_s28  ;;  %6095 = vmatpush3.bf16.msra.mxu1 %v6092_v22  ;;  %vm481_vm9 = vmand %vm479_vm7, %vm480_vm8  ;;  %s445_s29 = scalar_lea.vmem %s8205_s12, %s4941_s22 }
  0x10   : > { %v450_v11 = vld [vmem:[%s441_s14] sm:$0xff]  ;;  %v451_v12 = vld [vmem:[%s441_s14 + $0x8] sm:$0xff]  ;;  %v452_v13 = vld [vmem:[%s441_s14 + $0x10] sm:$0xff]  ;;  %6105 = vmatprep.subr.bf16.mxu1 %v6104_v25  ;;  %s449_s18 = scalar_lea.vmem %s8206_s13, %s4941_s22 }
  0x11   : > { %5541 = vmatprep.mubr.msk.f32.mxu0 %vm496_vm0, %v450_v11  ;;  %v453_v15 = vld [vmem:[%s441_s14 + $0x18] sm:$0xff]  ;;  %v454_v16 = vld [vmem:[%s441_s14 + $0x20] sm:$0xff]  ;;  %v455_v17 = vld [vmem:[%s441_s14 + $0x28] sm:$0xff] }
  0x12   : > { %5542 = vmatmul.mubr.msk.f32.vlgmr.msra.gmra.mrb[0].mxu0 %vm496_vm0, %v451_v12  ;;  %v456_v18 = vld [vmem:[%s441_s14 + $0x30] sm:$0xff]  ;;  %v457_v19 = vld [vmem:[%s441_s14 + $0x38] sm:$0xff]  ;;  %vm486_vm12 = vmand %vm484_vm10, %vm485_vm11 }
  0x13   : > { %5544 = vmatprep.mubr.msk.f32.mxu0 %vm496_vm0, %v452_v13  ;;  %6099 = vmatpush3.bf16.msra.mxu0 %v6096_v7  ;;  %v5155_v11 = vld [vmem:[%s8198_s5 + $0x12] ss:$0 sm:$0xff] }
  0x14   : > { %6101 = vmatprep.subr.bf16.mxu0 %v6100_v14 }
  0x16   : > { %5545 = vmatmul.mubr.msk.f32.gmra.mrb[2].mxu0 %vm496_vm0, %v453_v15 }
  0x17   : > { %5547 = vmatprep.mubr.msk.f32.mxu0 %vm496_vm0, %v454_v16  ;;  %6103 = vmatpush3.bf16.msra.mxu0 %v6100_v14 }
  0x1a   : > { %5548 = vmatmul.mubr.msk.f32.gmra.mrb[4].mxu0 %vm496_vm0, %v455_v17 }
  0x1b   : > { %5550 = vmatprep.mubr.msk.f32.mxu0 %vm496_vm0, %v456_v18 }
  0x1e   : > { %5551 = vmatmul.mubr.msk.f32.gmra.mrb[6].mxu0 %vm496_vm0, %v457_v19 }
  0xe5   : > { %v5543_v27 = vpop.f32.mrb[0].mxu0 }
  0xe6   : > { %v6707_v28 = vadd.f32 %v5543_v27, %v4947_v26  ;;  %v587_v29 = vpop.f32.mrb[1].mxu0 }
  0xe7   : > { %v6715_v32 = vadd.f32 %v4947_v26, %v587_v29 }
  0xe8   : > { %v627_v38 = vadd.f32 %v6707_v28, %v459_v31 }
  0xe9   : > { %v5546_v36 = vpop.f32.mrb[2].mxu0  ;;  %v626_v37 = vadd.f32 %v6715_v32, %v458_v30 }
  0xea   : > { %v6728_v39 = vadd.f32 %v5546_v36, %v4947_v26  ;;  %v597_v41 = vpop.f32.mrb[3].mxu0 }
  0xeb   : > { %v6733_v43 = vadd.f32 %v4947_v26, %v597_v41  ;;  %5561 = vmatprep.mubr.msk.f32.mxu1 %vm643_vm1, %v626_v37  ;;  %5581 = vmatprep.mubr.msk.f32.mxu0 %vm643_vm1, %v626_v37 }
  0xec   : > { %v629_v44 = vadd.f32 %v6728_v39, %v461_v35  ;;  %5562 = vmatmul.mubr.msk.f32.vlgmr.msra.gmra.mrb[0].mxu1 %vm643_vm1, %v627_v38  ;;  %5582 = vmatmul.mubr.msk.f32.vlgmr.msra.gmra.mrb[8].mxu0 %vm643_vm1, %v627_v38  ;;  %v4982_v35 = vld [vmem:[%s8198_s5 + $0x3] ss:$0 sm:$0xff] }
  0xed   : > { %v628_v45 = vadd.f32 %v6733_v43, %v460_v40  ;;  %v5549_v47 = vpop.f32.mrb[4].mxu0  ;;  %6107 = vmatpush3.bf16.msra.mxu1 %v6104_v25 }
  0xee   : > { %v6744_v48 = vadd.f32 %v5549_v47, %v4947_v26  ;;  %v607_v50 = vpop.f32.mrb[5].mxu0  ;;  %6109 = vmatprep.subr.bf16.mxu1 %v6108_v42 }
  0xef   : > { %v6749_v51 = vadd.f32 %v4947_v26, %v607_v50  ;;  %5564 = vmatprep.mubr.msk.f32.mxu1 %vm643_vm1, %v628_v45  ;;  %5584 = vmatprep.mubr.msk.f32.mxu0 %vm643_vm1, %v628_v45 }
  0xf0   : > { %v631_v52 = vadd.f32 %v6744_v48, %v463_v46  ;;  %5565 = vmatmul.mubr.msk.f32.gmra.mrb[2].mxu1 %vm643_vm1, %v629_v44  ;;  %5585 = vmatmul.mubr.msk.f32.gmra.mrb[10].mxu0 %vm643_vm1, %v629_v44 }
  0xf1   : > { %v630_v53 = vadd.f32 %v6749_v51, %v462_v49  ;;  %v5552_v55 = vpop.f32.mrb[6].mxu0  ;;  %6111 = vmatpush3.bf16.msra.mxu1 %v6108_v42 }
  0xf2   : > { %v6760_v56 = vadd.f32 %v5552_v55, %v4947_v26  ;;  %v617_v58 = vpop.f32.mrb[7].mxu0 }
  0xf3   : > { %v6765_v59 = vadd.f32 %v4947_v26, %v617_v58  ;;  %5567 = vmatprep.mubr.msk.f32.mxu1 %vm643_vm1, %v630_v53  ;;  %5587 = vmatprep.mubr.msk.f32.mxu0 %vm643_vm1, %v630_v53 }
  0xf4   : > { %v633_v60 = vadd.f32 %v6760_v56, %v465_v54  ;;  %5568 = vmatmul.mubr.msk.f32.gmra.mrb[4].mxu1 %vm643_vm1, %v631_v52  ;;  %5588 = vmatmul.mubr.msk.f32.gmra.mrb[12].mxu0 %vm643_vm1, %v631_v52 }
  0xf5   : > { %v632_v61 = vadd.f32 %v6765_v59, %v464_v57 }
  0xf7   : > { %5570 = vmatprep.mubr.msk.f32.mxu1 %vm643_vm1, %v632_v61  ;;  %5590 = vmatprep.mubr.msk.f32.mxu0 %vm643_vm1, %v632_v61 }
  0xf8   : > { %5571 = vmatmul.mubr.msk.f32.gmra.mrb[6].mxu1 %vm643_vm1, %v633_v60  ;;  %5591 = vmatmul.mubr.msk.f32.gmra.mrb[14].mxu0 %vm643_vm1, %v633_v60 }
  0xf9   : > { %5601 = vmatprep.mubr.msk.f32.mxu1 %vm643_vm1, %v6715_v32 }
  0xfc   : > { %5602 = vmatmul.mubr.msk.f32.vlgmr.msra.gmra.mrb[8].mxu1 %vm643_vm1, %v6707_v28 }
  0xfd   : > { %5604 = vmatprep.mubr.msk.f32.mxu1 %vm643_vm1, %v6733_v43 }
 0x100   : > { %5605 = vmatmul.mubr.msk.f32.gmra.mrb[10].mxu1 %vm643_vm1, %v6728_v39 }
 0x101   : > { %5607 = vmatprep.mubr.msk.f32.mxu1 %vm643_vm1, %v6749_v51 }
 0x104   : > { %5608 = vmatmul.mubr.msk.f32.gmra.mrb[12].mxu1 %vm643_vm1, %v6744_v48 }
 0x105   : > { %5610 = vmatprep.mubr.msk.f32.mxu1 %vm643_vm1, %v6765_v59 }
 0x108   : > { %5611 = vmatmul.mubr.msk.f32.gmra.mrb[14].mxu1 %vm643_vm1, %v6760_v56 }
 0x1bf   : > { %v6804_v2 = vpop.f32.mrb[0].mxu1  ;;  %v5583_v3 = vpop.f32.mrb[8].mxu0 }
 0x1c0   : > { %v855_v6 = vadd.f32 %v5583_v3, %v4969_v0  ;;  %v734_v7 = vpop.f32.mrb[1].mxu1  ;;  %v849_v8 = vpop.f32.mrb[9].mxu0 }
 0x1c1   : > { %v6810_v9 = vadd.f32 %v6802_v1, %v734_v7  ;;  %v850_v10 = vadd.f32 %v4969_v0, %v849_v8 }
 0x1c3   : > { %v6112_v12 = vpack.c.bf16 %v855_v6, %v850_v10  ;;  %v6818_v13 = vpop.f32.mrb[2].mxu1  ;;  %v5586_v14 = vpop.f32.mrb[10].mxu0  ;;  %v1027_v15 = vmul.f32 %v6807_v5, %v6810_v9 }
 0x1c4   : > { %v865_v16 = vadd.f32 %v5586_v14, %v4969_v0  ;;  %v744_v17 = vpop.f32.mrb[3].mxu1  ;;  %v859_v18 = vpop.f32.mrb[11].mxu0  ;;  %v6853_v8 = vadd.f32 %v6818_v13, %v6802_v1 }
 0x1c5   : > { %v860_v19 = vadd.f32 %v4969_v0, %v859_v18  ;;  %6114 = vmatprep.subr.msk.bf16.mxu0 %vm6814_vm3, %v6112_v12  ;;  %5629 = vmatprep.mubr.msk.f32.mxu0 %vm643_vm1, %v1027_v15  ;;  %v6847_v6 = vadd.f32 %v6802_v1, %v744_v17 }
 0x1c6   : > { %6117 = vmatpush3.bf16.xpose.msk.msra.mxu0 %vm6814_vm3, %v6112_v12  ;;  %v1030_v14 = vmul.f32 %v6807_v5, %v6853_v8 }
 0x1c7   : > { %v6118_v20 = vpack.c.bf16 %v865_v16, %v860_v19  ;;  %v5569_v21 = vpop.f32.mrb[4].mxu1  ;;  %v5589_v22 = vpop.f32.mrb[12].mxu0  ;;  %v6883_v19 = vsel %vm476_vm6, 1.0, %v6573_v4 }
 0x1c8   : > { %v754_v23 = vpop.f32.mrb[5].mxu1  ;;  %v875_v24 = vadd.f32 %v5589_v22, %v4969_v0  ;;  %v869_v25 = vpop.f32.mrb[13].mxu0  ;;  %v6863_v12 = vadd.f32 %v5569_v21, %v6802_v1  ;;  %v1035_v21 = vmul.f32 %v6883_v19, %v6810_v9  ;;  %v1037_v22 = vmul.f32 %v6883_v19, %v6847_v6 }
 0x1c9   : > { %6120 = vmatprep.subr.msk.bf16.mxu0 %vm6814_vm3, %v6118_v20  ;;  %v870_v26 = vadd.f32 %v4969_v0, %v869_v25  ;;  %v6856_v10 = vadd.f32 %v6802_v1, %v754_v23  ;;  %v1038_v23 = vmul.f32 %v6883_v19, %v6853_v8 }
 0x1ca   : > { %v1032_v17 = vmul.f32 %v6807_v5, %v6863_v12  ;;  %v1040_v25 = vmul.f32 %v6883_v19, %v6863_v12 }
 0x1cb   : > { %v5572_v27 = vpop.f32.mrb[6].mxu1  ;;  %v6124_v29 = vpack.c.bf16 %v875_v24, %v870_v26  ;;  %v5592_v30 = vpop.f32.mrb[14].mxu0  ;;  %v1031_v15 = vmul.f32 %v6807_v5, %v6856_v10  ;;  %v1039_v24 = vmul.f32 %v6883_v19, %v6856_v10 }
 0x1cc   : > { %v764_v31 = vpop.f32.mrb[7].mxu1  ;;  %v885_v33 = vadd.f32 %v5592_v30, %v4969_v0  ;;  %v879_v34 = vpop.f32.mrb[15].mxu0  ;;  %v770_v16 = vadd.f32 %v5572_v27, %v6802_v1  ;;  %v6911_v27 = vsel %vm481_vm9, 1.0, %v6573_v4 }
 0x1cd   : > { %v880_v36 = vadd.f32 %v4969_v0, %v879_v34  ;;  %v6844_v0 = vadd.f32 %v6804_v2, %v6802_v1  ;;  %v1029_v2 = vmul.f32 %v6807_v5, %v6847_v6  ;;  %v6870_v13 = vadd.f32 %v6802_v1, %v764_v31 }
 0x1ce   : > { %6123 = vmatpush3.bf16.xpose.msk.msra.mxu0 %vm6814_vm3, %v6118_v20  ;;  %v1034_v20 = vmul.f32 %v6807_v5, %v770_v16  ;;  %v1043_v30 = vmul.f32 %v6911_v27, %v6810_v9  ;;  %v1046_v34 = vmul.f32 %v6911_v27, %v6853_v8  ;;  %v1050_v63 = vmul.f32 %v6911_v27, %v770_v16 }
 0x1cf   : > { %v5603_v37 = vpop.f32.mrb[8].mxu1  ;;  %6126 = vmatprep.subr.msk.bf16.mxu0 %vm6814_vm3, %v6124_v29  ;;  %v6130_v38 = vpack.c.bf16 %v885_v33, %v880_v36  ;;  %v1028_v7 = vmul.f32 %v6807_v5, %v6844_v0  ;;  %v1033_v18 = vmul.f32 %v6807_v5, %v6870_v13  ;;  %v1036_v1 = vmul.f32 %v6883_v19, %v6844_v0 }
 0x1d0   : > { %v994_v40 = vadd.f32 %v5603_v37, %v4982_v35  ;;  %v988_v41 = vpop.f32.mrb[9].mxu1  ;;  %v1041_v26 = vmul.f32 %v6883_v19, %v6870_v13  ;;  %v1044_v31 = vmul.f32 %v6911_v27, %v6844_v0  ;;  %v1045_v33 = vmul.f32 %v6911_v27, %v6847_v6 }
 0x1d1   : > { %v989_v42 = vadd.f32 %v4982_v35, %v988_v41  ;;  %v1048_v36 = vmul.f32 %v6911_v27, %v6863_v12  ;;  %v1049_v37 = vmul.f32 %v6911_v27, %v6870_v13 }
 0x1d3   : > { %v6136_v44 = vpack.c.bf16 %v994_v40, %v989_v42  ;;  %v5606_v45 = vpop.f32.mrb[10].mxu1 }
 0x1d4   : > { %v1004_v46 = vadd.f32 %v5606_v45, %v4982_v35  ;;  %v998_v47 = vpop.f32.mrb[11].mxu1 }
 0x1d5   : > { %v999_v49 = vadd.f32 %v4982_v35, %v998_v47  ;;  %6137 = vmatprep.subr.bf16.mxu1 %v6136_v44 }
 0x1d6   : > { %6129 = vmatpush3.bf16.xpose.msk.msra.mxu0 %vm6814_vm3, %v6124_v29  ;;  %6139 = vmatpush3.bf16.msra.mxu1 %v6136_v44  ;;  %v1042_v29 = vmul.f32 %v6883_v19, %v770_v16 }
 0x1d7   : > { %v6140_v50 = vpack.c.bf16 %v1004_v46, %v999_v49  ;;  %v5609_v52 = vpop.f32.mrb[12].mxu1  ;;  %6132 = vmatprep.subr.msk.bf16.mxu0 %vm6814_vm3, %v6130_v38 }
 0x1d8   : > { %v1014_v53 = vadd.f32 %v5609_v52, %v4982_v35  ;;  %v1008_v54 = vpop.f32.mrb[13].mxu1 }
 0x1d9   : > { %v1009_v55 = vadd.f32 %v4982_v35, %v1008_v54  ;;  %6141 = vmatprep.subr.bf16.mxu1 %v6140_v50 }
 0x1da   : > { %6143 = vmatpush3.bf16.msra.mxu1 %v6140_v50 }
 0x1db   : > { %v6144_v57 = vpack.c.bf16 %v1014_v53, %v1009_v55  ;;  %v5612_v58 = vpop.f32.mrb[14].mxu1 }
 0x1dc   : > { %v1024_v60 = vadd.f32 %v5612_v58, %v4982_v35  ;;  %v1018_v61 = vpop.f32.mrb[15].mxu1 }
 0x1dd   : > { %v1019_v62 = vadd.f32 %v4982_v35, %v1018_v61  ;;  %6145 = vmatprep.subr.bf16.mxu1 %v6144_v57  ;;  %v1047_v35 = vmul.f32 %v6911_v27, %v6856_v10 }
 0x1de   : > { %6135 = vmatpush3.bf16.xpose.msk.msra.mxu0 %vm6814_vm3, %v6130_v38  ;;  %6147 = vmatpush3.bf16.msra.mxu1 %v6144_v57  ;;  %v6939_v38 = vsel %vm486_vm12, 1.0, %v6573_v4 }
 0x1df   : > { %v6148_v3 = vpack.c.bf16 %v1024_v60, %v1019_v62  ;;  %v1051_v40 = vmul.f32 %v6939_v38, %v6810_v9  ;;  %v1052_v41 = vmul.f32 %v6939_v38, %v6844_v0  ;;  %v1053_v42 = vmul.f32 %v6939_v38, %v6847_v6 }
 0x1e0   : > { %v1054_v44 = vmul.f32 %v6939_v38, %v6853_v8  ;;  %v1055_v9 = vmul.f32 %v6939_v38, %v6856_v10  ;;  %v1056_v45 = vmul.f32 %v6939_v38, %v6863_v12  ;;  %v1057_v46 = vmul.f32 %v6939_v38, %v6870_v13 }
 0x1e1   : > { %6149 = vmatprep.subr.bf16.mxu1 %v6148_v3  ;;  %v1058_v47 = vmul.f32 %v6939_v38, %v770_v16 }
 0x1e2   : > { %6151 = vmatpush3.bf16.msra.mxu1 %v6148_v3 }
 0x1e5   : > { %5630 = vmatmul.mubr.msk.f32.vlgmr.msra.gmra.mrb[16].mxu0 %vm643_vm1, %v1028_v7 }
 0x1e6   : > { %5632 = vmatprep.mubr.msk.f32.mxu0 %vm643_vm1, %v1029_v2 }
 0x1e9   : > { %5633 = vmatmul.mubr.msk.f32.gmra.mrb[18].mxu0 %vm643_vm1, %v1030_v14 }
 0x1ea   : > { %5635 = vmatprep.mubr.msk.f32.mxu0 %vm643_vm1, %v1031_v15 }
 0x1ed   : > { %5636 = vmatmul.mubr.msk.f32.gmra.mrb[20].mxu0 %vm643_vm1, %v1032_v17 }
 0x1ee   : > { %5638 = vmatprep.mubr.msk.f32.mxu0 %vm643_vm1, %v1033_v18 }
 0x1f1   : > { %5639 = vmatmul.mubr.msk.f32.gmra.mrb[22].mxu0 %vm643_vm1, %v1034_v20 }
 0x1f2   : > { %5641 = vmatprep.mubr.msk.f32.mxu0 %vm643_vm1, %v1035_v21 }
 0x1f5   : > { %5642 = vmatmul.mubr.msk.f32.gmra.mrb[24].mxu0 %vm643_vm1, %v1036_v1 }
 0x1f6   : > { %5644 = vmatprep.mubr.msk.f32.mxu0 %vm643_vm1, %v1037_v22 }
 0x1f9   : > { %5645 = vmatmul.mubr.msk.f32.gmra.mrb[26].mxu0 %vm643_vm1, %v1038_v23 }
 0x1fa   : > { %5647 = vmatprep.mubr.msk.f32.mxu0 %vm643_vm1, %v1039_v24 }
 0x1fd   : > { %5648 = vmatmul.mubr.msk.f32.gmra.mrb[28].mxu0 %vm643_vm1, %v1040_v25 }
 0x1fe   : > { %5650 = vmatprep.mubr.msk.f32.mxu0 %vm643_vm1, %v1041_v26 }
 0x201   : > { %5651 = vmatmul.mubr.msk.f32.gmra.mrb[30].mxu0 %vm643_vm1, %v1042_v29 }
 0x202   : > { %5653 = vmatprep.mubr.msk.f32.mxu0 %vm643_vm1, %v1043_v30 }
 0x205   : > { %5654 = vmatmul.mubr.msk.f32.gmra.mrb[32].mxu0 %vm643_vm1, %v1044_v31 }
 0x206   : > { %5656 = vmatprep.mubr.msk.f32.mxu0 %vm643_vm1, %v1045_v33 }
 0x209   : > { %5657 = vmatmul.mubr.msk.f32.gmra.mrb[34].mxu0 %vm643_vm1, %v1046_v34 }
 0x20a   : > { %5659 = vmatprep.mubr.msk.f32.mxu0 %vm643_vm1, %v1047_v35 }
 0x20d   : > { %5660 = vmatmul.mubr.msk.f32.gmra.mrb[36].mxu0 %vm643_vm1, %v1048_v36 }
 0x20e   : > { %5662 = vmatprep.mubr.msk.f32.mxu0 %vm643_vm1, %v1049_v37 }
 0x211   : > { %5663 = vmatmul.mubr.msk.f32.gmra.mrb[38].mxu0 %vm643_vm1, %v1050_v63 }
 0x212   : > { %5665 = vmatprep.mubr.msk.f32.mxu0 %vm643_vm1, %v1051_v40 }
 0x215   : > { %5666 = vmatmul.mubr.msk.f32.gmra.mrb[40].mxu0 %vm643_vm1, %v1052_v41 }
 0x216   : > { %5668 = vmatprep.mubr.msk.f32.mxu0 %vm643_vm1, %v1053_v42 }
 0x219   : > { %5669 = vmatmul.mubr.msk.f32.gmra.mrb[42].mxu0 %vm643_vm1, %v1054_v44 }
 0x21a   : > { %5671 = vmatprep.mubr.msk.f32.mxu0 %vm643_vm1, %v1055_v9 }
 0x21d   : > { %5672 = vmatmul.mubr.msk.f32.gmra.mrb[44].mxu0 %vm643_vm1, %v1056_v45 }
 0x21e   : > { %5674 = vmatprep.mubr.msk.f32.mxu0 %vm643_vm1, %v1057_v46 }
 0x221   : > { %5675 = vmatmul.mubr.msk.f32.gmra.mrb[46].mxu0 %vm643_vm1, %v1058_v47 }
 0x2b8   : > { %v6967_v49 = vpop.f32.mrb[16].mxu0 }
 0x2b9   : > { %v6969_v50 = vpop.f32.mrb[17].mxu0  ;;  %v1408_v55 = vsel %vm1404_vm13, %v6967_v49, -inf }
 0x2ba   : > { %v1405_v52 = vsel %vm1404_vm13, %v6969_v50, -inf }
 0x2bb   : > { %1406 = vmax.xlane.f32.xlu0 %v1405_v52 }
 0x2bc   : > { %v6973_v53 = vpop.f32.mrb[18].mxu0 }
 0x2bd   : > { %v6975_v54 = vpop.f32.mrb[19].mxu0  ;;  %v1414_v61 = vsel %vm1404_vm13, %v6973_v53, -inf }
 0x2be   : > { %v1411_v57 = vsel %vm1404_vm13, %v6975_v54, -inf }
 0x2bf   : > { %1409 = vmax.xlane.f32.xlu0 %v1408_v55  ;;  %1412 = vmax.xlane.f32.xlu1 %v1411_v57 }
 0x2c0   : > { %v6981_v58 = vpop.f32.mrb[20].mxu0 }
 0x2c1   : > { %v6983_v60 = vpop.f32.mrb[21].mxu0  ;;  %v1420_v6 = vsel %vm1404_vm13, %v6981_v58, -inf }
 0x2c2   : > { %v1417_v62 = vsel %vm1404_vm13, %v6983_v60, -inf }
 0x2c3   : > { %1415 = vmax.xlane.f32.xlu1 %v1414_v61  ;;  %1418 = vmax.xlane.f32.xlu0 %v1417_v62 }
 0x2c4   : > { %v6989_v0 = vpop.f32.mrb[22].mxu0 }
 0x2c5   : > { %v6991_v3 = vpop.f32.mrb[23].mxu0  ;;  %v1426_v2 = vsel %vm1404_vm13, %v6989_v0, -inf }
 0x2c6   : > { %v1423_v7 = vsel %vm1404_vm13, %v6991_v3, -inf }
 0x2c7   : > { %1421 = vmax.xlane.f32.xlu1 %v1420_v6  ;;  %1424 = vmax.xlane.f32.xlu0 %v1423_v7 }
 0x2c8   : > { %v6997_v8 = vpop.f32.mrb[24].mxu0 }
 0x2c9   : > { %v6999_v10 = vpop.f32.mrb[25].mxu0  ;;  %v1432_v15 = vsel %vm1404_vm13, %v6997_v8, -inf }
 0x2ca   : > { %v1429_v12 = vsel %vm1404_vm13, %v6999_v10, -inf }
 0x2cb   : > { %1427 = vmax.xlane.f32.xlu1 %v1426_v2  ;;  %1430 = vmax.xlane.f32.xlu0 %v1429_v12 }
 0x2cc   : > { %v7005_v14 = vpop.f32.mrb[26].mxu0 }
 0x2cd   : > { %v7007_v13 = vpop.f32.mrb[27].mxu0  ;;  %v1438_v20 = vsel %vm1404_vm13, %v7005_v14, -inf }
 0x2ce   : > { %v1435_v16 = vsel %vm1404_vm13, %v7007_v13, -inf }
 0x2cf   : > { %1433 = vmax.xlane.f32.xlu1 %v1432_v15  ;;  %1436 = vmax.xlane.f32.xlu0 %v1435_v16 }
 0x2d0   : > { %v7013_v17 = vpop.f32.mrb[28].mxu0 }
 0x2d1   : > { %v7015_v18 = vpop.f32.mrb[29].mxu0  ;;  %v1444_v23 = vsel %vm1404_vm13, %v7013_v17, -inf }
 0x2d2   : > { %v1441_v21 = vsel %vm1404_vm13, %v7015_v18, -inf }
 0x2d3   : > { %1439 = vmax.xlane.f32.xlu1 %v1438_v20  ;;  %1442 = vmax.xlane.f32.xlu0 %v1441_v21 }
 0x2d4   : > { %v7021_v1 = vpop.f32.mrb[30].mxu0 }
 0x2d5   : > { %v7023_v22 = vpop.f32.mrb[31].mxu0  ;;  %v1450_v29 = vsel %vm1404_vm13, %v7021_v1, -inf }
 0x2d6   : > { %v1447_v24 = vsel %vm1404_vm13, %v7023_v22, -inf }
 0x2d7   : > { %1445 = vmax.xlane.f32.xlu1 %v1444_v23  ;;  %1448 = vmax.xlane.f32.xlu0 %v1447_v24 }
 0x2d8   : > { %v7029_v25 = vpop.f32.mrb[32].mxu0 }
 0x2d9   : > { %v7031_v26 = vpop.f32.mrb[33].mxu0  ;;  %v1456_v34 = vsel %vm1404_vm13, %v7029_v25, -inf }
 0x2da   : > { %v1453_v30 = vsel %vm1404_vm13, %v7031_v26, -inf }
 0x2db   : > { %1451 = vmax.xlane.f32.xlu1 %v1450_v29  ;;  %1454 = vmax.xlane.f32.xlu0 %v1453_v30 }
 0x2dc   : > { %v7037_v31 = vpop.f32.mrb[34].mxu0 }
 0x2dd   : > { %v7039_v33 = vpop.f32.mrb[35].mxu0  ;;  %v1462_v63 = vsel %vm1404_vm13, %v7037_v31, -inf }
 0x2de   : > { %v1459_v35 = vsel %vm1404_vm13, %v7039_v33, -inf }
 0x2df   : > { %1457 = vmax.xlane.f32.xlu1 %v1456_v34  ;;  %1460 = vmax.xlane.f32.xlu0 %v1459_v35 }
 0x2e0   : > { %v7045_v36 = vpop.f32.mrb[36].mxu0 }
 0x2e1   : > { %v7047_v37 = vpop.f32.mrb[37].mxu0  ;;  %v1468_v44 = vsel %vm1404_vm13, %v7045_v36, -inf }
 0x2e2   : > { %v1465_v40 = vsel %vm1404_vm13, %v7047_v37, -inf }
 0x2e3   : > { %1463 = vmax.xlane.f32.xlu1 %v1462_v63  ;;  %1466 = vmax.xlane.f32.xlu0 %v1465_v40 }
 0x2e4   : > { %v7053_v41 = vpop.f32.mrb[38].mxu0 }
 0x2e5   : > { %v7055_v42 = vpop.f32.mrb[39].mxu0  ;;  %v1474_v47 = vsel %vm1404_vm13, %v7053_v41, -inf }
 0x2e6   : > { %v1471_v9 = vsel %vm1404_vm13, %v7055_v42, -inf }
 0x2e7   : > { %1469 = vmax.xlane.f32.xlu1 %v1468_v44  ;;  %1472 = vmax.xlane.f32.xlu0 %v1471_v9 }
 0x2e8   : > { %v7061_v45 = vpop.f32.mrb[40].mxu0 }
 0x2e9   : > { %v7063_v46 = vpop.f32.mrb[41].mxu0  ;;  %v1480_v61 = vsel %vm1404_vm13, %v7061_v45, -inf }
 0x2ea   : > { %v1477_v52 = vsel %vm1404_vm13, %v7063_v46, -inf }
 0x2eb   : > { %1475 = vmax.xlane.f32.xlu1 %v1474_v47  ;;  %1478 = vmax.xlane.f32.xlu0 %v1477_v52 }
 0x2ec   : > { %v7069_v55 = vpop.f32.mrb[42].mxu0 }
 0x2ed   : > { %v7071_v57 = vpop.f32.mrb[43].mxu0  ;;  %v1486_v2 = vsel %vm1404_vm13, %v7069_v55, -inf }
 0x2ee   : > { %v1483_v62 = vsel %vm1404_vm13, %v7071_v57, -inf }
 0x2ef   : > { %1481 = vmax.xlane.f32.xlu1 %v1480_v61  ;;  %1484 = vmax.xlane.f32.xlu0 %v1483_v62 }
 0x2f0   : > { %v7077_v6 = vpop.f32.mrb[44].mxu0 }
 0x2f1   : > { %v7079_v7 = vpop.f32.mrb[45].mxu0  ;;  %v1492_v20 = vsel %vm1404_vm13, %v7077_v6, -inf }
 0x2f2   : > { %v1489_v12 = vsel %vm1404_vm13, %v7079_v7, -inf }
 0x2f3   : > { %1487 = vmax.xlane.f32.xlu1 %v1486_v2  ;;  %1490 = vmax.xlane.f32.xlu0 %v1489_v12 }
 0x2f4   : > { %v7085_v15 = vpop.f32.mrb[46].mxu0 }
 0x2f5   : > { %v7087_v16 = vpop.f32.mrb[47].mxu0  ;;  %v1498_v23 = vsel %vm1404_vm13, %v7085_v15, -inf }
 0x2f6   : > { %v1495_v21 = vsel %vm1404_vm13, %v7087_v16, -inf }
 0x2f7   : > { %1493 = vmax.xlane.f32.xlu1 %v1492_v20  ;;  %1496 = vmax.xlane.f32.xlu0 %v1495_v21 }
 0x2fb   : > { %1499 = vmax.xlane.f32.xlu1 %v1498_v23 }
 0x348   : > { %v1407_v24 = vpop.xlane.xlu0 %1406 }
 0x349   : > { %v1501_v29 = vsub.f32 %v6969_v50, %v1407_v24 }
 0x34b   : > { %v1533_v30 = vmul.f32 1.442695, %v1501_v29 }
 0x34c   : > { %v1410_v34 = vpop.xlane.xlu0 %1409  ;;  %v1413_v35 = vpop.xlane.xlu1 %1412 }
 0x34d   : > { %6353 = vpow2.f32 %v1533_v30  ;;  %v1502_v63 = vsub.f32 %v6967_v49, %v1410_v34  ;;  %v1503_v40 = vsub.f32 %v6975_v54, %v1413_v35 }
 0x34f   : > { %v1535_v44 = vmul.f32 1.442695, %v1502_v63  ;;  %v1537_v9 = vmul.f32 1.442695, %v1503_v40 }
 0x350   : > { %v1416_v47 = vpop.xlane.xlu1 %1415  ;;  %v1419_v52 = vpop.xlane.xlu0 %1418 }
 0x351   : > { %6355 = vpow2.f32 %v1535_v44  ;;  %v1504_v61 = vsub.f32 %v6973_v53, %v1416_v47  ;;  %v1505_v62 = vsub.f32 %v6983_v60, %v1419_v52 }
 0x352   : > { %6357 = vpow2.f32 %v1537_v9 }
 0x353   : > { %v1539_v2 = vmul.f32 1.442695, %v1504_v61  ;;  %v1541_v50 = vmul.f32 1.442695, %v1505_v62 }
 0x354   : > { %v1422_v12 = vpop.xlane.xlu1 %1421  ;;  %v1425_v20 = vpop.xlane.xlu0 %1424 }
 0x355   : > { %6359 = vpow2.f32 %v1539_v2  ;;  %v1506_v21 = vsub.f32 %v6981_v58, %v1422_v12  ;;  %v1507_v49 = vsub.f32 %v6991_v3, %v1425_v20 }
 0x356   : > { %6361 = vpow2.f32 %v1541_v50 }
 0x357   : > { %v7102_v54 = vpop.eup %6353  ;;  %v1543_v23 = vmul.f32 1.442695, %v1506_v21  ;;  %v1545_v24 = vmul.f32 1.442695, %v1507_v49 }
 0x358   : > { %v1428_v29 = vpop.xlane.xlu1 %1427  ;;  %v1431_v30 = vpop.xlane.xlu0 %1430  ;;  %v1597_v53 = vsel %vm1404_vm13, %v7102_v54, 0.0 }
 0x359   : > { %6363 = vpow2.f32 %v1543_v23  ;;  %v1508_v60 = vsub.f32 %v6989_v0, %v1428_v29  ;;  %v1509_v34 = vsub.f32 %v6999_v10, %v1431_v30  ;;  %1598 = vadd.xlane.f32.xlu0 %v1597_v53 }
 0x35a   : > { %6365 = vpow2.f32 %v1545_v24 }
 0x35b   : > { %v7108_v58 = vpop.eup %6355  ;;  %v1547_v3 = vmul.f32 1.442695, %v1508_v60  ;;  %v1549_v35 = vmul.f32 1.442695, %v1509_v34 }
 0x35c   : > { %v7110_v63 = vpop.eup %6357  ;;  %v1434_v40 = vpop.xlane.xlu1 %1433  ;;  %v1600_v9 = vsel %vm1404_vm13, %v7108_v58, 0.0 }
 0x35d   : > { %v1437_v44 = vpop.xlane.xlu0 %1436  ;;  %6367 = vpow2.f32 %v1547_v3  ;;  %v1510_v47 = vsub.f32 %v6997_v8, %v1434_v40  ;;  %1601 = vadd.xlane.f32.xlu1 %v1600_v9  ;;  %v1603_v10 = vsel %vm1404_vm13, %v7110_v63, 0.0 }
 0x35e   : > { %v1511_v0 = vsub.f32 %v7007_v13, %v1437_v44  ;;  %6369 = vpow2.f32 %v1549_v35  ;;  %1604 = vadd.xlane.f32.xlu0 %v1603_v10 }
 0x35f   : > { %v7118_v52 = vpop.eup %6359  ;;  %v1551_v61 = vmul.f32 1.442695, %v1510_v47 }
 0x360   : > { %v1553_v62 = vmul.f32 1.442695, %v1511_v0  ;;  %v7120_v2 = vpop.eup %6361  ;;  %v1440_v50 = vpop.xlane.xlu1 %1439  ;;  %v1606_v20 = vsel %vm1404_vm13, %v7118_v52, 0.0 }
 0x361   : > { %v1443_v12 = vpop.xlane.xlu0 %1442  ;;  %6371 = vpow2.f32 %v1551_v61  ;;  %v1512_v8 = vsub.f32 %v7005_v14, %v1440_v50  ;;  %1607 = vadd.xlane.f32.xlu1 %v1606_v20  ;;  %v1609_v21 = vsel %vm1404_vm13, %v7120_v2, 0.0 }
 0x362   : > { %v1513_v13 = vsub.f32 %v7015_v18, %v1443_v12  ;;  %6373 = vpow2.f32 %v1553_v62  ;;  %1610 = vadd.xlane.f32.xlu0 %v1609_v21 }
 0x363   : > { %v7128_v49 = vpop.eup %6363  ;;  %v1555_v23 = vmul.f32 1.442695, %v1512_v8 }
 0x364   : > { %v1557_v24 = vmul.f32 1.442695, %v1513_v13  ;;  %v7130_v29 = vpop.eup %6365  ;;  %v1446_v30 = vpop.xlane.xlu1 %1445  ;;  %v1612_v60 = vsel %vm1404_vm13, %v7128_v49, 0.0 }
 0x365   : > { %v1449_v53 = vpop.xlane.xlu0 %1448  ;;  %6375 = vpow2.f32 %v1555_v23  ;;  %v1514_v14 = vsub.f32 %v7013_v17, %v1446_v30  ;;  %1613 = vadd.xlane.f32.xlu1 %v1612_v60  ;;  %v1615_v34 = vsel %vm1404_vm13, %v7130_v29, 0.0 }
 0x366   : > { %v1515_v18 = vsub.f32 %v7023_v22, %v1449_v53  ;;  %6377 = vpow2.f32 %v1557_v24  ;;  %1616 = vadd.xlane.f32.xlu0 %v1615_v34 }
 0x367   : > { %v7138_v3 = vpop.eup %6367  ;;  %v1559_v35 = vmul.f32 1.442695, %v1514_v14 }
 0x368   : > { %v1561_v40 = vmul.f32 1.442695, %v1515_v18  ;;  %v7140_v44 = vpop.eup %6369  ;;  %v1452_v9 = vpop.xlane.xlu1 %1451  ;;  %v1618_v0 = vsel %vm1404_vm13, %v7138_v3, 0.0 }
 0x369   : > { %v1455_v47 = vpop.xlane.xlu0 %1454  ;;  %6379 = vpow2.f32 %v1559_v35  ;;  %v1516_v17 = vsub.f32 %v7021_v1, %v1452_v9  ;;  %1619 = vadd.xlane.f32.xlu1 %v1618_v0  ;;  %v1621_v10 = vsel %vm1404_vm13, %v7140_v44, 0.0 }
 0x36a   : > { %v1517_v22 = vsub.f32 %v7031_v26, %v1455_v47  ;;  %6381 = vpow2.f32 %v1561_v40  ;;  %1622 = vadd.xlane.f32.xlu0 %v1621_v10 }
 0x36b   : > { %v7148_v61 = vpop.eup %6371  ;;  %v1563_v62 = vmul.f32 1.442695, %v1516_v17 }
 0x36c   : > { %v1565_v50 = vmul.f32 1.442695, %v1517_v22  ;;  %v7150_v12 = vpop.eup %6373  ;;  %v1458_v20 = vpop.xlane.xlu1 %1457  ;;  %v1624_v13 = vsel %vm1404_vm13, %v7148_v61, 0.0 }
 0x36d   : > { %v1461_v8 = vpop.xlane.xlu0 %1460  ;;  %6383 = vpow2.f32 %v1563_v62  ;;  %v1518_v1 = vsub.f32 %v7029_v25, %v1458_v20  ;;  %1625 = vadd.xlane.f32.xlu1 %v1624_v13  ;;  %v1627_v21 = vsel %vm1404_vm13, %v7150_v12, 0.0 }
 0x36e   : > { %v1519_v26 = vsub.f32 %v7039_v33, %v1461_v8  ;;  %6385 = vpow2.f32 %v1565_v50  ;;  %1628 = vadd.xlane.f32.xlu0 %v1627_v21 }
 0x36f   : > { %v7158_v23 = vpop.eup %6375  ;;  %v1567_v24 = vmul.f32 1.442695, %v1518_v1 }
 0x370   : > { %v1569_v30 = vmul.f32 1.442695, %v1519_v26  ;;  %v7160_v53 = vpop.eup %6377  ;;  %v1464_v60 = vpop.xlane.xlu1 %1463  ;;  %v1630_v18 = vsel %vm1404_vm13, %v7158_v23, 0.0 }
 0x371   : > { %v1467_v14 = vpop.xlane.xlu0 %1466  ;;  %6387 = vpow2.f32 %v1567_v24  ;;  %v1520_v25 = vsub.f32 %v7037_v31, %v1464_v60  ;;  %1631 = vadd.xlane.f32.xlu1 %v1630_v18  ;;  %v1633_v34 = vsel %vm1404_vm13, %v7160_v53, 0.0 }
 0x372   : > { %v1521_v33 = vsub.f32 %v7047_v37, %v1467_v14  ;;  %6389 = vpow2.f32 %v1569_v30  ;;  %1634 = vadd.xlane.f32.xlu0 %v1633_v34 }
 0x373   : > { %v7168_v35 = vpop.eup %6379  ;;  %v1571_v40 = vmul.f32 1.442695, %v1520_v25 }
 0x374   : > { %v1573_v9 = vmul.f32 1.442695, %v1521_v33  ;;  %v7170_v47 = vpop.eup %6381  ;;  %v1470_v0 = vpop.xlane.xlu1 %1469  ;;  %v1636_v22 = vsel %vm1404_vm13, %v7168_v35, 0.0 }
 0x375   : > { %v1473_v17 = vpop.xlane.xlu0 %1472  ;;  %6391 = vpow2.f32 %v1571_v40  ;;  %v1522_v31 = vsub.f32 %v7045_v36, %v1470_v0  ;;  %1637 = vadd.xlane.f32.xlu1 %v1636_v22  ;;  %v1639_v10 = vsel %vm1404_vm13, %v7170_v47, 0.0 }
 0x376   : > { %v1523_v37 = vsub.f32 %v7055_v42, %v1473_v17  ;;  %6393 = vpow2.f32 %v1573_v9  ;;  %1640 = vadd.xlane.f32.xlu0 %v1639_v10 }
 0x377   : > { %v7178_v62 = vpop.eup %6383  ;;  %v1575_v50 = vmul.f32 1.442695, %v1522_v31 }
 0x378   : > { %v1577_v20 = vmul.f32 1.442695, %v1523_v37  ;;  %v7180_v8 = vpop.eup %6385  ;;  %v1476_v13 = vpop.xlane.xlu1 %1475  ;;  %v1642_v26 = vsel %vm1404_vm13, %v7178_v62, 0.0 }
 0x379   : > { %v1479_v1 = vpop.xlane.xlu0 %1478  ;;  %6395 = vpow2.f32 %v1575_v50  ;;  %v1524_v36 = vsub.f32 %v7053_v41, %v1476_v13  ;;  %1643 = vadd.xlane.f32.xlu1 %v1642_v26  ;;  %v1645_v21 = vsel %vm1404_vm13, %v7180_v8, 0.0 }
 0x37a   : > { %v1525_v42 = vsub.f32 %v7063_v46, %v1479_v1  ;;  %6397 = vpow2.f32 %v1577_v20  ;;  %1646 = vadd.xlane.f32.xlu0 %v1645_v21 }
 0x37b   : > { %v7188_v24 = vpop.eup %6387  ;;  %v1579_v30 = vmul.f32 1.442695, %v1524_v36 }
 0x37c   : > { %v1581_v60 = vmul.f32 1.442695, %v1525_v42  ;;  %v7190_v14 = vpop.eup %6389  ;;  %v1482_v18 = vpop.xlane.xlu1 %1481  ;;  %v1648_v33 = vsel %vm1404_vm13, %v7188_v24, 0.0 }
 0x37d   : > { %v1485_v25 = vpop.xlane.xlu0 %1484  ;;  %6399 = vpow2.f32 %v1579_v30  ;;  %v1526_v41 = vsub.f32 %v7061_v45, %v1482_v18  ;;  %1649 = vadd.xlane.f32.xlu1 %v1648_v33  ;;  %v1651_v34 = vsel %vm1404_vm13, %v7190_v14, 0.0 }
 0x37e   : > { %v1527_v46 = vsub.f32 %v7071_v57, %v1485_v25  ;;  %6401 = vpow2.f32 %v1581_v60  ;;  %1652 = vadd.xlane.f32.xlu0 %v1651_v34 }
 0x37f   : > { %v7198_v40 = vpop.eup %6391  ;;  %v1583_v9 = vmul.f32 1.442695, %v1526_v41 }
 0x380   : > { %v1585_v0 = vmul.f32 1.442695, %v1527_v46  ;;  %v7200_v17 = vpop.eup %6393  ;;  %v1488_v22 = vpop.xlane.xlu1 %1487  ;;  %v1654_v37 = vsel %vm1404_vm13, %v7198_v40, 0.0 }
 0x381   : > { %v1491_v31 = vpop.xlane.xlu0 %1490  ;;  %6403 = vpow2.f32 %v1583_v9  ;;  %v1528_v45 = vsub.f32 %v7069_v55, %v1488_v22  ;;  %1655 = vadd.xlane.f32.xlu1 %v1654_v37  ;;  %v1657_v10 = vsel %vm1404_vm13, %v7200_v17, 0.0 }
 0x382   : > { %v1529_v57 = vsub.f32 %v7079_v7, %v1491_v31  ;;  %6405 = vpow2.f32 %v1585_v0  ;;  %1658 = vadd.xlane.f32.xlu0 %v1657_v10 }
 0x383   : > { %v7208_v50 = vpop.eup %6395  ;;  %v1587_v20 = vmul.f32 1.442695, %v1528_v45 }
 0x384   : > { %v1589_v13 = vmul.f32 1.442695, %v1529_v57  ;;  %v7210_v1 = vpop.eup %6397  ;;  %v1494_v26 = vpop.xlane.xlu1 %1493  ;;  %v1660_v42 = vsel %vm1404_vm13, %v7208_v50, 0.0 }
 0x385   : > { %v1497_v36 = vpop.xlane.xlu0 %1496  ;;  %6407 = vpow2.f32 %v1587_v20  ;;  %v1530_v55 = vsub.f32 %v7077_v6, %v1494_v26  ;;  %1661 = vadd.xlane.f32.xlu1 %v1660_v42  ;;  %v1663_v21 = vsel %vm1404_vm13, %v7210_v1, 0.0  ;;  %v5063_v42 = vld [vmem:[%s8197_s4 + $0x60] sm:$0xff] }
 0x386   : > { %v1531_v7 = vsub.f32 %v7087_v16, %v1497_v36  ;;  %6409 = vpow2.f32 %v1589_v13  ;;  %1664 = vadd.xlane.f32.xlu0 %v1663_v21 }
 0x387   : > { %v7218_v30 = vpop.eup %6399  ;;  %v1591_v60 = vmul.f32 1.442695, %v1530_v55  ;;  %v5064_v55 = vld [vmem:[%s8197_s4 + $0x68] sm:$0xff] }
 0x388   : > { %v1593_v18 = vmul.f32 1.442695, %v1531_v7  ;;  %v7220_v25 = vpop.eup %6401  ;;  %v1500_v33 = vpop.xlane.xlu1 %1499  ;;  %v1666_v41 = vsel %vm1404_vm13, %v7218_v30, 0.0  ;;  %v6152_v7 = vpack.c.bf16 %v5064_v55, %v5063_v42 }
 0x389   : > { %6411 = vpow2.f32 %v1591_v60  ;;  %v1532_v6 = vsub.f32 %v7085_v15, %v1500_v33  ;;  %1667 = vadd.xlane.f32.xlu1 %v1666_v41  ;;  %v1669_v16 = vsel %vm1404_vm13, %v7220_v25, 0.0 }
 0x38a   : > { %6413 = vpow2.f32 %v1593_v18  ;;  %1670 = vadd.xlane.f32.xlu0 %v1669_v16  ;;  %6153 = vmatprep.subr.bf16.mxu1 %v6152_v7 }
 0x38b   : > { %v7227_v46 = vpop.eup %6403  ;;  %v1595_v34 = vmul.f32 1.442695, %v1532_v6 }
 0x38c   : > { %v7229_v9 = vpop.eup %6405  ;;  %v1672_v0 = vsel %vm1404_vm13, %v7227_v46, 0.0 }
 0x38d   : > { %6415 = vpow2.f32 %v1595_v34  ;;  %1673 = vadd.xlane.f32.xlu1 %v1672_v0  ;;  %v1675_v22 = vsel %vm1404_vm13, %v7229_v9, 0.0 }
 0x38e   : > { %1676 = vadd.xlane.f32.xlu0 %v1675_v22 }
 0x38f   : > { %v7235_v15 = vpop.eup %6407 }
 0x390   : > { %v7237_v31 = vpop.eup %6409  ;;  %v1678_v37 = vsel %vm1404_vm13, %v7235_v15, 0.0 }
 0x391   : > { %1679 = vadd.xlane.f32.xlu1 %v1678_v37  ;;  %v1681_v45 = vsel %vm1404_vm13, %v7237_v31, 0.0 }
 0x392   : > { %1682 = vadd.xlane.f32.xlu0 %v1681_v45 }
 0x393   : > { %v7243_v57 = vpop.eup %6411 }
 0x394   : > { %v7245_v10 = vpop.eup %6413  ;;  %v1684_v20 = vsel %vm1404_vm13, %v7243_v57, 0.0 }
 0x395   : > { %1685 = vadd.xlane.f32.xlu1 %v1684_v20  ;;  %v1687_v13 = vsel %vm1404_vm13, %v7245_v10, 0.0 }
 0x396   : > { %1688 = vadd.xlane.f32.xlu0 %v1687_v13 }
 0x397   : > { %v7251_v26 = vpop.eup %6415 }
 0x398   : > { %v1690_v36 = vsel %vm1404_vm13, %v7251_v26, 0.0 }
 0x399   : > { %1691 = vadd.xlane.f32.xlu1 %v1690_v36 }
 0x3e6   : > { %v1599_v21 = vpop.xlane.xlu0 %1598 }
 0x3e7   : > { %6417 = vrcp.f32 %v1599_v21 }
 0x3ea   : > { %v1602_v60 = vpop.xlane.xlu1 %1601 }
 0x3eb   : > { %6419 = vrcp.f32 %v1602_v60  ;;  %v1605_v18 = vpop.xlane.xlu0 %1604 }
 0x3ec   : > { %6421 = vrcp.f32 %v1605_v18 }
 0x3ee   : > { %v1608_v33 = vpop.xlane.xlu1 %1607 }
 0x3ef   : > { %6423 = vrcp.f32 %v1608_v33  ;;  %v1611_v41 = vpop.xlane.xlu0 %1610 }
 0x3f0   : > { %6425 = vrcp.f32 %v1611_v41 }
 0x3f1   : > { %v6418_v6 = vpop.eup %6417 }
 0x3f2   : > { %v1614_v16 = vpop.xlane.xlu1 %1613  ;;  %v1725_v34 = vmul.f32 %v6418_v6, %v7102_v54 }
 0x3f3   : > { %6427 = vrcp.f32 %v1614_v16  ;;  %v1617_v0 = vpop.xlane.xlu0 %1616 }
 0x3f4   : > { %6429 = vrcp.f32 %v1617_v0  ;;  %5693 = vmatprep.mubr.msk.f32.mxu1 %vm1404_vm13, %v1725_v34 }
 0x3f5   : > { %v6420_v22 = vpop.eup %6419 }
 0x3f6   : > { %v6422_v37 = vpop.eup %6421  ;;  %v1726_v45 = vmul.f32 %v6420_v22, %v7108_v58  ;;  %v1620_v20 = vpop.xlane.xlu1 %1619 }
 0x3f7   : > { %6431 = vrcp.f32 %v1620_v20  ;;  %v1623_v13 = vpop.xlane.xlu0 %1622  ;;  %v1727_v36 = vmul.f32 %v6422_v37, %v7110_v63 }
 0x3f8   : > { %6433 = vrcp.f32 %v1623_v13  ;;  %5694 = vmatmul.mubr.msk.f32.vlgmr.msra.gmra.mrb[16].mxu1 %vm1404_vm13, %v1726_v45 }
 0x3f9   : > { %v6424_v42 = vpop.eup %6423  ;;  %5696 = vmatprep.mubr.msk.f32.mxu1 %vm1404_vm13, %v1727_v36  ;;  %6155 = vmatpush3.bf16.msra.mxu1 %v6152_v7 }
 0x3fa   : > { %v6426_v54 = vpop.eup %6425  ;;  %v1626_v55 = vpop.xlane.xlu1 %1625  ;;  %v1728_v21 = vmul.f32 %v6424_v42, %v7118_v52 }
 0x3fb   : > { %6435 = vrcp.f32 %v1626_v55  ;;  %v1629_v60 = vpop.xlane.xlu0 %1628  ;;  %v1729_v58 = vmul.f32 %v6426_v54, %v7120_v2 }
 0x3fc   : > { %6437 = vrcp.f32 %v1629_v60  ;;  %5697 = vmatmul.mubr.msk.f32.gmra.mrb[18].mxu1 %vm1404_vm13, %v1728_v21 }
 0x3fd   : > { %v6428_v18 = vpop.eup %6427  ;;  %5699 = vmatprep.mubr.msk.f32.mxu1 %vm1404_vm13, %v1729_v58 }
 0x3fe   : > { %v6430_v63 = vpop.eup %6429  ;;  %v1632_v33 = vpop.xlane.xlu1 %1631  ;;  %v1730_v41 = vmul.f32 %v6428_v18, %v7128_v49 }
 0x3ff   : > { %6439 = vrcp.f32 %v1632_v33  ;;  %v1635_v7 = vpop.xlane.xlu0 %1634  ;;  %v1731_v6 = vmul.f32 %v6430_v63, %v7130_v29 }
 0x400   : > { %6441 = vrcp.f32 %v1635_v7  ;;  %5700 = vmatmul.mubr.msk.f32.gmra.mrb[20].mxu1 %vm1404_vm13, %v1730_v41 }
 0x401   : > { %v6432_v52 = vpop.eup %6431  ;;  %5702 = vmatprep.mubr.msk.f32.mxu1 %vm1404_vm13, %v1731_v6 }
 0x402   : > { %v6434_v2 = vpop.eup %6433  ;;  %v1638_v16 = vpop.xlane.xlu1 %1637  ;;  %v1732_v34 = vmul.f32 %v6432_v52, %v7138_v3 }
 0x403   : > { %6443 = vrcp.f32 %v1638_v16  ;;  %v1641_v0 = vpop.xlane.xlu0 %1640  ;;  %v1733_v22 = vmul.f32 %v6434_v2, %v7140_v44 }
 0x404   : > { %6445 = vrcp.f32 %v1641_v0  ;;  %5703 = vmatmul.mubr.msk.f32.gmra.mrb[22].mxu1 %vm1404_vm13, %v1732_v34 }
 0x405   : > { %v6436_v49 = vpop.eup %6435  ;;  %5705 = vmatprep.mubr.msk.f32.mxu1 %vm1404_vm13, %v1733_v22 }
 0x406   : > { %v6438_v29 = vpop.eup %6437  ;;  %v1644_v37 = vpop.xlane.xlu1 %1643  ;;  %v1734_v45 = vmul.f32 %v6436_v49, %v7148_v61 }
 0x407   : > { %6447 = vrcp.f32 %v1644_v37  ;;  %v1647_v20 = vpop.xlane.xlu0 %1646  ;;  %v1735_v13 = vmul.f32 %v6438_v29, %v7150_v12 }
 0x408   : > { %6449 = vrcp.f32 %v1647_v20  ;;  %5706 = vmatmul.mubr.msk.f32.gmra.mrb[24].mxu1 %vm1404_vm13, %v1734_v45 }
 0x409   : > { %v6440_v3 = vpop.eup %6439  ;;  %5708 = vmatprep.mubr.msk.f32.mxu1 %vm1404_vm13, %v1735_v13 }
 0x40a   : > { %v6442_v44 = vpop.eup %6441  ;;  %v1650_v36 = vpop.xlane.xlu1 %1649  ;;  %v1736_v42 = vmul.f32 %v6440_v3, %v7158_v23 }
 0x40b   : > { %6451 = vrcp.f32 %v1650_v36  ;;  %v1653_v54 = vpop.xlane.xlu0 %1652  ;;  %v1737_v55 = vmul.f32 %v6442_v44, %v7160_v53 }
 0x40c   : > { %6453 = vrcp.f32 %v1653_v54  ;;  %5709 = vmatmul.mubr.msk.f32.gmra.mrb[26].mxu1 %vm1404_vm13, %v1736_v42 }
 0x40d   : > { %v6444_v61 = vpop.eup %6443  ;;  %5711 = vmatprep.mubr.msk.f32.mxu1 %vm1404_vm13, %v1737_v55 }
 0x40e   : > { %v6446_v12 = vpop.eup %6445  ;;  %v1656_v21 = vpop.xlane.xlu1 %1655  ;;  %v1738_v60 = vmul.f32 %v6444_v61, %v7168_v35 }
 0x40f   : > { %6455 = vrcp.f32 %v1656_v21  ;;  %v1659_v58 = vpop.xlane.xlu0 %1658  ;;  %v1739_v18 = vmul.f32 %v6446_v12, %v7170_v47 }
 0x410   : > { %6457 = vrcp.f32 %v1659_v58  ;;  %5712 = vmatmul.mubr.msk.f32.gmra.mrb[28].mxu1 %vm1404_vm13, %v1738_v60 }
 0x411   : > { %v6448_v23 = vpop.eup %6447  ;;  %5714 = vmatprep.mubr.msk.f32.mxu1 %vm1404_vm13, %v1739_v18 }
 0x412   : > { %v6450_v53 = vpop.eup %6449  ;;  %v1662_v63 = vpop.xlane.xlu1 %1661  ;;  %v1740_v33 = vmul.f32 %v6448_v23, %v7178_v62 }
 0x413   : > { %6459 = vrcp.f32 %v1662_v63  ;;  %v1665_v41 = vpop.xlane.xlu0 %1664  ;;  %v1741_v7 = vmul.f32 %v6450_v53, %v7180_v8 }
 0x414   : > { %6461 = vrcp.f32 %v1665_v41  ;;  %5715 = vmatmul.mubr.msk.f32.gmra.mrb[30].mxu1 %vm1404_vm13, %v1740_v33 }
 0x415   : > { %v6452_v35 = vpop.eup %6451  ;;  %5717 = vmatprep.mubr.msk.f32.mxu1 %vm1404_vm13, %v1741_v7 }
 0x416   : > { %v6454_v47 = vpop.eup %6453  ;;  %v1668_v6 = vpop.xlane.xlu1 %1667  ;;  %v1742_v52 = vmul.f32 %v6452_v35, %v7188_v24 }
 0x417   : > { %6463 = vrcp.f32 %v1668_v6  ;;  %v1671_v2 = vpop.xlane.xlu0 %1670  ;;  %v1743_v16 = vmul.f32 %v6454_v47, %v7190_v14 }
 0x418   : > { %6465 = vrcp.f32 %v1671_v2  ;;  %5718 = vmatmul.mubr.msk.f32.gmra.mrb[32].mxu1 %vm1404_vm13, %v1742_v52 }
 0x419   : > { %v6456_v62 = vpop.eup %6455  ;;  %5720 = vmatprep.mubr.msk.f32.mxu1 %vm1404_vm13, %v1743_v16 }
 0x41a   : > { %v6458_v8 = vpop.eup %6457  ;;  %v1674_v34 = vpop.xlane.xlu1 %1673  ;;  %v1744_v0 = vmul.f32 %v6456_v62, %v7198_v40 }
 0x41b   : > { %6467 = vrcp.f32 %v1674_v34  ;;  %v1677_v22 = vpop.xlane.xlu0 %1676  ;;  %v1745_v49 = vmul.f32 %v6458_v8, %v7200_v17 }
 0x41c   : > { %6469 = vrcp.f32 %v1677_v22  ;;  %5721 = vmatmul.mubr.msk.f32.gmra.mrb[34].mxu1 %vm1404_vm13, %v1744_v0 }
 0x41d   : > { %v6460_v24 = vpop.eup %6459  ;;  %5723 = vmatprep.mubr.msk.f32.mxu1 %vm1404_vm13, %v1745_v49 }
 0x41e   : > { %v6462_v14 = vpop.eup %6461  ;;  %v1680_v29 = vpop.xlane.xlu1 %1679  ;;  %v1746_v37 = vmul.f32 %v6460_v24, %v7208_v50 }
 0x41f   : > { %6471 = vrcp.f32 %v1680_v29  ;;  %v1683_v45 = vpop.xlane.xlu0 %1682  ;;  %v1747_v20 = vmul.f32 %v6462_v14, %v7210_v1 }
 0x420   : > { %6473 = vrcp.f32 %v1683_v45  ;;  %5724 = vmatmul.mubr.msk.f32.gmra.mrb[36].mxu1 %vm1404_vm13, %v1746_v37 }
 0x421   : > { %v6464_v40 = vpop.eup %6463  ;;  %5726 = vmatprep.mubr.msk.f32.mxu1 %vm1404_vm13, %v1747_v20 }
 0x422   : > { %v6466_v17 = vpop.eup %6465  ;;  %v1686_v13 = vpop.xlane.xlu1 %1685  ;;  %v1748_v3 = vmul.f32 %v6464_v40, %v7218_v30 }
 0x423   : > { %6475 = vrcp.f32 %v1686_v13  ;;  %v1689_v44 = vpop.xlane.xlu0 %1688  ;;  %v1749_v36 = vmul.f32 %v6466_v17, %v7220_v25 }
 0x424   : > { %6477 = vrcp.f32 %v1689_v44  ;;  %5727 = vmatmul.mubr.msk.f32.gmra.mrb[38].mxu1 %vm1404_vm13, %v1748_v3 }
 0x425   : > { %v6468_v50 = vpop.eup %6467  ;;  %5729 = vmatprep.mubr.msk.f32.mxu1 %vm1404_vm13, %v1749_v36 }
 0x426   : > { %v6470_v1 = vpop.eup %6469  ;;  %v1692_v42 = vpop.xlane.xlu1 %1691  ;;  %v1750_v54 = vmul.f32 %v6468_v50, %v7227_v46 }
 0x427   : > { %6479 = vrcp.f32 %v1692_v42  ;;  %v1751_v55 = vmul.f32 %v6470_v1, %v7229_v9 }
 0x428   : > { %5730 = vmatmul.mubr.msk.f32.gmra.mrb[40].mxu1 %vm1404_vm13, %v1750_v54 }
 0x429   : > { %v6472_v30 = vpop.eup %6471  ;;  %5732 = vmatprep.mubr.msk.f32.mxu1 %vm1404_vm13, %v1751_v55 }
 0x42a   : > { %v6474_v61 = vpop.eup %6473  ;;  %v1752_v25 = vmul.f32 %v6472_v30, %v7235_v15  ;;  %v5065_v15 = vld [vmem:[%s8197_s4 + $0x70] sm:$0xff] }
 0x42b   : > { %v1753_v12 = vmul.f32 %v6474_v61, %v7237_v31  ;;  %v5066_v31 = vld [vmem:[%s8197_s4 + $0x78] sm:$0xff] }
 0x42c   : > { %5733 = vmatmul.mubr.msk.f32.gmra.mrb[42].mxu1 %vm1404_vm13, %v1752_v25 }
 0x42d   : > { %v6476_v21 = vpop.eup %6475  ;;  %5735 = vmatprep.mubr.msk.f32.mxu1 %vm1404_vm13, %v1753_v12 }
 0x42e   : > { %v6478_v60 = vpop.eup %6477  ;;  %v1754_v46 = vmul.f32 %v6476_v21, %v7243_v57  ;;  %v6156_v57 = vpack.c.bf16 %v5066_v31, %v5065_v15 }
 0x42f   : > { %v1755_v9 = vmul.f32 %v6478_v60, %v7245_v10 }
 0x430   : > { %5736 = vmatmul.mubr.msk.f32.gmra.mrb[44].mxu1 %vm1404_vm13, %v1754_v46  ;;  %6157 = vmatprep.subr.bf16.mxu1 %v6156_v57 }
 0x431   : > { %v6480_v58 = vpop.eup %6479  ;;  %5738 = vmatprep.mubr.msk.f32.mxu1 %vm1404_vm13, %v1755_v9  ;;  %6159 = vmatpush3.bf16.msra.mxu1 %v6156_v57 }
 0x432   : > { %v1756_v18 = vmul.f32 %v6480_v58, %v7251_v26 }
 0x434   : > { %5739 = vmatmul.mubr.msk.f32.gmra.mrb[46].mxu1 %vm1404_vm13, %v1756_v18 }
 0x4cb   : > { %v5695_v10 = vpop.f32.mrb[16].mxu1 }
 0x4cc   : > { %v1919_v23 = vpop.f32.mrb[17].mxu1  ;;  %v2079_v47 = vmul.f32 %v5695_v10, %v6807_v5 }
 0x4cd   : > { %v2078_v2 = vmul.f32 %v6807_v5, %v1919_v23 }
 0x4cf   : > { %v5698_v53 = vpop.f32.mrb[18].mxu1 }
 0x4d0   : > { %v1929_v63 = vpop.f32.mrb[19].mxu1  ;;  %v2081_v0 = vmul.f32 %v5698_v53, %v6807_v5 }
 0x4d1   : > { %v2080_v24 = vmul.f32 %v6807_v5, %v1929_v63 }
 0x4d3   : > { %v5701_v33 = vpop.f32.mrb[20].mxu1 }
 0x4d4   : > { %v1939_v41 = vpop.f32.mrb[21].mxu1  ;;  %v2083_v20 = vmul.f32 %v5701_v33, %v6807_v5 }
 0x4d5   : > { %v2082_v13 = vmul.f32 %v6807_v5, %v1939_v41 }
 0x4d7   : > { %v5704_v26 = vpop.f32.mrb[22].mxu1 }
 0x4d8   : > { %v1949_v7 = vpop.f32.mrb[23].mxu1  ;;  %v2085_v1 = vmul.f32 %v5704_v26, %v6807_v5 }
 0x4d9   : > { %v2084_v55 = vmul.f32 %v6807_v5, %v1949_v7 }
 0x4db   : > { %v5707_v35 = vpop.f32.mrb[24].mxu1 }
 0x4dc   : > { %v2087_v6 = vmul.f32 %v5707_v35, %v6883_v19  ;;  %v1959_v52 = vpop.f32.mrb[25].mxu1 }
 0x4dd   : > { %v2086_v16 = vmul.f32 %v6883_v19, %v1959_v52 }
 0x4de   : > { %v2095_v62 = vadd.f32 %v2087_v6, %v2079_v47 }
 0x4df   : > { %v2094_v8 = vadd.f32 %v2086_v16, %v2078_v2  ;;  %v5710_v34 = vpop.f32.mrb[26].mxu1 }
 0x4e0   : > { %v2089_v22 = vmul.f32 %v5710_v34, %v6883_v19  ;;  %v1969_v49 = vpop.f32.mrb[27].mxu1 }
 0x4e1   : > { %v2088_v14 = vmul.f32 %v6883_v19, %v1969_v49 }
 0x4e2   : > { %v2097_v29 = vadd.f32 %v2089_v22, %v2081_v0 }
 0x4e3   : > { %v2096_v37 = vadd.f32 %v2088_v14, %v2080_v24  ;;  %v5713_v45 = vpop.f32.mrb[28].mxu1 }
 0x4e4   : > { %v2091_v40 = vmul.f32 %v5713_v45, %v6883_v19  ;;  %v1979_v17 = vpop.f32.mrb[29].mxu1 }
 0x4e5   : > { %v2090_v3 = vmul.f32 %v6883_v19, %v1979_v17 }
 0x4e6   : > { %v2099_v44 = vadd.f32 %v2091_v40, %v2083_v20 }
 0x4e7   : > { %v2098_v36 = vadd.f32 %v2090_v3, %v2082_v13  ;;  %v5716_v50 = vpop.f32.mrb[30].mxu1 }
 0x4e8   : > { %v2093_v42 = vmul.f32 %v5716_v50, %v6883_v19  ;;  %v1989_v54 = vpop.f32.mrb[31].mxu1 }
 0x4e9   : > { %v2092_v30 = vmul.f32 %v6883_v19, %v1989_v54 }
 0x4ea   : > { %v2101_v61 = vadd.f32 %v2093_v42, %v2085_v1 }
 0x4eb   : > { %v2100_v25 = vadd.f32 %v2092_v30, %v2084_v55  ;;  %v5719_v12 = vpop.f32.mrb[32].mxu1 }
 0x4ec   : > { %v2103_v21 = vmul.f32 %v5719_v12, %v6911_v27  ;;  %v1999_v60 = vpop.f32.mrb[33].mxu1 }
 0x4ed   : > { %v2102_v46 = vmul.f32 %v6911_v27, %v1999_v60 }
 0x4ee   : > { %v2111_v9 = vadd.f32 %v2103_v21, %v2095_v62 }
 0x4ef   : > { %v2110_v58 = vadd.f32 %v2102_v46, %v2094_v8  ;;  %v5722_v18 = vpop.f32.mrb[34].mxu1 }
 0x4f0   : > { %v2105_v15 = vmul.f32 %v5722_v18, %v6911_v27  ;;  %v2009_v31 = vpop.f32.mrb[35].mxu1 }
 0x4f1   : > { %v2104_v57 = vmul.f32 %v6911_v27, %v2009_v31 }
 0x4f2   : > { %v2113_v10 = vadd.f32 %v2105_v15, %v2097_v29 }
 0x4f3   : > { %v2112_v23 = vadd.f32 %v2104_v57, %v2096_v37  ;;  %v5725_v53 = vpop.f32.mrb[36].mxu1 }
 0x4f4   : > { %v2107_v63 = vmul.f32 %v5725_v53, %v6911_v27  ;;  %v2019_v33 = vpop.f32.mrb[37].mxu1 }
 0x4f5   : > { %v2106_v41 = vmul.f32 %v6911_v27, %v2019_v33 }
 0x4f6   : > { %v2115_v26 = vadd.f32 %v2107_v63, %v2099_v44 }
 0x4f7   : > { %v2114_v7 = vadd.f32 %v2106_v41, %v2098_v36  ;;  %v5728_v35 = vpop.f32.mrb[38].mxu1 }
 0x4f8   : > { %v2109_v47 = vmul.f32 %v5728_v35, %v6911_v27  ;;  %v2029_v6 = vpop.f32.mrb[39].mxu1 }
 0x4f9   : > { %v2108_v52 = vmul.f32 %v6911_v27, %v2029_v6 }
 0x4fa   : > { %v2117_v2 = vadd.f32 %v2109_v47, %v2101_v61  ;;  %v5067_v61 = vld [vmem:[%s8198_s5 + $0x4] ss:$0 sm:$0xff] }
 0x4fb   : > { %v2116_v16 = vadd.f32 %v2108_v52, %v2100_v25  ;;  %v5731_v62 = vpop.f32.mrb[40].mxu1 }
 0x4fc   : > { %v2119_v8 = vmul.f32 %v5731_v62, %v6939_v38  ;;  %v2039_v34 = vpop.f32.mrb[41].mxu1 }
 0x4fd   : > { %v2118_v0 = vmul.f32 %v6939_v38, %v2039_v34  ;;  %v2413_v34 = vld [vmem:[%s8199_s6 + $0x8] sm:$0xff] }
 0x4fe   : > { %v2127_v22 = vadd.f32 %v2119_v8, %v2111_v9 }
 0x4ff   : > { %v2126_v49 = vadd.f32 %v2118_v0, %v2110_v58  ;;  %v5734_v24 = vpop.f32.mrb[42].mxu1 }
 0x500   : > { %v2121_v14 = vmul.f32 %v5734_v24, %v6939_v38  ;;  %v2049_v29 = vpop.f32.mrb[43].mxu1 }
 0x501   : > { %v2120_v37 = vmul.f32 %v6939_v38, %v2049_v29  ;;  %5749 = vmatprep.mubr.msk.f32.mxu1 %vm643_vm1, %v2126_v49 }
 0x502   : > { %v2129_v45 = vadd.f32 %v2121_v14, %v2113_v10  ;;  %5750 = vmatmul.mubr.msk.f32.vlgmr.msra.gmra.mrb[48].mxu1 %vm643_vm1, %v2127_v22 }
 0x503   : > { %v2128_v20 = vadd.f32 %v2120_v37, %v2112_v23  ;;  %v5737_v40 = vpop.f32.mrb[44].mxu1 }
 0x504   : > { %v2123_v17 = vmul.f32 %v5737_v40, %v6939_v38  ;;  %v2059_v13 = vpop.f32.mrb[45].mxu1 }
 0x505   : > { %v2122_v3 = vmul.f32 %v6939_v38, %v2059_v13  ;;  %5752 = vmatprep.mubr.msk.f32.mxu1 %vm643_vm1, %v2128_v20 }
 0x506   : > { %v2131_v44 = vadd.f32 %v2123_v17, %v2115_v26  ;;  %5753 = vmatmul.mubr.msk.f32.gmra.mrb[50].mxu1 %vm643_vm1, %v2129_v45 }
 0x507   : > { %v2130_v36 = vadd.f32 %v2122_v3, %v2114_v7  ;;  %v5740_v50 = vpop.f32.mrb[46].mxu1 }
 0x508   : > { %v2125_v1 = vmul.f32 %v5740_v50, %v6939_v38  ;;  %v2069_v42 = vpop.f32.mrb[47].mxu1 }
 0x509   : > { %v2124_v54 = vmul.f32 %v6939_v38, %v2069_v42  ;;  %5755 = vmatprep.mubr.msk.f32.mxu1 %vm643_vm1, %v2130_v36 }
 0x50a   : > { %v2133_v55 = vadd.f32 %v2125_v1, %v2117_v2  ;;  %5756 = vmatmul.mubr.msk.f32.gmra.mrb[52].mxu1 %vm643_vm1, %v2131_v44 }
 0x50b   : > { %v2132_v30 = vadd.f32 %v2124_v54, %v2116_v16 }
 0x50d   : > { %5758 = vmatprep.mubr.msk.f32.mxu1 %vm643_vm1, %v2132_v30 }
 0x50e   : > { %5759 = vmatmul.mubr.msk.f32.gmra.mrb[54].mxu1 %vm643_vm1, %v2133_v55 }
 0x5d5   : > { %v5751_v25 = vpop.f32.mrb[48].mxu1 }
 0x5d6   : > { %v2240_v12 = vadd.f32 %v5751_v25, %v5067_v61  ;;  %v2234_v21 = vpop.f32.mrb[49].mxu1 }
 0x5d7   : > { %v2235_v60 = vadd.f32 %v5067_v61, %v2234_v21 }
 0x5d8   : > { %v2274_v46 = vadd.f32 %v2240_v12, %v6707_v28 }
 0x5d9   : > { %v5754_v9 = vpop.f32.mrb[50].mxu1  ;;  %v2273_v58 = vadd.f32 %v2235_v60, %v6715_v32 }
 0x5da   : > { %v2250_v18 = vadd.f32 %v5754_v9, %v5067_v61  ;;  %v2244_v15 = vpop.f32.mrb[51].mxu1  ;;  %v2286_v31 = vsel %vm643_vm1, %v2274_v46, 0.0 }
 0x5db   : > { %v2245_v57 = vadd.f32 %v5067_v61, %v2244_v15  ;;  %2287 = vadd.xlane.f32.xlu1 %v2286_v31  ;;  %v2283_v10 = vsel %vm643_vm1, %v2273_v58, 0.0 }
 0x5dc   : > { %2284 = vadd.xlane.f32.xlu0 %v2283_v10  ;;  %v2276_v23 = vadd.f32 %v2250_v18, %v6728_v39 }
 0x5dd   : > { %v5757_v53 = vpop.f32.mrb[52].mxu1  ;;  %v2275_v63 = vadd.f32 %v2245_v57, %v6733_v43 }
 0x5de   : > { %v2260_v33 = vadd.f32 %v5757_v53, %v5067_v61  ;;  %v2254_v41 = vpop.f32.mrb[53].mxu1  ;;  %v2292_v28 = vsel %vm643_vm1, %v2276_v23, 0.0 }
 0x5df   : > { %v2255_v26 = vadd.f32 %v5067_v61, %v2254_v41  ;;  %2293 = vadd.xlane.f32.xlu1 %v2292_v28  ;;  %v2289_v32 = vsel %vm643_vm1, %v2275_v63, 0.0 }
 0x5e0   : > { %2290 = vadd.xlane.f32.xlu0 %v2289_v32  ;;  %v2278_v7 = vadd.f32 %v2260_v33, %v6744_v48 }
 0x5e1   : > { %v5760_v35 = vpop.f32.mrb[54].mxu1  ;;  %v2277_v47 = vadd.f32 %v2255_v26, %v6749_v51  ;;  %v2412_v51 = vld [vmem:[%s8199_s6] sm:$0xff] }
 0x5e2   : > { %v2270_v6 = vadd.f32 %v5760_v35, %v5067_v61  ;;  %v2264_v52 = vpop.f32.mrb[55].mxu1  ;;  %v2298_v39 = vsel %vm643_vm1, %v2278_v7, 0.0  ;;  %v6160_v0 = vpack.c.bf16 %v2413_v34, %v2412_v51  ;;  %v2559_v35 = vld [vmem:[%s8200_s7 + $0x8] sm:$0xff] }
 0x5e3   : > { %v2265_v2 = vadd.f32 %v5067_v61, %v2264_v52  ;;  %2299 = vadd.xlane.f32.xlu1 %v2298_v39  ;;  %v2295_v43 = vsel %vm643_vm1, %v2277_v47, 0.0  ;;  %v2561_v52 = vld [vmem:[%s8200_s7 + $0x18] sm:$0xff] }
 0x5e4   : > { %2296 = vadd.xlane.f32.xlu0 %v2295_v43  ;;  %v2280_v16 = vadd.f32 %v2270_v6, %v6760_v56  ;;  %v2414_v56 = vld [vmem:[%s8199_s6 + $0x10] sm:$0xff]  ;;  %6161 = vmatprep.subr.bf16.mxu0 %v6160_v0  ;;  %v2563_v43 = vld [vmem:[%s8200_s7 + $0x28] sm:$0xff] }
 0x5e5   : > { %v2279_v62 = vadd.f32 %v2265_v2, %v6765_v59  ;;  %v2415_v59 = vld [vmem:[%s8199_s6 + $0x18] sm:$0xff]  ;;  %6163 = vmatpush3.bf16.msra.mxu0 %v6160_v0  ;;  %v2562_v2 = vld [vmem:[%s8200_s7 + $0x20] sm:$0xff] }
 0x5e6   : > { %v2304_v8 = vsel %vm643_vm1, %v2280_v16, 0.0  ;;  %v6164_v22 = vpack.c.bf16 %v2415_v59, %v2414_v56 }
 0x5e7   : > { %2305 = vadd.xlane.f32.xlu1 %v2304_v8  ;;  %v2301_v48 = vsel %vm643_vm1, %v2279_v62, 0.0 }
 0x5e8   : > { %2302 = vadd.xlane.f32.xlu0 %v2301_v48  ;;  %6165 = vmatprep.subr.bf16.mxu0 %v6164_v22 }
 0x5e9   : > { %6167 = vmatpush3.bf16.msra.mxu0 %v6164_v22 }
 0x668   : > { %v2288_v49 = vpop.xlane.xlu1 %2287 }
 0x669   : > { %v2309_v24 = vmul.f32 0.03125, %v2288_v49  ;;  %v2285_v14 = vpop.xlane.xlu0 %2284 }
 0x66a   : > { %v2308_v29 = vmul.f32 0.03125, %v2285_v14 }
 0x66b   : > { %v7402_v37 = vsub.f32 %v2274_v46, %v2309_v24 }
 0x66c   : > { %v7404_v45 = vsub.f32 %v2273_v58, %v2308_v29  ;;  %v2294_v20 = vpop.xlane.xlu1 %2293 }
 0x66d   : > { %v2311_v40 = vmul.f32 0.03125, %v2294_v20  ;;  %v2291_v17 = vpop.xlane.xlu0 %2290  ;;  %v2325_v13 = vmul.f32 %v7402_v37, %v7402_v37 }
 0x66e   : > { %v2310_v3 = vmul.f32 0.03125, %v2291_v17  ;;  %v2324_v44 = vmul.f32 %v7404_v45, %v7404_v45 }
 0x66f   : > { %v7410_v36 = vsub.f32 %v2276_v23, %v2311_v40  ;;  %v2335_v50 = vsel %vm643_vm1, %v2325_v13, 0.0 }
 0x670   : > { %v7413_v1 = vsub.f32 %v2275_v63, %v2310_v3  ;;  %v2300_v42 = vpop.xlane.xlu1 %2299  ;;  %2336 = vadd.xlane.f32.xlu1 %v2335_v50  ;;  %v2332_v54 = vsel %vm643_vm1, %v2324_v44, 0.0 }
 0x671   : > { %v2313_v55 = vmul.f32 0.03125, %v2300_v42  ;;  %v2297_v30 = vpop.xlane.xlu0 %2296  ;;  %2333 = vadd.xlane.f32.xlu0 %v2332_v54  ;;  %v2327_v61 = vmul.f32 %v7410_v36, %v7410_v36 }
 0x672   : > { %v2312_v25 = vmul.f32 0.03125, %v2297_v30  ;;  %v2326_v12 = vmul.f32 %v7413_v1, %v7413_v1  ;;  %v5076_v30 = vld [vmem:[%s8198_s5 + $0x5] ss:$0 sm:$0xff] }
 0x673   : > { %v7420_v21 = vsub.f32 %v2278_v7, %v2313_v55  ;;  %v2341_v60 = vsel %vm643_vm1, %v2327_v61, 0.0  ;;  %v2558_v7 = vld [vmem:[%s8200_s7] sm:$0xff] }
 0x674   : > { %v7423_v46 = vsub.f32 %v2277_v47, %v2312_v25  ;;  %2342 = vadd.xlane.f32.xlu1 %v2341_v60  ;;  %v2306_v9 = vpop.xlane.xlu1 %2305  ;;  %v2338_v58 = vsel %vm643_vm1, %v2326_v12, 0.0  ;;  %v2560_v47 = vld [vmem:[%s8200_s7 + $0x10] sm:$0xff]  ;;  %v6168_v6 = vpack.c.bf16 %v2559_v35, %v2558_v7 }
 0x675   : > { %v2315_v18 = vmul.f32 0.03125, %v2306_v9  ;;  %2339 = vadd.xlane.f32.xlu0 %v2338_v58  ;;  %v2303_v15 = vpop.xlane.xlu0 %2302  ;;  %v2329_v31 = vmul.f32 %v7420_v21, %v7420_v21  ;;  %v6172_v39 = vpack.c.bf16 %v2561_v52, %v2560_v47  ;;  %v5077_v58 = vld [vmem:[%s8198_s5 + $0x6] ss:$0 sm:$0xff] }
 0x676   : > { %v2314_v57 = vmul.f32 0.03125, %v2303_v15  ;;  %v2328_v10 = vmul.f32 %v7423_v46, %v7423_v46  ;;  %6169 = vmatprep.subr.bf16.mxu1 %v6168_v6 }
 0x677   : > { %v7430_v23 = vsub.f32 %v2280_v16, %v2315_v18  ;;  %v2347_v53 = vsel %vm643_vm1, %v2329_v31, 0.0  ;;  %6171 = vmatpush3.bf16.msra.mxu1 %v6168_v6  ;;  %v6176_v16 = vpack.c.bf16 %v2563_v43, %v2562_v2 }
 0x678   : > { %v7433_v63 = vsub.f32 %v2279_v62, %v2314_v57  ;;  %2348 = vadd.xlane.f32.xlu1 %v2347_v53  ;;  %v2344_v33 = vsel %vm643_vm1, %v2328_v10, 0.0  ;;  %6173 = vmatprep.subr.bf16.mxu1 %v6172_v39 }
 0x679   : > { %2345 = vadd.xlane.f32.xlu0 %v2344_v33  ;;  %v2331_v41 = vmul.f32 %v7430_v23, %v7430_v23 }
 0x67a   : > { %v2330_v28 = vmul.f32 %v7433_v63, %v7433_v63 }
 0x67b   : > { %v2353_v26 = vsel %vm643_vm1, %v2331_v41, 0.0  ;;  %6175 = vmatpush3.bf16.msra.mxu1 %v6172_v39 }
 0x67c   : > { %2354 = vadd.xlane.f32.xlu1 %v2353_v26  ;;  %v2350_v32 = vsel %vm643_vm1, %v2330_v28, 0.0  ;;  %6177 = vmatprep.subr.bf16.mxu1 %v6176_v16 }
 0x67d   : > { %2351 = vadd.xlane.f32.xlu0 %v2350_v32 }
 0x67f   : > { %6179 = vmatpush3.bf16.msra.mxu1 %v6176_v16 }
 0x6fd   : > { %v2337_v62 = vpop.xlane.xlu1 %2336 }
 0x6fe   : > { %v2357_v8 = vmul.f32 0.03125, %v2337_v62  ;;  %v2334_v48 = vpop.xlane.xlu0 %2333 }
 0x6ff   : > { %v2356_v51 = vmul.f32 0.03125, %v2334_v48 }
 0x700   : > { %v2365_v34 = vadd.f32 1e-05, %v2357_v8 }
 0x701   : > { %v2364_v56 = vadd.f32 1e-05, %v2356_v51  ;;  %v2343_v0 = vpop.xlane.xlu1 %2342  ;;  %v6574_v51 = vmov 0.0|0.0  }
 0x702   : > { %6481 = vrsqrt.f32 %v2365_v34  ;;  %v2359_v59 = vmul.f32 0.03125, %v2343_v0  ;;  %v2340_v22 = vpop.xlane.xlu0 %2339  ;;  %6184 = vmatprep.subr.bf16.mxu0 %v6574_v51  ;;  %v5098_v34 = vld [vmem:[%s8197_s4 + $0x80] sm:$0xff] }
 0x703   : > { %6483 = vrsqrt.f32 %v2364_v56  ;;  %v2358_v49 = vmul.f32 0.03125, %v2340_v22  ;;  %v5099_v56 = vld [vmem:[%s8197_s4 + $0x88] sm:$0xff]  ;;  %v5101_v22 = vld [vmem:[%s8197_s4 + $0x98] sm:$0xff] }
 0x704   : > { %v2367_v24 = vadd.f32 1e-05, %v2359_v59  ;;  %v6185_v0 = vpack.c.bf16 %v5099_v56, %v5098_v34  ;;  %v5100_v59 = vld [vmem:[%s8197_s4 + $0x90] sm:$0xff] }
 0x705   : > { %v2366_v14 = vadd.f32 1e-05, %v2358_v49  ;;  %v2349_v29 = vpop.xlane.xlu1 %2348  ;;  %v6188_v49 = vpack.c.bf16 %v5101_v22, %v5100_v59 }
 0x706   : > { %6485 = vrsqrt.f32 %v2367_v24  ;;  %v2361_v20 = vmul.f32 0.03125, %v2349_v29  ;;  %v2346_v40 = vpop.xlane.xlu0 %2345  ;;  %v7532_v24 = vld [vmem:[%s8195_s2] sm:$0xff] }
 0x707   : > { %6487 = vrsqrt.f32 %v2366_v14  ;;  %v2360_v17 = vmul.f32 0.03125, %v2346_v40  ;;  %v5078_v14 = vld [vmem:[%s8201_s8] ss:$0 sm:$0xff] }
 0x708   : > { %v2369_v13 = vadd.f32 1e-05, %v2361_v20 }
 0x709   : > { %v2368_v3 = vadd.f32 1e-05, %v2360_v17  ;;  %v2355_v44 = vpop.xlane.xlu1 %2354  ;;  %v5104_v17 = vld [vmem:[%s8197_s4 + $0xa0] sm:$0xff] }
 0x70a   : > { %6489 = vrsqrt.f32 %v2369_v13  ;;  %v2363_v50 = vmul.f32 0.03125, %v2355_v44  ;;  %v2352_v42 = vpop.xlane.xlu0 %2351  ;;  %v5105_v13 = vld [vmem:[%s8197_s4 + $0xa8] sm:$0xff] }
 0x70b   : > { %6491 = vrsqrt.f32 %v2368_v3  ;;  %v2362_v54 = vmul.f32 0.03125, %v2352_v42  ;;  %v6191_v42 = vpack.c.bf16 %v5105_v13, %v5104_v17  ;;  %v5111_v17 = vld [vmem:[%s8197_s4 + $0xc8] sm:$0xff]  ;;  %v5112_v13 = vld [vmem:[%s8197_s4 + $0xd0] sm:$0xff] }
 0x70c   : > { %v6482_v55 = vpop.eup %6481  ;;  %v2371_v61 = vadd.f32 1e-05, %v2363_v50 }
 0x70d   : > { %v6484_v25 = vpop.eup %6483  ;;  %v2381_v12 = vmul.f32 %v6482_v55, %v7402_v37  ;;  %v2370_v60 = vadd.f32 1e-05, %v2362_v54 }
 0x70e   : > { %6493 = vrsqrt.f32 %v2371_v61  ;;  %v2380_v9 = vmul.f32 %v6484_v25, %v7404_v45  ;;  %v5106_v61 = vld [vmem:[%s8197_s4 + $0xb0] sm:$0xff]  ;;  %v5107_v25 = vld [vmem:[%s8197_s4 + $0xb8] sm:$0xff] }
 0x70f   : > { %v2393_v18 = vmul.f32 %v5076_v30, %v2381_v12  ;;  %6495 = vrsqrt.f32 %v2370_v60 }
 0x710   : > { %v6486_v15 = vpop.eup %6485  ;;  %v2392_v31 = vmul.f32 %v5076_v30, %v2380_v9 }
 0x711   : > { %v6488_v57 = vpop.eup %6487  ;;  %v2383_v10 = vmul.f32 %v6486_v15, %v7410_v36  ;;  %v7472_v37 = vadd.f32 %v5077_v58, %v2393_v18 }
 0x712   : > { %v7469_v53 = vadd.f32 %v5077_v58, %v2392_v31  ;;  %v2382_v33 = vmul.f32 %v6488_v57, %v7413_v1 }
 0x713   : > { %v2395_v41 = vmul.f32 %v5076_v30, %v2383_v10 }
 0x714   : > { %v6490_v28 = vpop.eup %6489  ;;  %5769 = vmatprep.mubr.msk.f32.mxu0 %vm643_vm1, %v7469_v53  ;;  %v2394_v45 = vmul.f32 %v5076_v30, %v2382_v33 }
 0x715   : > { %v6492_v26 = vpop.eup %6491  ;;  %5770 = vmatmul.mubr.msk.f32.vlgmr.msra.gmra.mrb[48].mxu0 %vm643_vm1, %v7472_v37  ;;  %v2385_v32 = vmul.f32 %v6490_v28, %v7420_v21  ;;  %v7482_v35 = vadd.f32 %v5077_v58, %v2395_v41 }
 0x716   : > { %v7479_v7 = vadd.f32 %v5077_v58, %v2394_v45  ;;  %v2384_v36 = vmul.f32 %v6492_v26, %v7423_v46  ;;  %6186 = vmatpush3.bf16.msra.mxu0 %v6185_v0  ;;  %v5108_v0 = vld [vmem:[%s8198_s5 + $0xb] ss:$0 sm:$0xff] }
 0x717   : > { %v2397_v1 = vmul.f32 %v5076_v30, %v2385_v32  ;;  %6187 = vmatprep.subr.bf16.mxu0 %v6574_v51 }
 0x718   : > { %v6494_v47 = vpop.eup %6493  ;;  %5772 = vmatprep.mubr.msk.f32.mxu0 %vm643_vm1, %v7479_v7  ;;  %v2396_v6 = vmul.f32 %v5076_v30, %v2384_v36 }
 0x719   : > { %v6496_v52 = vpop.eup %6495  ;;  %5773 = vmatmul.mubr.msk.f32.gmra.mrb[50].mxu0 %vm643_vm1, %v7482_v35  ;;  %v2387_v39 = vmul.f32 %v6494_v47, %v7430_v23  ;;  %v7492_v43 = vadd.f32 %v5077_v58, %v2397_v1  ;;  %v2564_v23 = vld [vmem:[%s8200_s7 + $0x30] sm:$0xff]  ;;  %v5102_v1 = vld [vmem:[%s8198_s5 + $0xa] ss:$0 sm:$0xff] }
 0x71a   : > { %v7489_v2 = vadd.f32 %v5077_v58, %v2396_v6  ;;  %v2386_v21 = vmul.f32 %v6496_v52, %v7433_v63  ;;  %v2565_v63 = vld [vmem:[%s8200_s7 + $0x38] sm:$0xff]  ;;  %6189 = vmatpush3.bf16.msra.mxu0 %v6188_v49 }
 0x71b   : > { %v2399_v46 = vmul.f32 %v5076_v30, %v2387_v39  ;;  %v6180_v48 = vpack.c.bf16 %v2565_v63, %v2564_v23  ;;  %6196 = vmatprep.subr.bf16.mxu0 %v6574_v51 }
 0x71c   : > { %5775 = vmatprep.mubr.msk.f32.mxu0 %vm643_vm1, %v7489_v2  ;;  %v2398_v16 = vmul.f32 %v5076_v30, %v2386_v21 }
 0x71d   : > { %5776 = vmatmul.mubr.msk.f32.gmra.mrb[52].mxu0 %vm643_vm1, %v7492_v43  ;;  %v7500_v8 = vadd.f32 %v5077_v58, %v2399_v46  ;;  %6181 = vmatprep.subr.bf16.mxu1 %v6180_v48 }
 0x71e   : > { %v7498_v62 = vadd.f32 %v5077_v58, %v2398_v16  ;;  %6183 = vmatpush3.bf16.msra.mxu1 %v6180_v48  ;;  %v6194_v58 = vpack.c.bf16 %v5107_v25, %v5106_v61 }
 0x71f   : > { %6190 = vmatprep.subr.bf16.mxu1 %v6574_v51 }
 0x720   : > { %5778 = vmatprep.mubr.msk.f32.mxu0 %vm643_vm1, %v7498_v62 }
 0x721   : > { %5779 = vmatmul.mubr.msk.f32.gmra.mrb[54].mxu0 %vm643_vm1, %v7500_v8 }
 0x722   : > { %5817 = vmatprep.mubr.msk.f32.mxu0 %vm6575_vm14, %v6573_v4 }
 0x725   : > { %5818 = vmatmul.mubr.msk.f32.vlgmr.msra.gmra.mrb[56].mxu0 %vm643_vm1, %v7532_v24 }
 0x726   : > { %5839 = vmatprep.mubr.msk.f32.mxu0 %vm6575_vm14, %v6573_v4 }
 0x7e8   : > { %v5771_v29 = vpop.f32.mrb[48].mxu0 }
 0x7e9   : > { %v2517_v20 = vadd.f32 %v5771_v29, %v5078_v14  ;;  %v2511_v40 = vpop.f32.mrb[49].mxu0 }
 0x7ea   : > { %v2512_v3 = vadd.f32 %v5078_v14, %v2511_v40  ;;  %v5110_v40 = vld [vmem:[%s8197_s4 + $0xc0] sm:$0xff] }
 0x7eb   : > { %v2551_v54 = vmax.f32 %v2517_v20, 0.0 }
 0x7ec   : > { %v2550_v44 = vmax.f32 %v2512_v3, 0.0  ;;  %v5774_v50 = vpop.f32.mrb[50].mxu0  ;;  %v6197_v3 = vpack.c.bf16 %v5111_v17, %v5110_v40 }
 0x7ed   : > { %v2527_v55 = vadd.f32 %v5774_v50, %v5078_v14  ;;  %v2521_v30 = vpop.f32.mrb[51].mxu0 }
 0x7ee   : > { %v2522_v12 = vadd.f32 %v5078_v14, %v2521_v30  ;;  %5797 = vmatprep.mubr.msk.f32.mxu1 %vm1404_vm13, %v2550_v44  ;;  %v5113_v44 = vld [vmem:[%s8197_s4 + $0xd8] sm:$0xff]  ;;  %6198 = vmatpush3.bf16.msra.mxu0 %v6197_v3 }
 0x7ef   : > { %5798 = vmatmul.mubr.msk.f32.vlgmr.msra.gmra.mrb[56].mxu1 %vm1404_vm13, %v2551_v54  ;;  %v2553_v18 = vmax.f32 %v2527_v55, 0.0  ;;  %v6200_v50 = vpack.c.bf16 %v5113_v44, %v5112_v13  ;;  %6199 = vmatprep.subr.bf16.mxu0 %v6574_v51 }
 0x7f0   : > { %v2552_v60 = vmax.f32 %v2522_v12, 0.0  ;;  %v5777_v9 = vpop.f32.mrb[52].mxu0  ;;  %6192 = vmatpush3.bf16.msra.mxu1 %v6191_v42 }
 0x7f1   : > { %v2537_v15 = vadd.f32 %v5777_v9, %v5078_v14  ;;  %v2531_v31 = vpop.f32.mrb[53].mxu0  ;;  %6193 = vmatprep.subr.bf16.mxu1 %v6574_v51 }
 0x7f2   : > { %v2532_v57 = vadd.f32 %v5078_v14, %v2531_v31  ;;  %5800 = vmatprep.mubr.msk.f32.mxu1 %vm1404_vm13, %v2552_v60  ;;  %6201 = vmatpush3.bf16.msra.mxu0 %v6200_v50 }
 0x7f3   : > { %5801 = vmatmul.mubr.msk.f32.gmra.mrb[58].mxu1 %vm1404_vm13, %v2553_v18  ;;  %v2555_v41 = vmax.f32 %v2537_v15, 0.0 }
 0x7f4   : > { %v2554_v10 = vmax.f32 %v2532_v57, 0.0  ;;  %v5780_v33 = vpop.f32.mrb[54].mxu0  ;;  %6195 = vmatpush3.bf16.msra.mxu1 %v6194_v58 }
 0x7f5   : > { %v2547_v28 = vadd.f32 %v5780_v33, %v5078_v14  ;;  %v2541_v45 = vpop.f32.mrb[55].mxu0  ;;  %5840 = vmatmul.mubr.f32.vlgmr.msra.gmra.mrb[58].mxu0 %v6573_v4 }
 0x7f6   : > { %v2542_v26 = vadd.f32 %v5078_v14, %v2541_v45  ;;  %5803 = vmatprep.mubr.msk.f32.mxu1 %vm1404_vm13, %v2554_v10 }
 0x7f7   : > { %5804 = vmatmul.mubr.msk.f32.gmra.mrb[60].mxu1 %vm1404_vm13, %v2555_v41  ;;  %v2557_v36 = vmax.f32 %v2547_v28, 0.0 }
 0x7f8   : > { %v2556_v32 = vmax.f32 %v2542_v26, 0.0  ;;  %v2918_v47 = vpop.f32.mrb[56].mxu0 }
 0x7f9   : > { %v2919_v6 = vadd.f32 %v5102_v1, %v2918_v47  ;;  %v5819_v52 = vpop.f32.mrb[57].mxu0 }
 0x7fa   : > { %5806 = vmatprep.mubr.msk.f32.mxu1 %vm1404_vm13, %v2556_v32  ;;  %v5087_v32 = vld [vmem:[%s8198_s5 + $0x7] ss:$0 sm:$0xff] }
 0x7fb   : > { %5807 = vmatmul.mubr.msk.f32.gmra.mrb[62].mxu1 %vm1404_vm13, %v2557_v36  ;;  %v3085_v39 = vmul.f32 %v6807_v5, %v2919_v6  ;;  %v3086_v14 = vmul.f32 %v6883_v19, %v2919_v6  ;;  %v3087_v29 = vmul.f32 %v6911_v27, %v2919_v6  ;;  %v3088_v20 = vmul.f32 %v6939_v38, %v2919_v6 }
 0x7fc   : > { %5828 = vmatprep.mubr.msk.f32.mxu1 %vm6575_vm14, %v6573_v4 }
 0x7ff   : > { %5829 = vmatmul.mubr.msk.f32.vlgmr.msra.gmra.mrb[64].mxu1 %vm643_vm1, %v7532_v24 }
 0x800   : > { %5844 = vmatprep.mubr.msk.f32.mxu1 %vm643_vm1, %v3085_v39 }
 0x8c2   : > { %v7572_v21 = vpop.f32.mrb[56].mxu1 }
 0x8c3   : > { %v7574_v46 = vpop.f32.mrb[57].mxu1  ;;  %v2667_v47 = vadd.f32 %v7572_v21, %v5087_v32 }
 0x8c4   : > { %v2662_v52 = vadd.f32 %v5087_v32, %v7574_v46 }
 0x8c5   : > { %v7641_v21 = vadd.f32 %v2667_v47, %v7472_v37 }
 0x8c6   : > { %v7576_v16 = vpop.f32.mrb[58].mxu1 }
 0x8c7   : > { %v7578_v23 = vpop.f32.mrb[59].mxu1 }
 0x8ca   : > { %v7580_v63 = vpop.f32.mrb[60].mxu1 }
 0x8cb   : > { %v7582_v48 = vpop.f32.mrb[61].mxu1 }
 0x8cc   : > { %v2682_v37 = vadd.f32 %v5087_v32, %v7582_v48 }
 0x8ce   : > { %v7584_v34 = vpop.f32.mrb[62].mxu1  ;;  %v2704_v48 = vadd.f32 %v2682_v37, %v7489_v2  ;;  %v5114_v2 = vld [vmem:[%s8198_s5 + $0xc] ss:$0 sm:$0xff]  ;;  %v5126_v37 = vld [vmem:[%s8197_s4 + $0xf0] sm:$0xff] }
 0x8cf   : > { %v7586_v56 = vpop.f32.mrb[63].mxu1  ;;  %v2697_v13 = vadd.f32 %v7584_v34, %v5087_v32 }
 0x8d0   : > { %v2692_v3 = vadd.f32 %v5087_v32, %v7586_v56  ;;  %v2722_v34 = vsel %vm643_vm1, %v2704_v48, 0.0 }
 0x8d1   : > { %v7668_v44 = vadd.f32 %v2697_v13, %v7500_v8 }
 0x8d2   : > { %v2998_v59 = vpop.f32.mrb[64].mxu1 }
 0x8d3   : > { %v2999_v22 = vadd.f32 %v5108_v0, %v2998_v59  ;;  %v5830_v49 = vpop.f32.mrb[65].mxu1  ;;  %v2731_v56 = vsel %vm643_vm1, %v7668_v44, 0.0 }
 0x8d5   : > { %5842 = vmatprep.subr.msk.mxu1 %vm643_vm1, %v2999_v22 }
 0x8d6   : > { %5843 = vmatpush3.xpose.msk.msra.mxu1 %vm643_vm1, %v2999_v22  ;;  %v2677_v22 = vadd.f32 %v7576_v16, %v5087_v32  ;;  %v2713_v16 = vsel %vm643_vm1, %v7641_v21, 0.0 }
 0x8d7   : > { %6202 = vmatprep.subr.bf16.mxu1 %v6574_v51 }
 0x8d8   : > { %v7651_v40 = vadd.f32 %v2677_v22, %v7482_v35 }
 0x8d9   : > { %5845 = vmatmul.mubr.msk.f32.vlgmr.msra.gmra.mrb[66].mxu1 %vm643_vm1, %v3086_v14  ;;  %v2672_v14 = vadd.f32 %v5087_v32, %v7578_v23 }
 0x8da   : > { %5847 = vmatprep.mubr.msk.f32.mxu1 %vm643_vm1, %v3087_v29  ;;  %v2700_v29 = vadd.f32 %v2662_v52, %v7469_v53  ;;  %v2719_v53 = vsel %vm643_vm1, %v7651_v40, 0.0 }
 0x8db   : > { %v2702_v17 = vadd.f32 %v2672_v14, %v7479_v7 }
 0x8dc   : > { %v2710_v23 = vsel %vm643_vm1, %v2700_v29, 0.0 }
 0x8dd   : > { %5848 = vmatmul.mubr.msk.f32.gmra.mrb[68].mxu1 %vm643_vm1, %v3088_v20  ;;  %v2687_v20 = vadd.f32 %v7580_v63, %v5087_v32  ;;  %v2716_v35 = vsel %vm643_vm1, %v2702_v17, 0.0 }
 0x8de   : > { %5866 = vmatprep.mubr.msk.f32.mxu1 %vm6575_vm14, %v6573_v4 }
 0x8df   : > { %v7660_v63 = vadd.f32 %v2687_v20, %v7492_v43  ;;  %v2706_v43 = vadd.f32 %v2692_v3, %v7498_v62  ;;  %v5125_v20 = vld [vmem:[%s8197_s4 + $0xe8] sm:$0xff] }
 0x8e1   : > { %v2725_v7 = vsel %vm643_vm1, %v7660_v63, 0.0  ;;  %v2728_v50 = vsel %vm643_vm1, %v2706_v43, 0.0 }
 0x9ac   : > { %v5846_v42 = vpop.f32.mrb[66].mxu1 }
 0x9ad   : > { %v3170_v54 = vpop.f32.mrb[67].mxu1  ;;  %v3193_v55 = vsel %vm3189_vm15, %v5846_v42, -inf }
 0x9ae   : > { %3194 = vmax.xlane.f32.xlu1 %v3193_v55  ;;  %v3190_v30 = vsel %vm3189_vm15, %v3170_v54, -inf }
 0x9af   : > { %3191 = vmax.xlane.f32.xlu0 %v3190_v30 }
 0x9b0   : > { %v5849_v61 = vpop.f32.mrb[68].mxu1 }
 0x9b1   : > { %v3180_v25 = vpop.f32.mrb[69].mxu1  ;;  %v3199_v12 = vsel %vm3189_vm15, %v5849_v61, -inf }
 0x9b2   : > { %3200 = vmax.xlane.f32.xlu1 %v3199_v12  ;;  %v3196_v60 = vsel %vm3189_vm15, %v3180_v25, -inf }
 0x9b3   : > { %3197 = vmax.xlane.f32.xlu0 %v3196_v60 }
 0xa3b   : > { %v3195_v9 = vpop.xlane.xlu1 %3194 }
 0xa3c   : > { %v3203_v58 = vsub.f32 %v5846_v42, %v3195_v9  ;;  %v3192_v18 = vpop.xlane.xlu0 %3191  ;;  %v3081_v42 = vpop.f32.mrb[58].mxu0 }
 0xa3d   : > { %v3202_v15 = vsub.f32 %v3170_v54, %v3192_v18  ;;  %v3082_v8 = vadd.f32 %v5114_v2, %v3081_v42  ;;  %v5841_v54 = vpop.f32.mrb[59].mxu0  ;;  %v7721_v2 = vld [vmem:[%s8198_s5 + $0x8] ss:$0 sm:$0xff] }
 0xa3e   : > { %v3208_v31 = vmul.f32 1.442695, %v3203_v58 }
 0xa3f   : > { %v3206_v57 = vmul.f32 1.442695, %v3202_v15  ;;  %v3201_v10 = vpop.xlane.xlu1 %3200  ;;  %5850 = vmatprep.subr.mxu0 %v3082_v8 }
 0xa40   : > { %6497 = vpow2.f32 %v3208_v31  ;;  %v3205_v33 = vsub.f32 %v5849_v61, %v3201_v10  ;;  %v3198_v41 = vpop.xlane.xlu0 %3197  ;;  %5851 = vmatpush3.msra.mxu0 %v3082_v8 }
 0xa41   : > { %6499 = vpow2.f32 %v3206_v57  ;;  %v3204_v28 = vsub.f32 %v3180_v25, %v3198_v41  ;;  %6208 = vmatprep.subr.bf16.mxu0 %v6574_v51 }
 0xa42   : > { %v3212_v45 = vmul.f32 1.442695, %v3205_v33 }
 0xa43   : > { %v3210_v26 = vmul.f32 1.442695, %v3204_v28 }
 0xa44   : > { %6501 = vpow2.f32 %v3212_v45 }
 0xa45   : > { %6503 = vpow2.f32 %v3210_v26 }
 0xa4a   : > { %v7623_v36 = vpop.eup %6497 }
 0xa4b   : > { %v7625_v1 = vpop.eup %6499  ;;  %v3217_v6 = vsel %vm3189_vm15, %v7623_v36, 0.0 }
 0xa4c   : > { %3218 = vadd.xlane.f32.xlu1 %v3217_v6  ;;  %v3214_v39 = vsel %vm3189_vm15, %v7625_v1, 0.0 }
 0xa4d   : > { %3215 = vadd.xlane.f32.xlu0 %v3214_v39 }
 0xa4e   : > { %v7633_v0 = vpop.eup %6501 }
 0xa4f   : > { %v7635_v59 = vpop.eup %6503  ;;  %v3223_v49 = vsel %vm3189_vm15, %v7633_v0, 0.0 }
 0xa50   : > { %3224 = vadd.xlane.f32.xlu1 %v3223_v49  ;;  %v3220_v46 = vsel %vm3189_vm15, %v7635_v59, 0.0 }
 0xa51   : > { %3221 = vadd.xlane.f32.xlu0 %v3220_v46 }
 0xa54   : > { %2714 = vadd.xlane.f32.xlu1 %v2713_v16 }
 0xa55   : > { %2711 = vadd.xlane.f32.xlu0 %v2710_v23  ;;  %v5127_v23 = vld [vmem:[%s8197_s4 + $0xf8] sm:$0xff] }
 0xa58   : > { %2720 = vadd.xlane.f32.xlu1 %v2719_v53 }
 0xa59   : > { %2717 = vadd.xlane.f32.xlu0 %v2716_v35 }
 0xa5c   : > { %2726 = vadd.xlane.f32.xlu1 %v2725_v7 }
 0xa5d   : > { %2723 = vadd.xlane.f32.xlu0 %v2722_v34 }
 0xa60   : > { %2732 = vadd.xlane.f32.xlu1 %v2731_v56 }
 0xa61   : > { %2729 = vadd.xlane.f32.xlu0 %v2728_v50 }
 0xad9   : > { %v3219_v62 = vpop.xlane.xlu1 %3218 }
 0xada   : > { %6505 = vrcp.f32 %v3219_v62  ;;  %v3216_v55 = vpop.xlane.xlu0 %3215 }
 0xadb   : > { %6507 = vrcp.f32 %v3216_v55 }
 0xadd   : > { %v3225_v30 = vpop.xlane.xlu1 %3224 }
 0xade   : > { %6509 = vrcp.f32 %v3225_v30  ;;  %v3222_v61 = vpop.xlane.xlu0 %3221 }
 0xadf   : > { %6511 = vrcp.f32 %v3222_v61  ;;  %v7729_v61 = vld [vmem:[%s8198_s5 + $0x9] ss:$0 sm:$0xff] }
 0xae1   : > { %v2715_v13 = vpop.xlane.xlu1 %2714 }
 0xae2   : > { %v2712_v25 = vpop.xlane.xlu0 %2711 }
 0xae3   : > { %v2734_v12 = vmul.f32 0.03125, %v2712_v25 }
 0xae4   : > { %v6506_v60 = vpop.eup %6505 }
 0xae5   : > { %v6508_v9 = vpop.eup %6507  ;;  %v2742_v58 = vsub.f32 %v2700_v29, %v2734_v12  ;;  %v3231_v31 = vmul.f32 %v6506_v60, %v7623_v36  ;;  %v5124_v29 = vld [vmem:[%s8197_s4 + $0xe0] sm:$0xff]  ;;  %v2721_v53 = vpop.xlane.xlu1 %2720 }
 0xae6   : > { %v2718_v18 = vpop.xlane.xlu0 %2717  ;;  %v3230_v15 = vmul.f32 %v6508_v9, %v7625_v1  ;;  %v6203_v16 = vpack.c.bf16 %v5125_v20, %v5124_v29  ;;  %v5139_v20 = vld [vmem:[%s8197_s4 + $0x128] sm:$0xff] }
 0xae7   : > { %v2736_v57 = vmul.f32 0.03125, %v2718_v18  ;;  %v2750_v10 = vmul.f32 %v2742_v58, %v2742_v58 }
 0xae8   : > { %v6510_v33 = vpop.eup %6509  ;;  %5852 = vmatprep.mubr.msk.f32.mxu0 %vm3189_vm15, %v3230_v15  ;;  %6204 = vmatpush3.bf16.msra.mxu1 %v6203_v16  ;;  %v6557_v15 = vld [vmem:[%s8194_s1] sm:$0xff] }
 0xae9   : > { %v6512_v41 = vpop.eup %6511  ;;  %v7682_v28 = vsub.f32 %v2702_v17, %v2736_v57  ;;  %5853 = vmatmul.mubr.msk.f32.vlgmr.msra.gmra.mrb[60].mxu0 %vm3189_vm15, %v3231_v31  ;;  %v2758_v45 = vsel %vm643_vm1, %v2750_v10, 0.0  ;;  %v3233_v1 = vmul.f32 %v6510_v33, %v7633_v0  ;;  %6205 = vmatprep.subr.bf16.mxu1 %v6574_v51  ;;  %v6206_v17 = vpack.c.bf16 %v5127_v23, %v5126_v37  ;;  %v2727_v3 = vpop.xlane.xlu1 %2726  ;;  %v5128_v10 = vld [vmem:[%s8198_s5 + $0xd] ss:$0 sm:$0xff]  ;;  %v5140_v37 = vld [vmem:[%s8197_s4 + $0x130] sm:$0xff]  ;;  %v5141_v23 = vld [vmem:[%s8197_s4 + $0x138] sm:$0xff] }
 0xaea   : > { %2759 = vadd.xlane.f32.xlu1 %v2758_v45  ;;  %v2724_v26 = vpop.xlane.xlu0 %2723  ;;  %v3232_v32 = vmul.f32 %v6512_v41, %v7635_v59  ;;  %v2735_v57 = vmul.f32 0.03125, %v2715_v13  ;;  %v2737_v41 = vmul.f32 0.03125, %v2721_v53 }
 0xaeb   : > { %v2738_v47 = vmul.f32 0.03125, %v2724_v26  ;;  %v2752_v36 = vmul.f32 %v7682_v28, %v7682_v28 }
 0xaec   : > { %5855 = vmatprep.mubr.msk.f32.mxu0 %vm3189_vm15, %v3232_v32  ;;  %6207 = vmatpush3.bf16.msra.mxu1 %v6206_v17  ;;  %v7746_v33 = vsub.f32 %v7641_v21, %v2735_v57  ;;  %v6218_v17 = vpack.c.bf16 %v5141_v23, %v5140_v37 }
 0xaed   : > { %v7691_v6 = vsub.f32 %v2704_v48, %v2738_v47  ;;  %5856 = vmatmul.mubr.msk.f32.gmra.mrb[62].mxu0 %vm3189_vm15, %v3233_v1  ;;  %v2764_v52 = vsel %vm643_vm1, %v2752_v36, 0.0  ;;  %v2733_v35 = vpop.xlane.xlu1 %2732  ;;  %v7749_v47 = vsub.f32 %v7651_v40, %v2737_v41  ;;  %v2739_v1 = vmul.f32 0.03125, %v2727_v3 }
 0xaee   : > { %2765 = vadd.xlane.f32.xlu1 %v2764_v52  ;;  %v2730_v39 = vpop.xlane.xlu0 %2729  ;;  %5877 = vmatprep.mubr.msk.f32.mxu0 %vm6575_vm14, %v6573_v4  ;;  %v2751_v52 = vmul.f32 %v7746_v33, %v7746_v33 }
 0xaef   : > { %v2740_v59 = vmul.f32 0.03125, %v2730_v39  ;;  %v2754_v0 = vmul.f32 %v7691_v6, %v7691_v6  ;;  %v7755_v39 = vsub.f32 %v7660_v63, %v2739_v1 }
 0xaf0   : > { %v2761_v21 = vsel %vm643_vm1, %v2751_v52, 0.0 }
 0xaf1   : > { %v7699_v22 = vsub.f32 %v2706_v43, %v2740_v59  ;;  %v2770_v49 = vsel %vm643_vm1, %v2754_v0, 0.0  ;;  %v2741_v59 = vmul.f32 0.03125, %v2733_v35  ;;  %v2753_v0 = vmul.f32 %v7749_v47, %v7749_v47 }
 0xaf2   : > { %2771 = vadd.xlane.f32.xlu1 %v2770_v49 }
 0xaf3   : > { %v2756_v14 = vmul.f32 %v7699_v22, %v7699_v22  ;;  %v7761_v40 = vsub.f32 %v7668_v44, %v2741_v59  ;;  %v2767_v49 = vsel %vm643_vm1, %v2753_v0, 0.0  ;;  %v5138_v44 = vld [vmem:[%s8197_s4 + $0x120] sm:$0xff] }
 0xaf4   : > { %v6214_v16 = vpack.c.bf16 %v5139_v20, %v5138_v44 }
 0xaf5   : > { %v2776_v46 = vsel %vm643_vm1, %v2756_v14, 0.0  ;;  %v2755_v14 = vmul.f32 %v7755_v39, %v7755_v39  ;;  %v2757_v63 = vmul.f32 %v7761_v40, %v7761_v40 }
 0xaf6   : > { %2777 = vadd.xlane.f32.xlu1 %v2776_v46  ;;  %6215 = vmatprep.subr.bf16.mxu1 %v6214_v16 }
 0xaf7   : > { %v2773_v46 = vsel %vm643_vm1, %v2755_v14, 0.0  ;;  %v2779_v29 = vsel %vm643_vm1, %v2757_v63, 0.0 }
 0xb77   : > { %v2760_v48 = vpop.xlane.xlu1 %2759 }
 0xb78   : > { %v2782_v7 = vmul.f32 0.03125, %v2760_v48 }
 0xb7a   : > { %v2790_v34 = vadd.f32 1e-05, %v2782_v7 }
 0xb7b   : > { %v2766_v13 = vpop.xlane.xlu1 %2765 }
 0xb7c   : > { %6513 = vrsqrt.f32 %v2790_v34  ;;  %v2784_v3 = vmul.f32 0.03125, %v2766_v13  ;;  %v6560_v13 = vld [vmem:[%s8194_s1 + $0x18] sm:$0xff] }
 0xb7e   : > { %v2792_v35 = vadd.f32 1e-05, %v2784_v3 }
 0xb7f   : > { %v2772_v53 = vpop.xlane.xlu1 %2771 }
 0xb80   : > { %v2786_v48 = vmul.f32 0.03125, %v2772_v53  ;;  %6515 = vrsqrt.f32 %v2792_v35 }
 0xb83   : > { %v2778_v7 = vpop.xlane.xlu1 %2777 }
 0xb86   : > { %v6514_v43 = vpop.eup %6513 }
 0xb87   : > { %v2806_v56 = vmul.f32 %v6514_v43, %v2742_v58 }
 0xb89   : > { %v2818_v62 = vmul.f32 %v7721_v2, %v2806_v56  ;;  %v2794_v56 = vadd.f32 1e-05, %v2786_v48  ;;  %v6561_v48 = vld [vmem:[%s8194_s1 + $0x20] sm:$0xff] }
 0xb8b   : > { %v7733_v60 = vadd.f32 %v7729_v61, %v2818_v62  ;;  %6517 = vrsqrt.f32 %v2794_v56  ;;  %v6562_v56 = vld [vmem:[%s8194_s1 + $0x28] sm:$0xff] }
 0xb8d   : > { %v3531_v31 = vadd.f32 %v6557_v15, %v7733_v60 }
 0xbbc   : > { %v5854_v50 = vpop.f32.mrb[60].mxu0 }
 0xbbd   : > { %v3332_v42 = vmul.f32 %v5854_v50, %v6883_v19  ;;  %v3312_v8 = vpop.f32.mrb[61].mxu0  ;;  %v2788_v50 = vmul.f32 0.03125, %v2778_v7 }
 0xbbe   : > { %v3331_v54 = vmul.f32 %v6807_v5, %v3312_v8 }
 0xbc0   : > { %v3333_v55 = vadd.f32 %v3332_v42, %v3331_v54  ;;  %v5857_v30 = vpop.f32.mrb[62].mxu0 }
 0xbc1   : > { %v3322_v25 = vpop.f32.mrb[63].mxu0  ;;  %v3336_v9 = vmul.f32 %v5857_v30, %v6939_v38 }
 0xbc2   : > { %v3334_v12 = vmul.f32 %v6911_v27, %v3322_v25 }
 0xbc4   : > { %v3335_v58 = vadd.f32 %v3334_v12, %v3333_v55  ;;  %v2796_v55 = vadd.f32 1e-05, %v2788_v50 }
 0xbc6   : > { %v3337_v18 = vadd.f32 %v3336_v9, %v3335_v58 }
 0xbc8   : > { %5867 = vmatmul.mubr.msk.f32.vlgmr.msra.gmra.mrb[70].mxu1 %vm643_vm1, %v3337_v18  ;;  %v6516_v18 = vpop.eup %6515 }
 0xbc9   : > { %5888 = vmatprep.mubr.msk.f32.mxu1 %vm643_vm1, %v3531_v31  ;;  %6217 = vmatpush3.bf16.msra.mxu1 %v6214_v16  ;;  %v2808_v57 = vmul.f32 %v6516_v18, %v7682_v28  ;;  %v6518_v41 = vpop.eup %6517  ;;  %v5151_v18 = vld [vmem:[%s8197_s4 + $0x140] sm:$0xff] }
 0xbca   : > { %6219 = vmatprep.subr.bf16.mxu1 %v6218_v17  ;;  %v2810_v1 = vmul.f32 %v6518_v41, %v7691_v6 }
 0xbcb   : > { %v2820_v52 = vmul.f32 %v7721_v2, %v2808_v57 }
 0xbcd   : > { %6221 = vmatpush3.bf16.msra.mxu1 %v6218_v17  ;;  %v7794_v14 = vadd.f32 %v7729_v61, %v2820_v52  ;;  %v5153_v52 = vld [vmem:[%s8197_s4 + $0x150] sm:$0xff] }
 0xc9b   : > { %v3417_v45 = vpop.f32.mrb[70].mxu1 }
 0xc9c   : > { %v3418_v26 = vadd.f32 %v5128_v10, %v3417_v45  ;;  %v5868_v32 = vpop.f32.mrb[71].mxu1 }
 0xc9e   : > { %v3424_v36 = vsel %vm643_vm1, %v3418_v26, 0.0 }
 0xc9f   : > { %3425 = vadd.xlane.f32.xlu0 %v3424_v36 }
 0xca3   : > { %2762 = vadd.xlane.f32.xlu0 %v2761_v21 }
 0xca7   : > { %2768 = vadd.xlane.f32.xlu0 %v2767_v49 }
 0xcab   : > { %2774 = vadd.xlane.f32.xlu0 %v2773_v46  ;;  %v2822_v46 = vmul.f32 %v7721_v2, %v2810_v1  ;;  %v5131_v1 = vld [vmem:[%s8198_s5 + $0xf] ss:$0 sm:$0xff] }
 0xcaf   : > { %2780 = vadd.xlane.f32.xlu0 %v2779_v29 }
 0xd2c   : > { %v3426_v34 = vpop.xlane.xlu0 %3425 }
 0xd2d   : > { %v3427_v43 = vmul.f32 0.03125, %v3426_v34 }
 0xd2f   : > { %v7782_v42 = vsub.f32 %v3418_v26, %v3427_v43 }
 0xd30   : > { %v2763_v8 = vpop.xlane.xlu0 %2762 }
 0xd31   : > { %v2783_v54 = vmul.f32 0.03125, %v2763_v8  ;;  %v3429_v62 = vmul.f32 %v7782_v42, %v7782_v42 }
 0xd33   : > { %v2791_v30 = vadd.f32 1e-05, %v2783_v54  ;;  %v3430_v25 = vsel %vm643_vm1, %v3429_v62, 0.0  ;;  %v6563_v54 = vld [vmem:[%s8194_s1 + $0x30] sm:$0xff] }
 0xd34   : > { %3431 = vadd.xlane.f32.xlu1 %v3430_v25  ;;  %v2769_v12 = vpop.xlane.xlu0 %2768 }
 0xd35   : > { %6519 = vrsqrt.f32 %v2791_v30  ;;  %v2785_v9 = vmul.f32 0.03125, %v2769_v12 }
 0xd36   : > { %6521 = vrsqrt.f32 %v2796_v55  ;;  %v5133_v55 = vld [vmem:[%s8197_s4 + $0x108] sm:$0xff] }
 0xd37   : > { %v2793_v58 = vadd.f32 1e-05, %v2785_v9  ;;  %v5134_v9 = vld [vmem:[%s8197_s4 + $0x110] sm:$0xff] }
 0xd38   : > { %v2775_v15 = vpop.xlane.xlu0 %2774 }
 0xd39   : > { %6523 = vrsqrt.f32 %v2793_v58  ;;  %v2787_v31 = vmul.f32 0.03125, %v2775_v15  ;;  %v5135_v58 = vld [vmem:[%s8197_s4 + $0x118] sm:$0xff]  ;;  %v5152_v15 = vld [vmem:[%s8197_s4 + $0x148] sm:$0xff] }
 0xd3b   : > { %v2795_v10 = vadd.f32 1e-05, %v2787_v31  ;;  %v6222_v31 = vpack.c.bf16 %v5152_v15, %v5151_v18 }
 0xd3c   : > { %v2781_v45 = vpop.xlane.xlu0 %2780 }
 0xd3d   : > { %6525 = vrsqrt.f32 %v2795_v10  ;;  %v2789_v26 = vmul.f32 0.03125, %v2781_v45 }
 0xd3f   : > { %v6520_v32 = vpop.eup %6519  ;;  %v2797_v36 = vadd.f32 1e-05, %v2789_v26  ;;  %v5130_v26 = vld [vmem:[%s8198_s5 + $0xe] ss:$0 sm:$0xff] }
 0xd40   : > { %v6522_v59 = vpop.eup %6521  ;;  %v2807_v21 = vmul.f32 %v6520_v32, %v7746_v33  ;;  %v6558_v33 = vld [vmem:[%s8194_s1 + $0x8] sm:$0xff] }
 0xd41   : > { %6527 = vrsqrt.f32 %v2797_v36  ;;  %v2812_v28 = vmul.f32 %v6522_v59, %v7699_v22  ;;  %v6559_v22 = vld [vmem:[%s8194_s1 + $0x10] sm:$0xff]  ;;  %v5154_v59 = vld [vmem:[%s8197_s4 + $0x158] sm:$0xff] }
 0xd42   : > { %v2819_v0 = vmul.f32 %v7721_v2, %v2807_v21  ;;  %v3533_v16 = vadd.f32 %v6559_v22, %v7794_v14 }
 0xd43   : > { %v6524_v49 = vpop.eup %6523  ;;  %v2824_v37 = vmul.f32 %v7721_v2, %v2812_v28 }
 0xd44   : > { %v2809_v63 = vmul.f32 %v6524_v49, %v7749_v47  ;;  %v7799_v6 = vadd.f32 %v7729_v61, %v2819_v0  ;;  %v7811_v47 = vadd.f32 %v7729_v61, %v2822_v46  ;;  %v6226_v49 = vpack.c.bf16 %v5154_v59, %v5153_v52 }
 0xd45   : > { %v2836_v7 = vadd.f32 %v7729_v61, %v2824_v37 }
 0xd46   : > { %v3532_v29 = vadd.f32 %v6558_v33, %v7799_v6  ;;  %v2821_v44 = vmul.f32 %v7721_v2, %v2809_v63 }
 0xd47   : > { %v6526_v20 = vpop.eup %6525  ;;  %v3537_v62 = vadd.f32 %v6563_v54, %v2836_v7 }
 0xd48   : > { %v2811_v23 = vmul.f32 %v6526_v20, %v7755_v39  ;;  %5889 = vmatmul.mubr.msk.f32.vlgmr.msra.gmra.mrb[72].mxu1 %vm643_vm1, %v3532_v29  ;;  %v2833_v17 = vadd.f32 %v7729_v61, %v2821_v44  ;;  %v3535_v39 = vadd.f32 %v6561_v48, %v7811_v47 }
 0xd49   : > { %5891 = vmatprep.mubr.msk.f32.mxu1 %vm643_vm1, %v3533_v16 }
 0xd4a   : > { %v3534_v53 = vadd.f32 %v6560_v13, %v2833_v17  ;;  %v2823_v3 = vmul.f32 %v7721_v2, %v2811_v23 }
 0xd4b   : > { %v6528_v35 = vpop.eup %6527 }
 0xd4c   : > { %v2813_v34 = vmul.f32 %v6528_v35, %v7761_v40  ;;  %5892 = vmatmul.mubr.msk.f32.gmra.mrb[74].mxu1 %vm643_vm1, %v3534_v53  ;;  %v2835_v43 = vadd.f32 %v7729_v61, %v2823_v3  ;;  %v5132_v40 = vld [vmem:[%s8197_s4 + $0x100] sm:$0xff]  ;;  %v5136_v35 = vld [vmem:[%s8198_s5 + $0x10] ss:$0 sm:$0xff] }
 0xd4d   : > { %5894 = vmatprep.mubr.msk.f32.mxu1 %vm643_vm1, %v3535_v39  ;;  %v6209_v25 = vpack.c.bf16 %v5133_v55, %v5132_v40 }
 0xd4e   : > { %v3536_v50 = vadd.f32 %v6562_v56, %v2835_v43  ;;  %v2825_v8 = vmul.f32 %v7721_v2, %v2813_v34  ;;  %v6564_v2 = vld [vmem:[%s8194_s1 + $0x38] sm:$0xff] }
 0xd4f   : > { %6210 = vmatpush3.bf16.msra.mxu0 %v6209_v25 }
 0xd50   : > { %5895 = vmatmul.mubr.msk.f32.gmra.mrb[76].mxu1 %vm643_vm1, %v3536_v50  ;;  %v2837_v30 = vadd.f32 %v7729_v61, %v2825_v8  ;;  %6211 = vmatprep.subr.bf16.mxu0 %v6574_v51  ;;  %v6212_v61 = vpack.c.bf16 %v5135_v58, %v5134_v9 }
 0xd51   : > { %5897 = vmatprep.mubr.msk.f32.mxu1 %vm643_vm1, %v3537_v62 }
 0xd52   : > { %v3538_v12 = vadd.f32 %v6564_v2, %v2837_v30 }
 0xd53   : > { %6213 = vmatpush3.bf16.msra.mxu0 %v6212_v61 }
 0xd54   : > { %5898 = vmatmul.mubr.msk.f32.gmra.mrb[78].mxu1 %vm643_vm1, %v3538_v12  ;;  %6223 = vmatprep.subr.bf16.mxu0 %v6222_v31 }
 0xdc1   : > { %v3432_v57 = vpop.xlane.xlu1 %3431 }
 0xdc2   : > { %v3433_v10 = vmul.f32 0.03125, %v3432_v57 }
 0xdc4   : > { %v3434_v41 = vadd.f32 1e-05, %v3433_v10 }
 0xdc6   : > { %6529 = vrsqrt.f32 %v3434_v41 }
 0xdd0   : > { %v6530_v45 = vpop.eup %6529 }
 0xdd1   : > { %v3436_v32 = vmul.f32 %v6530_v45, %v7782_v42 }
 0xdd3   : > { %v3441_v36 = vmul.f32 %v5130_v26, %v3436_v32 }
 0xdd5   : > { %v7877_v21 = vadd.f32 %v5131_v1, %v3441_v36 }
 0xdd7   : > { %v3447_v0 = vadd.f32 %v7877_v21, %v7532_v24  ;;  %v5142_v24 = vld [vmem:[%s8198_s5 + $0x11] ss:$0 sm:$0xff] }
 0xdd9   : > { %5878 = vmatmul.mubr.msk.f32.vlgmr.msra.gmra.mrb[64].mxu0 %vm643_vm1, %v3447_v0 }
 0xdda   : > { %6225 = vmatpush3.bf16.msra.mxu0 %v6222_v31  ;;  %5908 = vmatprep.mubr.msk.f32.mxu0 %vm643_vm1, %v7733_v60 }
 0xddb   : > { %6227 = vmatprep.subr.bf16.mxu0 %v6226_v49 }
 0xdde   : > { %6229 = vmatpush3.bf16.msra.mxu0 %v6226_v49 }
 0xde1   : > { %5909 = vmatmul.mubr.msk.f32.vlgmr.msra.gmra.mrb[66].mxu0 %vm643_vm1, %v7799_v6 }
 0xde2   : > { %5911 = vmatprep.mubr.msk.f32.mxu0 %vm643_vm1, %v7794_v14 }
 0xde5   : > { %5912 = vmatmul.mubr.msk.f32.gmra.mrb[68].mxu0 %vm643_vm1, %v2833_v17 }
 0xde6   : > { %5914 = vmatprep.mubr.msk.f32.mxu0 %vm643_vm1, %v7811_v47 }
 0xde9   : > { %5915 = vmatmul.mubr.msk.f32.gmra.mrb[70].mxu0 %vm643_vm1, %v2835_v43 }
 0xdea   : > { %5917 = vmatprep.mubr.msk.f32.mxu0 %vm643_vm1, %v2836_v7 }
 0xded   : > { %5918 = vmatmul.mubr.msk.f32.gmra.mrb[72].mxu0 %vm643_vm1, %v2837_v30 }
 0xe1b   : > { %v5890_v60 = vpop.f32.mrb[72].mxu1 }
 0xe1c   : > { %v3645_v42 = vadd.f32 %v5890_v60, %v5142_v24  ;;  %v3639_v28 = vpop.f32.mrb[73].mxu1 }
 0xe1d   : > { %v3640_v46 = vadd.f32 %v5142_v24, %v3639_v28 }
 0xe1f   : > { %v6230_v14 = vpack.c.bf16 %v3645_v42, %v3640_v46  ;;  %v5893_v63 = vpop.f32.mrb[74].mxu1 }
 0xe20   : > { %v3655_v6 = vadd.f32 %v5893_v63, %v5142_v24  ;;  %v3649_v33 = vpop.f32.mrb[75].mxu1 }
 0xe21   : > { %v3650_v29 = vadd.f32 %v5142_v24, %v3649_v33  ;;  %6232 = vmatprep.subr.msk.bf16.mxu1 %vm6814_vm3, %v6230_v14 }
 0xe22   : > { %6235 = vmatpush3.bf16.xpose.msk.msra.mxu1 %vm6814_vm3, %v6230_v14 }
 0xe23   : > { %v6236_v44 = vpack.c.bf16 %v3655_v6, %v3650_v29  ;;  %v5896_v20 = vpop.f32.mrb[76].mxu1 }
 0xe24   : > { %v3665_v22 = vadd.f32 %v5896_v20, %v5142_v24  ;;  %v3659_v16 = vpop.f32.mrb[77].mxu1 }
 0xe25   : > { %v3660_v47 = vadd.f32 %v5142_v24, %v3659_v16  ;;  %6238 = vmatprep.subr.msk.bf16.mxu1 %vm6814_vm3, %v6236_v44 }
 0xe27   : > { %v6242_v37 = vpack.c.bf16 %v3665_v22, %v3660_v47  ;;  %v5899_v23 = vpop.f32.mrb[78].mxu1 }
 0xe28   : > { %v3675_v17 = vadd.f32 %v5899_v23, %v5142_v24  ;;  %v3669_v13 = vpop.f32.mrb[79].mxu1 }
 0xe29   : > { %v3670_v53 = vadd.f32 %v5142_v24, %v3669_v13 }
 0xe2a   : > { %6241 = vmatpush3.bf16.xpose.msk.msra.mxu1 %vm6814_vm3, %v6236_v44 }
 0xe2b   : > { %v6248_v3 = vpack.c.bf16 %v3675_v17, %v3670_v53  ;;  %6244 = vmatprep.subr.msk.bf16.mxu1 %vm6814_vm3, %v6242_v37 }
 0xe32   : > { %6247 = vmatpush3.bf16.xpose.msk.msra.mxu1 %vm6814_vm3, %v6242_v37 }
 0xe33   : > { %6250 = vmatprep.subr.msk.bf16.mxu1 %vm6814_vm3, %v6248_v3 }
 0xe3a   : > { %6253 = vmatpush3.bf16.xpose.msk.msra.mxu1 %vm6814_vm3, %v6248_v3 }
 0xe3b   : > { %6282 = vmatprep.subr.bf16.mxu1 %v6574_v51 }
 0xeac   : > { %v3527_v48 = vpop.f32.mrb[64].mxu0 }
 0xead   : > { %v3528_v39 = vadd.f32 %v5136_v35, %v3527_v48  ;;  %v5879_v7 = vpop.f32.mrb[65].mxu0 }
 0xeaf   : > { %v3818_v34 = vmul.f32 %v6883_v19, %v3528_v39  ;;  %v3817_v43 = vmul.f32 %v6807_v5, %v3528_v39  ;;  %v3819_v56 = vmul.f32 %v6911_v27, %v3528_v39  ;;  %v3820_v8 = vmul.f32 %v6939_v38, %v3528_v39 }
 0xeb1   : > { %5936 = vmatprep.mubr.msk.f32.mxu1 %vm643_vm1, %v3817_v43 }
 0xeb2   : > { %5937 = vmatmul.mubr.msk.f32.vlgmr.msra.gmra.mrb[80].mxu1 %vm643_vm1, %v3818_v34 }
 0xeb3   : > { %5939 = vmatprep.mubr.msk.f32.mxu1 %vm643_vm1, %v3819_v56 }
 0xeb4   : > { %v5910_v50 = vpop.f32.mrb[66].mxu0 }
 0xeb5   : > { %v3784_v54 = vadd.f32 %v5910_v50, %v5155_v11  ;;  %v3778_v62 = vpop.f32.mrb[67].mxu0 }
 0xeb6   : > { %v3779_v40 = vadd.f32 %v5155_v11, %v3778_v62  ;;  %5940 = vmatmul.mubr.msk.f32.gmra.mrb[82].mxu1 %vm643_vm1, %v3820_v8 }
 0xeb7   : > { %6002 = vmatprep.mubr.msk.f32.mxu1 %vm6575_vm14, %v6573_v4 }
 0xeb8   : > { %v6254_v55 = vpack.c.bf16 %v3784_v54, %v3779_v40  ;;  %v5913_v30 = vpop.f32.mrb[68].mxu0  ;;  %v5180_v40 = vld [vmem:[%s8197_s4 + $0x160] sm:$0xff] }
 0xeb9   : > { %v3794_v25 = vadd.f32 %v5913_v30, %v5155_v11  ;;  %v3788_v2 = vpop.f32.mrb[69].mxu0 }
 0xeba   : > { %v3789_v12 = vadd.f32 %v5155_v11, %v3788_v2  ;;  %6255 = vmatprep.subr.bf16.mxu0 %v6254_v55  ;;  %v5183_v2 = vld [vmem:[%s8197_s4 + $0x178] sm:$0xff] }
 0xebb   : > { %6257 = vmatpush3.bf16.msra.mxu0 %v6254_v55  ;;  %v5181_v55 = vld [vmem:[%s8197_s4 + $0x168] sm:$0xff] }
 0xebc   : > { %v6258_v9 = vpack.c.bf16 %v3794_v25, %v3789_v12  ;;  %v5916_v58 = vpop.f32.mrb[70].mxu0  ;;  %v6271_v30 = vpack.c.bf16 %v5181_v55, %v5180_v40  ;;  %v5182_v25 = vld [vmem:[%s8197_s4 + $0x170] sm:$0xff] }
 0xebd   : > { %v3804_v61 = vadd.f32 %v5916_v58, %v5155_v11  ;;  %v3798_v18 = vpop.f32.mrb[71].mxu0  ;;  %v6274_v12 = vpack.c.bf16 %v5183_v2, %v5182_v25 }
 0xebe   : > { %v3799_v15 = vadd.f32 %v5155_v11, %v3798_v18  ;;  %6259 = vmatprep.subr.bf16.mxu0 %v6258_v9 }
 0xebf   : > { %6261 = vmatpush3.bf16.msra.mxu0 %v6258_v9 }
 0xec0   : > { %v6262_v31 = vpack.c.bf16 %v3804_v61, %v3799_v15  ;;  %v5919_v57 = vpop.f32.mrb[72].mxu0 }
 0xec1   : > { %v3814_v10 = vadd.f32 %v5919_v57, %v5155_v11  ;;  %v3808_v41 = vpop.f32.mrb[73].mxu0 }
 0xec2   : > { %v3809_v45 = vadd.f32 %v5155_v11, %v3808_v41  ;;  %6263 = vmatprep.subr.bf16.mxu0 %v6262_v31 }
 0xec3   : > { %6265 = vmatpush3.bf16.msra.mxu0 %v6262_v31 }
 0xec4   : > { %v6266_v26 = vpack.c.bf16 %v3814_v10, %v3809_v45 }
 0xec6   : > { %6267 = vmatprep.subr.bf16.mxu0 %v6266_v26 }
 0xec7   : > { %6269 = vmatpush3.bf16.msra.mxu0 %v6266_v26 }
 0xec8   : > { %6270 = vmatprep.subr.bf16.mxu0 %v6574_v51 }
 0xf85   : > { %v5938_v32 = vpop.f32.mrb[80].mxu1 }
 0xf86   : > { %v3923_v1 = vpop.f32.mrb[81].mxu1  ;;  %v3945_v36 = vsel %vm1404_vm13, %v5938_v32, -inf }
 0xf87   : > { %3946 = vmax.xlane.f32.xlu1 %v3945_v36  ;;  %v3942_v52 = vsel %vm1404_vm13, %v3923_v1, -inf }
 0xf88   : > { %3943 = vmax.xlane.f32.xlu0 %v3942_v52 }
 0xf89   : > { %v5941_v59 = vpop.f32.mrb[82].mxu1 }
 0xf8a   : > { %v3933_v0 = vpop.f32.mrb[83].mxu1  ;;  %v3951_v49 = vsel %vm1404_vm13, %v5941_v59, -inf }
 0xf8b   : > { %3952 = vmax.xlane.f32.xlu1 %v3951_v49  ;;  %v3948_v24 = vsel %vm1404_vm13, %v3933_v0, -inf }
 0xf8c   : > { %3949 = vmax.xlane.f32.xlu0 %v3948_v24  ;;  %v5188_v24 = vld [vmem:[%s8199_s6 + $0x20] sm:$0xff] }
0x1014   : > { %v3947_v60 = vpop.xlane.xlu1 %3946 }
0x1015   : > { %v3955_v42 = vsub.f32 %v5938_v32, %v3947_v60  ;;  %v3944_v28 = vpop.xlane.xlu0 %3943  ;;  %v5189_v60 = vld [vmem:[%s8199_s6 + $0x28] sm:$0xff] }
0x1016   : > { %v3954_v46 = vsub.f32 %v3923_v1, %v3944_v28  ;;  %v5191_v28 = vld [vmem:[%s8199_s6 + $0x38] sm:$0xff] }
0x1017   : > { %v3960_v14 = vmul.f32 1.442695, %v3955_v42  ;;  %v6277_v42 = vpack.c.bf16 %v5189_v60, %v5188_v24  ;;  %v5212_v24 = vld [vmem:[%s8197_s4 + $0x188] sm:$0xff] }
0x1018   : > { %v3958_v63 = vmul.f32 1.442695, %v3954_v46  ;;  %v3953_v6 = vpop.xlane.xlu1 %3952 }
0x1019   : > { %6531 = vpow2.f32 %v3960_v14  ;;  %v3957_v33 = vsub.f32 %v5941_v59, %v3953_v6  ;;  %v3950_v29 = vpop.xlane.xlu0 %3949  ;;  %v5194_v14 = vld [vmem:[%s8200_s7 + $0x40] sm:$0xff]  ;;  %v5196_v6 = vld [vmem:[%s8200_s7 + $0x50] sm:$0xff] }
0x101a   : > { %6533 = vpow2.f32 %v3958_v63  ;;  %v3956_v44 = vsub.f32 %v3933_v0, %v3950_v29  ;;  %v5195_v63 = vld [vmem:[%s8200_s7 + $0x48] sm:$0xff]  ;;  %v5197_v29 = vld [vmem:[%s8200_s7 + $0x58] sm:$0xff] }
0x101b   : > { %v3964_v20 = vmul.f32 1.442695, %v3957_v33  ;;  %v6283_v33 = vpack.c.bf16 %v5195_v63, %v5194_v14  ;;  %v5214_v14 = vld [vmem:[%s8197_s4 + $0x198] sm:$0xff] }
0x101c   : > { %v3962_v22 = vmul.f32 1.442695, %v3956_v44  ;;  %v6286_v44 = vpack.c.bf16 %v5197_v29, %v5196_v6 }
0x101d   : > { %6535 = vpow2.f32 %v3964_v20  ;;  %6284 = vmatpush3.bf16.msra.mxu1 %v6283_v33  ;;  %v5198_v20 = vld [vmem:[%s8200_s7 + $0x60] sm:$0xff] }
0x101e   : > { %6537 = vpow2.f32 %v3962_v22  ;;  %6285 = vmatprep.subr.bf16.mxu1 %v6574_v51  ;;  %v5199_v22 = vld [vmem:[%s8200_s7 + $0x68] sm:$0xff] }
0x1021   : > { %6287 = vmatpush3.bf16.msra.mxu1 %v6286_v44 }
0x1022   : > { %6288 = vmatprep.subr.bf16.mxu1 %v6574_v51 }
0x1023   : > { %v6532_v16 = vpop.eup %6531 }
0x1024   : > { %v6534_v47 = vpop.eup %6533  ;;  %v3969_v37 = vsel %vm1404_vm13, %v6532_v16, 0.0 }
0x1025   : > { %3970 = vadd.xlane.f32.xlu1 %v3969_v37  ;;  %v3966_v23 = vsel %vm1404_vm13, %v6534_v47, 0.0 }
0x1026   : > { %3967 = vadd.xlane.f32.xlu0 %v3966_v23 }
0x1027   : > { %v6536_v17 = vpop.eup %6535 }
0x1028   : > { %v6538_v13 = vpop.eup %6537  ;;  %v3975_v53 = vsel %vm1404_vm13, %v6536_v17, 0.0 }
0x1029   : > { %3976 = vadd.xlane.f32.xlu1 %v3975_v53  ;;  %v3972_v3 = vsel %vm1404_vm13, %v6538_v13, 0.0 }
0x102a   : > { %3973 = vadd.xlane.f32.xlu0 %v3972_v3  ;;  %v5187_v3 = vld [vmem:[%s8198_s5 + $0x15] ss:$0 sm:$0xff] }
0x10b2   : > { %v3971_v35 = vpop.xlane.xlu1 %3970 }
0x10b3   : > { %6539 = vrcp.f32 %v3971_v35  ;;  %v3968_v48 = vpop.xlane.xlu0 %3967 }
0x10b4   : > { %6541 = vrcp.f32 %v3968_v48 }
0x10b6   : > { %v3977_v39 = vpop.xlane.xlu1 %3976 }
0x10b7   : > { %6543 = vrcp.f32 %v3977_v39  ;;  %v3974_v7 = vpop.xlane.xlu0 %3973  ;;  %v5200_v39 = vld [vmem:[%s8200_s7 + $0x70] sm:$0xff] }
0x10b8   : > { %6545 = vrcp.f32 %v3974_v7  ;;  %v5201_v7 = vld [vmem:[%s8200_s7 + $0x78] sm:$0xff] }
0x10bd   : > { %v6540_v34 = vpop.eup %6539 }
0x10be   : > { %v6542_v43 = vpop.eup %6541  ;;  %v3983_v11 = vmul.f32 %v6540_v34, %v6532_v16  ;;  %v6289_v16 = vpack.c.bf16 %v5199_v22, %v5198_v20  ;;  %v6292_v34 = vpack.c.bf16 %v5201_v7, %v5200_v39  ;;  %v5206_v20 = vld [vmem:[%s8198_s5 + $0x19] ss:$0 sm:$0xff]  ;;  %v4503_v22 = vld [vmem:[%s8203_s10] sm:$0xff] }
0x10bf   : > { %v3982_v56 = vmul.f32 %v6542_v43, %v6534_v47  ;;  %v5192_v43 = vld [vmem:[%s8201_s8 + $0x1] ss:$0 sm:$0xff]  ;;  %v4506_v39 = vld [vmem:[%s8203_s10 + $0x18] sm:$0xff] }
0x10c0   : > { %6290 = vmatpush3.bf16.msra.mxu1 %v6289_v16 }
0x10c1   : > { %v6544_v50 = vpop.eup %6543  ;;  %5958 = vmatprep.mubr.msk.f32.mxu0 %vm1404_vm13, %v3982_v56  ;;  %6291 = vmatprep.subr.bf16.mxu1 %v6574_v51 }
0x10c2   : > { %v6546_v8 = vpop.eup %6545  ;;  %5959 = vmatmul.mubr.msk.f32.vlgmr.msra.gmra.mrb[74].mxu0 %vm1404_vm13, %v3983_v11  ;;  %v3985_v62 = vmul.f32 %v6544_v50, %v6536_v17 }
0x10c3   : > { %v3984_v54 = vmul.f32 %v6546_v8, %v6538_v13  ;;  %6272 = vmatpush3.bf16.msra.mxu0 %v6271_v30  ;;  %v5186_v13 = vld [vmem:[%s8198_s5 + $0x14] ss:$0 sm:$0xff] }
0x10c4   : > { %6273 = vmatprep.subr.bf16.mxu0 %v6574_v51  ;;  %6293 = vmatpush3.bf16.msra.mxu1 %v6292_v34  ;;  %v4507_v34 = vld [vmem:[%s8203_s10 + $0x20] sm:$0xff] }
0x10c5   : > { %5961 = vmatprep.mubr.msk.f32.mxu0 %vm1404_vm13, %v3984_v54  ;;  %6324 = vmatprep.subr.bf16.mxu1 %v6574_v51  ;;  %v5202_v54 = vld [vmem:[%s8198_s5 + $0x16] ss:$0 sm:$0xff] }
0x10c6   : > { %5962 = vmatmul.mubr.msk.f32.gmra.mrb[76].mxu0 %vm1404_vm13, %v3985_v62 }
0x10c7   : > { %5972 = vmatprep.mubr.msk.f32.mxu0 %vm6575_vm14, %v6573_v4  ;;  %6275 = vmatpush3.bf16.msra.mxu0 %v6274_v12 }
0x10c8   : > { %6276 = vmatprep.subr.bf16.mxu0 %v6574_v51 }
0x1195   : > { %v5960_v9 = vpop.f32.mrb[74].mxu0 }
0x1196   : > { %v4084_v58 = vmul.f32 %v5960_v9, %v6883_v19  ;;  %v4064_v61 = vpop.f32.mrb[75].mxu0  ;;  %v5184_v19 = vld [vmem:[%s8198_s5 + $0x13] ss:$0 sm:$0xff] }
0x1197   : > { %v4083_v18 = vmul.f32 %v6807_v5, %v4064_v61 }
0x1199   : > { %v4085_v15 = vadd.f32 %v4084_v58, %v4083_v18  ;;  %v5963_v31 = vpop.f32.mrb[76].mxu0 }
0x119a   : > { %v4074_v57 = vpop.f32.mrb[77].mxu0  ;;  %v4088_v41 = vmul.f32 %v5963_v31, %v6939_v38 }
0x119b   : > { %v4086_v10 = vmul.f32 %v6911_v27, %v4074_v57 }
0x119d   : > { %v4087_v45 = vadd.f32 %v4086_v10, %v4085_v15  ;;  %v5204_v10 = vld [vmem:[%s8198_s5 + $0x17] ss:$0 sm:$0xff] }
0x119f   : > { %v4089_v26 = vadd.f32 %v4088_v41, %v4087_v45  ;;  %v5205_v45 = vld [vmem:[%s8198_s5 + $0x18] ss:$0 sm:$0xff] }
0x11a1   : > { %5973 = vmatmul.mubr.msk.f32.vlgmr.msra.gmra.mrb[78].mxu0 %vm643_vm1, %v4089_v26 }
0x11a2   : > { %5983 = vmatprep.mubr.msk.f32.mxu0 %vm6575_vm14, %v6573_v4  ;;  %6278 = vmatpush3.bf16.msra.mxu0 %v6277_v42  ;;  %v4423_v42 = vld [vmem:[%s8202_s9 + $0x10] sm:$0xff] }
0x11a3   : > { %6279 = vmatprep.subr.bf16.mxu0 %v6574_v51 }
0x1274   : > { %v4169_v32 = vpop.f32.mrb[78].mxu0 }
0x1275   : > { %v4170_v5 = vadd.f32 %v5184_v19, %v4169_v32  ;;  %v5974_v1 = vpop.f32.mrb[79].mxu0 }
0x1277   : > { %v4173_v36 = vadd.f32 %v4170_v5, %v7877_v21  ;;  %v5190_v21 = vld [vmem:[%s8199_s6 + $0x30] sm:$0xff] }
0x1278   : > { %v6280_v46 = vpack.c.bf16 %v5191_v28, %v5190_v21  ;;  %v4424_v21 = vld [vmem:[%s8202_s9 + $0x18] sm:$0xff]  ;;  %v5213_v28 = vld [vmem:[%s8197_s4 + $0x190] sm:$0xff] }
0x1279   : > { %v4176_v27 = vsel %vm643_vm1, %v4173_v36, 0.0  ;;  %v6328_v63 = vpack.c.bf16 %v5214_v14, %v5213_v28 }
0x127a   : > { %4177 = vadd.xlane.f32.xlu0 %v4176_v27  ;;  %6281 = vmatpush3.bf16.msra.mxu0 %v6280_v46  ;;  %v6298_v46 = vpack.c.bf16 %v4424_v21, %v4423_v42 }
0x127b   : > { %6294 = vmatprep.subr.bf16.mxu0 %v6574_v51 }
0x1307   : > { %v4178_v38 = vpop.xlane.xlu0 %4177 }
0x1308   : > { %v4179_v52 = vmul.f32 0.03125, %v4178_v38 }
0x130a   : > { %v4180_v59 = vsub.f32 %v4173_v36, %v4179_v52  ;;  %v4421_v52 = vld [vmem:[%s8202_s9] sm:$0xff] }
0x130c   : > { %v4181_v0 = vmul.f32 %v4180_v59, %v4180_v59 }
0x130e   : > { %v4182_v49 = vsel %vm643_vm1, %v4181_v0, 0.0  ;;  %v5211_v0 = vld [vmem:[%s8197_s4 + $0x180] sm:$0xff] }
0x130f   : > { %4183 = vadd.xlane.f32.xlu1 %v4182_v49  ;;  %v6325_v60 = vpack.c.bf16 %v5212_v24, %v5211_v0  ;;  %v5221_v24 = vld [vmem:[%s8198_s5 + $0x1c] ss:$0 sm:$0xff] }
0x139c   : > { %v4184_v47 = vpop.xlane.xlu1 %4183 }
0x139d   : > { %v4185_v37 = vmul.f32 0.03125, %v4184_v47  ;;  %v4504_v47 = vld [vmem:[%s8203_s10 + $0x8] sm:$0xff] }
0x139f   : > { %v4186_v23 = vadd.f32 1e-05, %v4185_v37  ;;  %v5217_v37 = vld [vmem:[%s8197_s4 + $0x1a0] sm:$0xff] }
0x13a1   : > { %6547 = vrsqrt.f32 %v4186_v23  ;;  %v5218_v23 = vld [vmem:[%s8197_s4 + $0x1a8] sm:$0xff] }
0x13ab   : > { %v6548_v17 = vpop.eup %6547 }
0x13ac   : > { %v4188_v53 = vmul.f32 %v6548_v17, %v4180_v59  ;;  %v4422_v59 = vld [vmem:[%s8202_s9 + $0x8] sm:$0xff]  ;;  %v5207_v17 = vld [vmem:[%s8198_s5 + $0x1a] ss:$0 sm:$0xff] }
0x13ad   : > { %v6295_v49 = vpack.c.bf16 %v4422_v59, %v4421_v52  ;;  %v5225_v59 = vld [vmem:[%s8202_s9 + $0x30] sm:$0xff] }
0x13ae   : > { %v4193_v35 = vmul.f32 %v5186_v13, %v4188_v53  ;;  %v6301_v53 = vpack.c.bf16 %v4504_v47, %v4503_v22 }
0x13b0   : > { %v4198_v48 = vadd.f32 %v5187_v3, %v4193_v35  ;;  %v6331_v3 = vpack.c.bf16 %v5218_v23, %v5217_v37 }
0x13b2   : > { %5984 = vmatmul.mubr.msk.f32.vlgmr.msra.gmra.mrb[80].mxu0 %vm643_vm1, %v4198_v48 }
0x13b3   : > { %6013 = vmatprep.mubr.msk.f32.mxu0 %vm6575_vm14, %v6573_v4  ;;  %6296 = vmatpush3.bf16.msra.mxu0 %v6295_v49  ;;  %v5210_v49 = vld [vmem:[%s8204_s11 + $0x1] ss:$0 sm:$0xff] }
0x13b4   : > { %6297 = vmatprep.subr.bf16.mxu0 %v6574_v51 }
0x13b7   : > { %6299 = vmatpush3.bf16.msra.mxu0 %v6298_v46 }
0x13b8   : > { %6300 = vmatprep.subr.bf16.mxu0 %v6574_v51 }
0x1485   : > { %v4278_v56 = vpop.f32.mrb[80].mxu0 }
0x1486   : > { %v4279_v11 = vadd.f32 %v5192_v43, %v4278_v56  ;;  %v5985_v50 = vpop.f32.mrb[81].mxu0  ;;  %v4508_v43 = vld [vmem:[%s8203_s10 + $0x28] sm:$0xff] }
0x1487   : > { %v6307_v56 = vpack.c.bf16 %v4508_v43, %v4507_v34  ;;  %v4510_v50 = vld [vmem:[%s8203_s10 + $0x38] sm:$0xff] }
0x1488   : > { %v4282_v8 = vmax.f32 %v4279_v11, 0.0  ;;  %v4509_v11 = vld [vmem:[%s8203_s10 + $0x30] sm:$0xff] }
0x148a   : > { %6003 = vmatmul.mubr.msk.f32.vlgmr.msra.gmra.mrb[84].mxu1 %vm1404_vm13, %v4282_v8  ;;  %v6310_v8 = vpack.c.bf16 %v4510_v50, %v4509_v11 }
0x148b   : > { %6059 = vmatprep.mubr.msk.f32.mxu1 %vm6575_vm14, %v6573_v4  ;;  %6326 = vmatpush3.bf16.msra.mxu1 %v6325_v60 }
0x148c   : > { %6327 = vmatprep.subr.bf16.mxu1 %v6574_v51 }
0x148f   : > { %6329 = vmatpush3.bf16.msra.mxu1 %v6328_v63  ;;  %v5227_v63 = vld [vmem:[%s8204_s11 + $0x2] ss:$0 sm:$0xff] }
0x1490   : > { %6330 = vmatprep.subr.bf16.mxu1 %v6574_v51 }
0x155d   : > { %v4366_v62 = vpop.f32.mrb[84].mxu1 }
0x155e   : > { %v4367_v40 = vadd.f32 %v5202_v54, %v4366_v62  ;;  %v6004_v55 = vpop.f32.mrb[85].mxu1  ;;  %v4511_v54 = vld [vmem:[%s8203_s10 + $0x40] sm:$0xff]  ;;  %v4512_v62 = vld [vmem:[%s8203_s10 + $0x48] sm:$0xff] }
0x155f   : > { %v4513_v55 = vld [vmem:[%s8203_s10 + $0x50] sm:$0xff] }
0x1560   : > { %v4370_v30 = vadd.f32 %v4367_v40, %v4198_v48  ;;  %v4505_v48 = vld [vmem:[%s8203_s10 + $0x10] sm:$0xff]  ;;  %v6313_v40 = vpack.c.bf16 %v4512_v62, %v4511_v54 }
0x1561   : > { %v6304_v7 = vpack.c.bf16 %v4506_v39, %v4505_v48 }
0x1562   : > { %v4373_v25 = vsel %vm643_vm1, %v4370_v30, 0.0 }
0x1563   : > { %4374 = vadd.xlane.f32.xlu0 %v4373_v25 }
0x15f0   : > { %v4375_v2 = vpop.xlane.xlu0 %4374 }
0x15f1   : > { %v4376_v12 = vmul.f32 0.03125, %v4375_v2  ;;  %v4515_v2 = vld [vmem:[%s8203_s10 + $0x60] sm:$0xff] }
0x15f3   : > { %v4377_v9 = vsub.f32 %v4370_v30, %v4376_v12  ;;  %v4514_v30 = vld [vmem:[%s8203_s10 + $0x58] sm:$0xff]  ;;  %v4516_v12 = vld [vmem:[%s8203_s10 + $0x68] sm:$0xff] }
0x15f4   : > { %v6316_v25 = vpack.c.bf16 %v4514_v30, %v4513_v55 }
0x15f5   : > { %v4378_v58 = vmul.f32 %v4377_v9, %v4377_v9 }
0x15f7   : > { %v4379_v61 = vsel %vm643_vm1, %v4378_v58, 0.0  ;;  %v4517_v58 = vld [vmem:[%s8203_s10 + $0x70] sm:$0xff] }
0x15f8   : > { %4380 = vadd.xlane.f32.xlu1 %v4379_v61  ;;  %v4518_v61 = vld [vmem:[%s8203_s10 + $0x78] sm:$0xff] }
0x1685   : > { %v4381_v18 = vpop.xlane.xlu1 %4380 }
0x1686   : > { %v4382_v15 = vmul.f32 0.03125, %v4381_v18  ;;  %v6322_v18 = vpack.c.bf16 %v4518_v61, %v4517_v58 }
0x1688   : > { %v4383_v31 = vadd.f32 1e-05, %v4382_v15  ;;  %v5219_v15 = vld [vmem:[%s8197_s4 + $0x1b0] sm:$0xff] }
0x168a   : > { %6549 = vrsqrt.f32 %v4383_v31  ;;  %v5220_v31 = vld [vmem:[%s8197_s4 + $0x1b8] sm:$0xff] }
0x1694   : > { %v6550_v57 = vpop.eup %6549 }
0x1695   : > { %v4385_v41 = vmul.f32 %v6550_v57, %v4377_v9  ;;  %v6319_v9 = vpack.c.bf16 %v4516_v12, %v4515_v2  ;;  %v6334_v57 = vpack.c.bf16 %v5220_v31, %v5219_v15 }
0x1697   : > { %v4390_v26 = vmul.f32 %v5204_v10, %v4385_v41  ;;  %v5208_v10 = vld [vmem:[%s8204_s11] ss:$0 sm:$0xff]  ;;  %v5215_v41 = vld [vmem:[%s8198_s5 + $0x1b] ss:$0 sm:$0xff] }
0x1699   : > { %v4395_v19 = vadd.f32 %v5205_v45, %v4390_v26 }
0x169b   : > { %v4398_v32 = vsel %vm643_vm1, %v4395_v19, 0.0 }
0x169c   : > { %4399 = vadd.xlane.f32.xlu0 %v4398_v32 }
0x1729   : > { %v4400_v5 = vpop.xlane.xlu0 %4399 }
0x172a   : > { %v4401_v1 = vmul.f32 0.03125, %v4400_v5 }
0x172c   : > { %v4402_v36 = vsub.f32 %v4395_v19, %v4401_v1 }
0x172e   : > { %v4403_v27 = vmul.f32 %v4402_v36, %v4402_v36 }
0x1730   : > { %v4404_v38 = vsel %vm643_vm1, %v4403_v27, 0.0  ;;  %v5223_v27 = vld [vmem:[%s8202_s9 + $0x20] sm:$0xff] }
0x1731   : > { %4405 = vadd.xlane.f32.xlu1 %v4404_v38  ;;  %v5224_v38 = vld [vmem:[%s8202_s9 + $0x28] sm:$0xff] }
0x1732   : > { %v6337_v52 = vpack.c.bf16 %v5224_v38, %v5223_v27 }
0x17be   : > { %v4406_v6 = vpop.xlane.xlu1 %4405 }
0x17bf   : > { %v4407_v33 = vmul.f32 0.03125, %v4406_v6 }
0x17c1   : > { %v4408_v29 = vadd.f32 1e-05, %v4407_v33 }
0x17c3   : > { %6551 = vrsqrt.f32 %v4408_v29 }
0x17cd   : > { %v6552_v44 = vpop.eup %6551 }
0x17ce   : > { %v4410_v16 = vmul.f32 %v6552_v44, %v4402_v36 }
0x17d0   : > { %v4415_v13 = vmul.f32 %v5206_v20, %v4410_v16 }
0x17d2   : > { %v4420_v35 = vadd.f32 %v5207_v17, %v4415_v13 }
0x17d4   : > { %6014 = vmatmul.mubr.msk.f32.vlgmr.msra.gmra.mrb[82].mxu0 %vm643_vm1, %v4420_v35  ;;  %6060 = vmatmul.mubr.msk.f32.vlgmr.msra.gmra.mrb[86].mxu1 %vm643_vm1, %v4420_v35 }
0x17d5   : > { %6302 = vmatpush3.bf16.msra.mxu0 %v6301_v53  ;;  %6332 = vmatpush3.bf16.msra.mxu1 %v6331_v3 }
0x17d6   : > { %6303 = vmatprep.subr.bf16.mxu0 %v6574_v51  ;;  %6333 = vmatprep.subr.bf16.mxu1 %v6574_v51 }
0x17d7   : > { %6048 = vmatprep.mubr.msk.f32.mxu0 %vm6575_vm14, %v6573_v4  ;;  %6070 = vmatprep.mubr.msk.f32.mxu1 %vm6575_vm14, %v6573_v4 }
0x17d9   : > { %6305 = vmatpush3.bf16.msra.mxu0 %v6304_v7  ;;  %6335 = vmatpush3.bf16.msra.mxu1 %v6334_v57 }
0x17da   : > { %6306 = vmatprep.subr.bf16.mxu0 %v6574_v51  ;;  %6336 = vmatprep.subr.bf16.mxu1 %v6574_v51 }
0x17dd   : > { %6308 = vmatpush3.bf16.msra.mxu0 %v6307_v56 }
0x17de   : > { %6309 = vmatprep.subr.bf16.mxu0 %v6574_v51 }
0x17e1   : > { %6311 = vmatpush3.bf16.msra.mxu0 %v6310_v8 }
0x17e2   : > { %6312 = vmatprep.subr.bf16.mxu0 %v6574_v51 }
0x17e5   : > { %6314 = vmatpush3.bf16.msra.mxu0 %v6313_v40 }
0x17e6   : > { %6315 = vmatprep.subr.bf16.mxu0 %v6574_v51 }
0x17e9   : > { %6317 = vmatpush3.bf16.msra.mxu0 %v6316_v25 }
0x17ea   : > { %6318 = vmatprep.subr.bf16.mxu0 %v6574_v51 }
0x17ed   : > { %6320 = vmatpush3.bf16.msra.mxu0 %v6319_v9 }
0x17ee   : > { %6321 = vmatprep.subr.bf16.mxu0 %v6574_v51 }
0x17f1   : > { %6323 = vmatpush3.bf16.msra.mxu0 %v6322_v18 }
0x18a7   : > { %v4499_v45 = vpop.f32.mrb[82].mxu0  ;;  %v4671_v26 = vpop.f32.mrb[86].mxu1 }
0x18a8   : > { %v4500_v19 = vadd.f32 %v5208_v10, %v4499_v45  ;;  %v4672_v32 = vadd.f32 %v5215_v41, %v4671_v26  ;;  %v6015_v5 = vpop.f32.mrb[83].mxu0  ;;  %v6061_v1 = vpop.f32.mrb[87].mxu1 }
0x18aa   : > { %v4675_v36 = vmax.f32 %v4672_v32, 0.0  ;;  %6049 = vmatmul.mubr.f32.vlgmr.msra.gmra.mrb[84].mxu0 %v4500_v19 }
0x18ac   : > { %6071 = vmatmul.mubr.msk.f32.vlgmr.msra.gmra.mrb[88].mxu1 %vm643_vm1, %v4675_v36 }
0x18ad   : > { %6081 = vmatprep.mubr.msk.f32.mxu1 %vm6575_vm14, %v6573_v4  ;;  %6338 = vmatpush3.bf16.msra.mxu1 %v6337_v52  ;;  %v5226_v4 = vld [vmem:[%s8202_s9 + $0x38] sm:$0xff] }
0x18ae   : > { %6339 = vmatprep.subr.bf16.mxu1 %v6574_v51  ;;  %v6340_v0 = vpack.c.bf16 %v5226_v4, %v5225_v59 }
0x18b1   : > { %6341 = vmatpush3.bf16.msra.mxu1 %v6340_v0 }
0x197d   : > { %v4590_v51 = vpop.f32.mrb[84].mxu0 }
0x197e   : > { %v4591_v60 = vadd.f32 %v5210_v49, %v4590_v51  ;;  %v6050_v42 = vpop.f32.mrb[85].mxu0 }
0x197f   : > { %v4755_v21 = vpop.f32.mrb[88].mxu1 }
0x1980   : > { %4594 = vst [vmem:[%s445_s29] sm:$0xff] %v4591_v60  ;;  %v4756_v28 = vadd.f32 %v5221_v24, %v4755_v21  ;;  %v6072_v46 = vpop.f32.mrb[89].mxu1 }
0x1982   : > { %v4759_v14 = vmax.f32 %v4756_v28, 0.0 }
0x1984   : > { %6082 = vmatmul.mubr.msk.f32.vlgmr.msra.gmra.mrb[90].mxu1 %vm643_vm1, %v4759_v14 }
0x1a57   : > { %v4839_v6 = vpop.f32.mrb[90].mxu1 }
0x1a58   : > { %v4840_v33 = vadd.f32 %v5227_v63, %v4839_v6  ;;  %v6083_v29 = vpop.f32.mrb[91].mxu1 }
0x1a5a   : > { %v4843_v44 = vsub.f32 0.0, %v4840_v33 }
0x1a5c   : > { %v4844_v20 = vmul.f32 1.442695, %v4843_v44 }
0x1a5e   : > { %6553 = vpow2.f32 %v4844_v20 }
0x1a68   : > { %v6554_v22 = vpop.eup %6553 }
0x1a69   : > { %v4846_v16 = vadd.f32 1.0, %v6554_v22 }
0x1a6b   : > { %6555 = vrcp.f32 %v4846_v16 }
0x1a75   : > { %v6556_v47 = vpop.eup %6555 }
0x1a76   : > { %4849 = vst [vmem:[%s449_s18] sm:$0xff] %v6556_v47 }
0x1a77 PF: > { %s24_s25 = sadd.s32 1, %s6571_s25  }
0x1a78   : > { %p21_p4 = scmp.ge.s32.totalorder %s24_s25, 4  }
0x1a7a   :  { %23 = sbr.rel (!%p21_p4) target bundleno = 1 (0x1), region = 126 }

</bundles_post_ra>
